<compile_context>
chip_gen: v5e
topology: v5e:2x2
jax: 0.10.0
libtpu: 0.0.40
codegen_flags: <defaults>
</compile_context>

<pallas_src>
import math

import jax
import jax.numpy as jnp
from jax import lax
from jax.experimental import pallas as pl
from jax.experimental.pallas import tpu as pltpu


# ---------------------------------------------------------------------------
# In-kernel building blocks (operate on VMEM values; traced once per kernel)
# ---------------------------------------------------------------------------
def _tap_select(h, l_out, k_off, stride, pad, sel_cache):
    """Gather conv tap rows: result[b, t, :] = h[b, stride*t + k_off - pad, :] (0 if OOB)."""
    batch, l_in, _ = h.shape
    if stride == 1 and k_off == pad and l_out == l_in:
        return h  # identity tap of a 'same' conv — no gather needed
    key = ("conv", l_out, l_in, k_off, stride, pad)
    if key not in sel_cache:
        t = lax.broadcasted_iota(jnp.int32, (batch, l_out, l_in), 1)
        s = lax.broadcasted_iota(jnp.int32, (batch, l_out, l_in), 2)
        sel_cache[key] = jnp.where(
            s == stride * t + (k_off - pad), 1.0, 0.0
        ).astype(jnp.float32)
    # batched matmul (same dot_general form as the reference flash kernel) -> MXU
    return jnp.einsum("bts,bsc->btc", sel_cache[key], h,
                      preferred_element_type=jnp.float32)


def _upsample2(h, sel_cache):
    """Nearest-neighbour x2 upsample along time, fused in-kernel (no HBM round trip)."""
    batch, l_in, _ = h.shape
    key = ("up", l_in)
    if key not in sel_cache:
        j = lax.broadcasted_iota(jnp.int32, (batch, 2 * l_in, l_in), 1)
        s = lax.broadcasted_iota(jnp.int32, (batch, 2 * l_in, l_in), 2)
        sel_cache[key] = jnp.where(
            (j == 2 * s) | (j == 2 * s + 1), 1.0, 0.0
        ).astype(jnp.float32)
    return jnp.einsum("bts,bsc->btc", sel_cache[key], h,
                      preferred_element_type=jnp.float32)


def _conv1d_fused(h, w, b, *, stride, pad, sel_cache, slope=None, residual=None):
    """Conv1d on channels-last h: (B, Li, Cin); w: (K, Cin, Cout); b: (1, Cout).

    Optional fused LeakyReLU (slope) OR residual add (never both — matches the module:
    the second ResBlock conv adds the residual with no activation)."""
    assert slope is None or residual is None
    batch, l_in, _ = h.shape
    k_taps, c_in, c_out = w.shape
    l_out = (l_in + 2 * pad - k_taps) // stride + 1

    acc = None
    for k in range(k_taps):
        tap = _tap_select(h, l_out, k, stride, pad, sel_cache)          # (B, Lo, Cin)
        term = jnp.dot(tap.reshape(batch * l_out, c_in), w[k],          # batch fused
                       preferred_element_type=jnp.float32)              # into matmul M
        acc = term if acc is None else acc + term
    y = acc.reshape(batch, l_out, c_out) + b                            # bias
    if slope is not None:
        y = jnp.where(y >= 0.0, y, y * slope)                           # LeakyReLU
    if residual is not None:
        y = y + residual
    return y


def _resblock_fused(h, w1, b1, w2, b2, sel_cache):
    out = _conv1d_fused(h, w1, b1, stride=1, pad=1, sel_cache=sel_cache, slope=0.2)
    return _conv1d_fused(out, w2, b2, stride=1, pad=1, sel_cache=sel_cache, residual=h)


# ---------------------------------------------------------------------------
# Pallas kernels
# ---------------------------------------------------------------------------
def _make_encoder_kernel(n_stages):
    """x -> n x [down-conv(4,2,1) + LReLU(0.2) + ResBlock], all fused in one kernel."""
    def kernel(x_ref, *refs):
        o_ref = refs[-1]
        w_refs = refs[:-1]          # 6 arrays per stage: wd, bd, w1, b1, w2, b2
        sel_cache = {}
        h = x_ref[...]
        for i in range(n_stages):
            wd, bd, w1, b1, w2, b2 = [r[...] for r in w_refs[6 * i:6 * (i + 1)]]
            h = _conv1d_fused(h, wd, bd, stride=2, pad=1,
                              sel_cache=sel_cache, slope=0.2)
            h = _resblock_fused(h, w1, b1, w2, b2, sel_cache)
        o_ref[...] = h.astype(o_ref.dtype)
    return kernel


def _latent_kernel(x_ref, wmu_ref, bmu_ref, wlv_ref, blv_ref, eps_ref,
                   z_ref, mu_ref, logvar_ref):
    """fc_mu + fc_logvar + reparameterize fused (exp runs on the EUP path)."""
    batch, l, c = x_ref.shape
    x2 = x_ref[...].reshape(batch * l, c)
    mu = jnp.dot(x2, wmu_ref[...], preferred_element_type=jnp.float32) + bmu_ref[...]
    logvar = jnp.dot(x2, wlv_ref[...], preferred_element_type=jnp.float32) + blv_ref[...]
    std = jnp.exp(0.5 * logvar)
    z = mu + eps_ref[...].reshape(batch * l, c) * std
    mu_ref[...] = mu.reshape(batch, l, c).astype(mu_ref.dtype)
    logvar_ref[...] = logvar.reshape(batch, l, c).astype(logvar_ref.dtype)
    z_ref[...] = z.reshape(batch, l, c).astype(z_ref.dtype)


def _make_decoder_kernel(n_stages):
    """2 ResBlocks + n x [nearest-x2 upsample + conv3 + LReLU] + final conv3, fused."""
    def kernel(x_ref, *refs):
        o_ref = refs[-1]
        w_refs = refs[:-1]
        sel_cache = {}
        h = x_ref[...]
        idx = 0
        for _ in range(2):                                   # two ResBlocks
            w1, b1, w2, b2 = [r[...] for r in w_refs[idx:idx + 4]]
            idx += 4
            h = _resblock_fused(h, w1, b1, w2, b2, sel_cache)
        for _ in range(n_stages):                            # upsample + conv + LReLU
            w, b = [r[...] for r in w_refs[idx:idx + 2]]
            idx += 2
            h = _upsample2(h, sel_cache)
            h = _conv1d_fused(h, w, b, stride=1, pad=1,
                              sel_cache=sel_cache, slope=0.2)
        wf, bf = [r[...] for r in w_refs[idx:idx + 2]]       # final conv (no activation)
        h = _conv1d_fused(h, wf, bf, stride=1, pad=1, sel_cache=sel_cache)
        o_ref[...] = h.astype(o_ref.dtype)
    return kernel


# ---------------------------------------------------------------------------
# Parameters (xavier-normal conv/linear weights, zero bias — as in the module)
# ---------------------------------------------------------------------------
def _conv_params(key, cin, cout, k):
    std = math.sqrt(2.0 / (cin * k + cout * k))                # torch xavier_normal_
    w = jax.random.normal(key, (k, cin, cout), jnp.float32) * std
    return {"w": w, "b": jnp.zeros((1, cout), jnp.float32)}


def _linear_params(key, cin, cout):
    std = math.sqrt(2.0 / (cin + cout))
    w = jax.random.normal(key, (cin, cout), jnp.float32) * std
    return {"w": w, "b": jnp.zeros((1, cout), jnp.float32)}


def _resblock_params(key, c):
    k1, k2 = jax.random.split(key)
    return {"c1": _conv_params(k1, c, c, 3), "c2": _conv_params(k2, c, c, 3)}


def make_params(key, *, vae_test_dim, vae_length, vae_layer):
    C, Din, n = vae_length, vae_test_dim, vae_layer
    keys = iter(jax.random.split(key, 64))

    enc, cin = [], Din
    for _ in range(n):                                      # VQEncoderV3
        enc.append({"down": _conv_params(next(keys), cin, C, 4),
                    "res": _resblock_params(next(keys), C)})
        cin = C

    channels = [C] * n + [Din]                              # VQDecoderV3 (no input conv)
    dec_res = [_resblock_params(next(keys), channels[0]) for _ in range(2)]
    dec_up = [_conv_params(next(keys), channels[i], channels[i + 1], 3) for i in range(n)]
    dec_final = _conv_params(next(keys), channels[-1], channels[-1], 3)

    fc_mu = _linear_params(next(keys), C, C)
    fc_logvar = _linear_params(next(keys), C, C)

    return {"enc": enc, "dec_res": dec_res, "dec_up": dec_up,
            "dec_final": dec_final, "fc_mu": fc_mu, "fc_logvar": fc_logvar}


# ---------------------------------------------------------------------------
# Forward pass: exactly three pallas_calls
# ---------------------------------------------------------------------------
def vae_conv_forward(params, inputs, eps, variational=True):
    n = len(params["enc"])
    B, T, Din = inputs.shape
    C = params["fc_mu"]["w"].shape[0]
    Lo = T // (2 ** n)
    vmem = pl.BlockSpec(memory_space=pltpu.MemorySpace.VMEM)

    # ---- encoder (one fused kernel) ----
    enc_args = [inputs]
    for st in params["enc"]:
        enc_args += [st["down"]["w"], st["down"]["b"],
                     st["res"]["c1"]["w"], st["res"]["c1"]["b"],
                     st["res"]["c2"]["w"], st["res"]["c2"]["b"]]
    pre_latent = pl.pallas_call(
        _make_encoder_kernel(n),
        out_shape=jax.ShapeDtypeStruct((B, Lo, C), inputs.dtype),
        in_specs=[vmem] * len(enc_args),
        out_specs=vmem,
    )(*enc_args)

    mu = logvar = None
    if variational:
        # ---- fc_mu + fc_logvar + reparameterize (one fused kernel) ----
        z, mu, logvar = pl.pallas_call(
            _latent_kernel,
            out_shape=(jax.ShapeDtypeStruct((B, Lo, C), inputs.dtype),) * 3,
            in_specs=[vmem] * 6,
            out_specs=(vmem,) * 3,
        )(pre_latent, params["fc_mu"]["w"], params["fc_mu"]["b"],
          params["fc_logvar"]["w"], params["fc_logvar"]["b"], eps)
        pre_latent = z

    # ---- decoder (one fused kernel) ----
    dec_args = [pre_latent]
    for r in params["dec_res"]:
        dec_args += [r["c1"]["w"], r["c1"]["b"], r["c2"]["w"], r["c2"]["b"]]
    for u in params["dec_up"]:
        dec_args += [u["w"], u["b"]]
    dec_args += [params["dec_final"]["w"], params["dec_final"]["b"]]
    rec_pose = pl.pallas_call(
        _make_decoder_kernel(n),
        out_shape=jax.ShapeDtypeStruct((B, T, Din), inputs.dtype),
        in_specs=[vmem] * len(dec_args),
        out_specs=vmem,
    )(*dec_args)

    return {"poses_feat": pre_latent, "rec_pose": rec_pose,
            "pose_mu": mu, "pose_logvar": logvar}


# ---------------------------------------------------------------------------
# Pure-JAX (XLA) reference of the same forward pass, for a numerical self-check
# ---------------------------------------------------------------------------
def _ref_conv1d(x, w, b, stride, pad, slope=None, residual=None):
    B, L, _ = x.shape
    K, _, Cout = w.shape
    Lo = (L + 2 * pad - K) // stride + 1
    xp = jnp.pad(x, ((0, 0), (pad, pad), (0, 0)))
    y = jnp.zeros((B, Lo, Cout), jnp.float32) + b
    for k in range(K):
        win = xp[:, k:k + stride * (Lo - 1) + 1:stride, :]
        y = y + jnp.einsum("blc,cd->bld", win, w[k])
    if slope is not None:
        y = jnp.where(y >= 0.0, y, y * slope)
    if residual is not None:
        y = y + residual
    return y


def _ref_resblock(x, p):
    h = _ref_conv1d(x, p["c1"]["w"], p["c1"]["b"], 1, 1, slope=0.2)
    return _ref_conv1d(h, p["c2"]["w"], p["c2"]["b"], 1, 1, residual=x)


def vae_conv_reference(params, x, eps, variational=True):
    h = x
    for st in params["enc"]:
        h = _ref_conv1d(h, st["down"]["w"], st["down"]["b"], 2, 1, slope=0.2)
        h = _ref_resblock(h, st["res"])
    mu = logvar = None
    if variational:
        mu = jnp.einsum("blc,cd->bld", h, params["fc_mu"]["w"]) + params["fc_mu"]["b"]
        logvar = jnp.einsum("blc,cd->bld", h, params["fc_logvar"]["w"]) + params["fc_logvar"]["b"]
        h = mu + eps * jnp.exp(0.5 * logvar)
    z = h
    for r in params["dec_res"]:
        h = _ref_resblock(h, r)
    for u in params["dec_up"]:
        h = jnp.repeat(h, 2, axis=1)
        h = _ref_conv1d(h, u["w"], u["b"], 1, 1, slope=0.2)
    rec = _ref_conv1d(h, params["dec_final"]["w"], params["dec_final"]["b"], 1, 1)
    return {"poses_feat": z, "rec_pose": rec, "pose_mu": mu, "pose_logvar": logvar}


# ---------------------------------------------------------------------------
if __name__ == "__main__":
    B, T = 2, 16
    vae_test_dim, vae_length, vae_layer = 16, 32, 2
    Lo = T // (2 ** vae_layer)

    root = jax.random.PRNGKey(0)
    k_params, k_x, k_eps = jax.random.split(root, 3)

    params = make_params(k_params, vae_test_dim=vae_test_dim,
                         vae_length=vae_length, vae_layer=vae_layer)
    x = jax.random.normal(k_x, (B, T, vae_test_dim), jnp.float32)
    eps = jax.random.normal(k_eps, (B, Lo, vae_length), jnp.float32)  # randn_like(std)

    fwd = jax.jit(vae_conv_forward, static_argnames=("variational",))
    out = fwd(params, x, eps, variational=True)
    out = jax.block_until_ready(out)

    assert out["poses_feat"].shape == (B, Lo, vae_length)
    assert out["rec_pose"].shape == (B, T, vae_test_dim)
    assert out["pose_mu"].shape == (B, Lo, vae_length)
    assert out["pose_logvar"].shape == (B, Lo, vae_length)

    # numerical self-check vs pure-JAX reference (loose tol for matmul precision diffs)
    ref = jax.jit(vae_conv_reference, static_argnames=("variational",))(
        params, x, eps, variational=True)
    ref = jax.block_until_ready(ref)
    for name in ("poses_feat", "rec_pose", "pose_mu", "pose_logvar"):
        err = float(jnp.max(jnp.abs(out[name] - ref[name])))
        assert err < 0.15, f"{name}: max abs err {err}"

    print("KERNEL_OK")
</pallas_src>

<mosaic_0001>
module attributes {stable_mosaic.version = 11 : i64} {
  func.func @_latent_kernel(%arg0: memref<2x4x32xf32, #tpu.memory_space<vmem>>, %arg1: memref<32x32xf32, #tpu.memory_space<vmem>>, %arg2: memref<1x32xf32, #tpu.memory_space<vmem>>, %arg3: memref<32x32xf32, #tpu.memory_space<vmem>>, %arg4: memref<1x32xf32, #tpu.memory_space<vmem>>, %arg5: memref<2x4x32xf32, #tpu.memory_space<vmem>>, %arg6: memref<2x4x32xf32, #tpu.memory_space<vmem>>, %arg7: memref<2x4x32xf32, #tpu.memory_space<vmem>>, %arg8: memref<2x4x32xf32, #tpu.memory_space<vmem>>) attributes {dimension_semantics = [], scalar_prefetch = 0 : i64, scratch_operands = 0 : i64, tpu.core_type = #tpu.core_type<tc>} {
    %c0 = arith.constant 0 : index
    %c0_0 = arith.constant 0 : index
    %c0_1 = arith.constant 0 : index
    %0 = vector.load %arg0[%c0, %c0_0, %c0_1] : memref<2x4x32xf32, #tpu.memory_space<vmem>>, vector<2x4x32xf32>
    %1 = vector.shape_cast %0 : vector<2x4x32xf32> to vector<8x32xf32>
    %c0_2 = arith.constant 0 : index
    %c0_3 = arith.constant 0 : index
    %2 = vector.load %arg1[%c0_2, %c0_3] : memref<32x32xf32, #tpu.memory_space<vmem>>, vector<32x32xf32>
    %cst = arith.constant dense<0.000000e+00> : vector<8x32xf32>
    %3 = tpu.matmul %1, %2, %cst {dimension_numbers = #tpu.dot_dimension_numbers<[1], [0], [0], [1], [0, 0, 1, 1], [], []>} : vector<8x32xf32>, vector<32x32xf32>, vector<8x32xf32> -> vector<8x32xf32>
    %c0_4 = arith.constant 0 : index
    %c0_5 = arith.constant 0 : index
    %4 = vector.load %arg2[%c0_4, %c0_5] : memref<1x32xf32, #tpu.memory_space<vmem>>, vector<1x32xf32>
    %5 = vector.broadcast %4 : vector<1x32xf32> to vector<8x32xf32>
    %6 = arith.addf %3, %5 : vector<8x32xf32>
    %c0_6 = arith.constant 0 : index
    %c0_7 = arith.constant 0 : index
    %7 = vector.load %arg3[%c0_6, %c0_7] : memref<32x32xf32, #tpu.memory_space<vmem>>, vector<32x32xf32>
    %cst_8 = arith.constant dense<0.000000e+00> : vector<8x32xf32>
    %8 = tpu.matmul %1, %7, %cst_8 {dimension_numbers = #tpu.dot_dimension_numbers<[1], [0], [0], [1], [0, 0, 1, 1], [], []>} : vector<8x32xf32>, vector<32x32xf32>, vector<8x32xf32> -> vector<8x32xf32>
    %c0_9 = arith.constant 0 : index
    %c0_10 = arith.constant 0 : index
    %9 = vector.load %arg4[%c0_9, %c0_10] : memref<1x32xf32, #tpu.memory_space<vmem>>, vector<1x32xf32>
    %10 = vector.broadcast %9 : vector<1x32xf32> to vector<8x32xf32>
    %11 = arith.addf %8, %10 : vector<8x32xf32>
    %cst_11 = arith.constant 5.000000e-01 : f32
    %12 = vector.broadcast %cst_11 : f32 to vector<8x32xf32>
    %13 = arith.mulf %12, %11 : vector<8x32xf32>
    %14 = math.exp %13 : vector<8x32xf32>
    %c0_12 = arith.constant 0 : index
    %c0_13 = arith.constant 0 : index
    %c0_14 = arith.constant 0 : index
    %15 = vector.load %arg5[%c0_12, %c0_13, %c0_14] : memref<2x4x32xf32, #tpu.memory_space<vmem>>, vector<2x4x32xf32>
    %16 = vector.shape_cast %15 : vector<2x4x32xf32> to vector<8x32xf32>
    %17 = arith.mulf %16, %14 : vector<8x32xf32>
    %18 = arith.addf %6, %17 : vector<8x32xf32>
    %19 = vector.shape_cast %6 : vector<8x32xf32> to vector<2x4x32xf32>
    %c0_15 = arith.constant 0 : index
    %c0_16 = arith.constant 0 : index
    %c0_17 = arith.constant 0 : index
    %20 = vector.load %arg7[%c0_15, %c0_16, %c0_17] : memref<2x4x32xf32, #tpu.memory_space<vmem>>, vector<2x4x32xf32>
    tpu.vector_store %arg7[%c0_15, %c0_16, %c0_17], %19 {strides = array<i32>} : memref<2x4x32xf32, #tpu.memory_space<vmem>>, vector<2x4x32xf32>,
    %21 = vector.shape_cast %11 : vector<8x32xf32> to vector<2x4x32xf32>
    %c0_18 = arith.constant 0 : index
    %c0_19 = arith.constant 0 : index
    %c0_20 = arith.constant 0 : index
    %22 = vector.load %arg8[%c0_18, %c0_19, %c0_20] : memref<2x4x32xf32, #tpu.memory_space<vmem>>, vector<2x4x32xf32>
    tpu.vector_store %arg8[%c0_18, %c0_19, %c0_20], %21 {strides = array<i32>} : memref<2x4x32xf32, #tpu.memory_space<vmem>>, vector<2x4x32xf32>,
    %23 = vector.shape_cast %18 : vector<8x32xf32> to vector<2x4x32xf32>
    %c0_21 = arith.constant 0 : index
    %c0_22 = arith.constant 0 : index
    %c0_23 = arith.constant 0 : index
    %24 = vector.load %arg6[%c0_21, %c0_22, %c0_23] : memref<2x4x32xf32, #tpu.memory_space<vmem>>, vector<2x4x32xf32>
    tpu.vector_store %arg6[%c0_21, %c0_22, %c0_23], %23 {strides = array<i32>} : memref<2x4x32xf32, #tpu.memory_space<vmem>>, vector<2x4x32xf32>,
    return
  }
}

module attributes {stable_mosaic.version = 11 : i64} {
  func.func @kernel(%arg0: memref<2x4x32xf32, #tpu.memory_space<vmem>>, %arg1: memref<3x32x32xf32, #tpu.memory_space<vmem>>, %arg2: memref<1x32xf32, #tpu.memory_space<vmem>>, %arg3: memref<3x32x32xf32, #tpu.memory_space<vmem>>, %arg4: memref<1x32xf32, #tpu.memory_space<vmem>>, %arg5: memref<3x32x32xf32, #tpu.memory_space<vmem>>, %arg6: memref<1x32xf32, #tpu.memory_space<vmem>>, %arg7: memref<3x32x32xf32, #tpu.memory_space<vmem>>, %arg8: memref<1x32xf32, #tpu.memory_space<vmem>>, %arg9: memref<3x32x32xf32, #tpu.memory_space<vmem>>, %arg10: memref<1x32xf32, #tpu.memory_space<vmem>>, %arg11: memref<3x32x16xf32, #tpu.memory_space<vmem>>, %arg12: memref<1x16xf32, #tpu.memory_space<vmem>>, %arg13: memref<3x16x16xf32, #tpu.memory_space<vmem>>, %arg14: memref<1x16xf32, #tpu.memory_space<vmem>>, %arg15: memref<2x16x16xf32, #tpu.memory_space<vmem>>) attributes {dimension_semantics = [], scalar_prefetch = 0 : i64, scratch_operands = 0 : i64, tpu.core_type = #tpu.core_type<tc>} {
    %c0 = arith.constant 0 : index
    %c0_0 = arith.constant 0 : index
    %c0_1 = arith.constant 0 : index
    %0 = vector.load %arg0[%c0, %c0_0, %c0_1] : memref<2x4x32xf32, #tpu.memory_space<vmem>>, vector<2x4x32xf32>
    %c0_2 = arith.constant 0 : index
    %c0_3 = arith.constant 0 : index
    %c0_4 = arith.constant 0 : index
    %1 = vector.load %arg1[%c0_2, %c0_3, %c0_4] : memref<3x32x32xf32, #tpu.memory_space<vmem>>, vector<3x32x32xf32>
    %c0_5 = arith.constant 0 : index
    %c0_6 = arith.constant 0 : index
    %2 = vector.load %arg2[%c0_5, %c0_6] : memref<1x32xf32, #tpu.memory_space<vmem>>, vector<1x32xf32>
    %c0_7 = arith.constant 0 : index
    %c0_8 = arith.constant 0 : index
    %c0_9 = arith.constant 0 : index
    %3 = vector.load %arg3[%c0_7, %c0_8, %c0_9] : memref<3x32x32xf32, #tpu.memory_space<vmem>>, vector<3x32x32xf32>
    %c0_10 = arith.constant 0 : index
    %c0_11 = arith.constant 0 : index
    %4 = vector.load %arg4[%c0_10, %c0_11] : memref<1x32xf32, #tpu.memory_space<vmem>>, vector<1x32xf32>
    %5 = tpu.iota {dimensions = array<i32: 1>} : vector<2x4x4xi32>
    %6 = tpu.iota {dimensions = array<i32: 2>} : vector<2x4x4xi32>
    %c1_i32 = arith.constant 1 : i32
    %7 = vector.broadcast %c1_i32 : i32 to vector<2x4x4xi32>
    %8 = arith.muli %7, %5 : vector<2x4x4xi32>
    %c-1_i32 = arith.constant -1 : i32
    %9 = vector.broadcast %c-1_i32 : i32 to vector<2x4x4xi32>
    %10 = arith.addi %8, %9 : vector<2x4x4xi32>
    %11 = arith.cmpi eq, %6, %10 : vector<2x4x4xi32>
    %cst = arith.constant 1.000000e+00 : f32
    %cst_12 = arith.constant 0.000000e+00 : f32
    %12 = vector.broadcast %cst : f32 to vector<2x4x4xf32>
    %13 = vector.broadcast %cst_12 : f32 to vector<2x4x4xf32>
    %14 = arith.select %11, %12, %13 : vector<2x4x4xi1>, vector<2x4x4xf32>
    "tpu.trace_start"() <{level = 10 : i32, message = "bts,bsc->btc"}> : () -> ()
    %cst_13 = arith.constant dense<0.000000e+00> : vector<2x4x32xf32>
    %15 = tpu.matmul %14, %0, %cst_13 {dimension_numbers = #tpu.dot_dimension_numbers<[2], [1], [1], [2], [0, 0, 0, 1, 1, 2], [0], [0]>} : vector<2x4x4xf32>, vector<2x4x32xf32>, vector<2x4x32xf32> -> vector<2x4x32xf32>
    "tpu.trace_stop"() : () -> ()
    %16 = vector.shape_cast %15 : vector<2x4x32xf32> to vector<8x32xf32>
    %17 = vector.extract_strided_slice %1 {offsets = [0, 0, 0], sizes = [1, 32, 32], strides = [1, 1, 1]} : vector<3x32x32xf32> to vector<1x32x32xf32>
    %18 = vector.shape_cast %17 : vector<1x32x32xf32> to vector<32x32xf32>
    %cst_14 = arith.constant dense<0.000000e+00> : vector<8x32xf32>
    %19 = tpu.matmul %16, %18, %cst_14 {dimension_numbers = #tpu.dot_dimension_numbers<[1], [0], [0], [1], [0, 0, 1, 1], [], []>} : vector<8x32xf32>, vector<32x32xf32>, vector<8x32xf32> -> vector<8x32xf32>
    %20 = vector.shape_cast %0 : vector<2x4x32xf32> to vector<8x32xf32>
    %21 = vector.extract_strided_slice %1 {offsets = [1, 0, 0], sizes = [1, 32, 32], strides = [1, 1, 1]} : vector<3x32x32xf32> to vector<1x32x32xf32>
    %22 = vector.shape_cast %21 : vector<1x32x32xf32> to vector<32x32xf32>
    %cst_15 = arith.constant dense<0.000000e+00> : vector<8x32xf32>
    %23 = tpu.matmul %20, %22, %cst_15 {dimension_numbers = #tpu.dot_dimension_numbers<[1], [0], [0], [1], [0, 0, 1, 1], [], []>} : vector<8x32xf32>, vector<32x32xf32>, vector<8x32xf32> -> vector<8x32xf32>
    %24 = arith.addf %19, %23 : vector<8x32xf32>
    %25 = tpu.iota {dimensions = array<i32: 1>} : vector<2x4x4xi32>
    %26 = tpu.iota {dimensions = array<i32: 2>} : vector<2x4x4xi32>
    %c1_i32_16 = arith.constant 1 : i32
    %27 = vector.broadcast %c1_i32_16 : i32 to vector<2x4x4xi32>
    %28 = arith.muli %27, %25 : vector<2x4x4xi32>
    %c1_i32_17 = arith.constant 1 : i32
    %29 = vector.broadcast %c1_i32_17 : i32 to vector<2x4x4xi32>
    %30 = arith.addi %28, %29 : vector<2x4x4xi32>
    %31 = arith.cmpi eq, %26, %30 : vector<2x4x4xi32>
    %cst_18 = arith.constant 1.000000e+00 : f32
    %cst_19 = arith.constant 0.000000e+00 : f32
    %32 = vector.broadcast %cst_18 : f32 to vector<2x4x4xf32>
    %33 = vector.broadcast %cst_19 : f32 to vector<2x4x4xf32>
    %34 = arith.select %31, %32, %33 : vector<2x4x4xi1>, vector<2x4x4xf32>
    "tpu.trace_start"() <{level = 10 : i32, message = "bts,bsc->btc"}> : () -> ()
    %cst_20 = arith.constant dense<0.000000e+00> : vector<2x4x32xf32>
    %35 = tpu.matmul %34, %0, %cst_20 {dimension_numbers = #tpu.dot_dimension_numbers<[2], [1], [1], [2], [0, 0, 0, 1, 1, 2], [0], [0]>} : vector<2x4x4xf32>, vector<2x4x32xf32>, vector<2x4x32xf32> -> vector<2x4x32xf32>
    "tpu.trace_stop"() : () -> ()
    %36 = vector.shape_cast %35 : vector<2x4x32xf32> to vector<8x32xf32>
    %37 = vector.extract_strided_slice %1 {offsets = [2, 0, 0], sizes = [1, 32, 32], strides = [1, 1, 1]} : vector<3x32x32xf32> to vector<1x32x32xf32>
    %38 = vector.shape_cast %37 : vector<1x32x32xf32> to vector<32x32xf32>
    %cst_21 = arith.constant dense<0.000000e+00> : vector<8x32xf32>
    %39 = tpu.matmul %36, %38, %cst_21 {dimension_numbers = #tpu.dot_dimension_numbers<[1], [0], [0], [1], [0, 0, 1, 1], [], []>} : vector<8x32xf32>, vector<32x32xf32>, vector<8x32xf32> -> vector<8x32xf32>
    %40 = arith.addf %24, %39 : vector<8x32xf32>
    %41 = vector.shape_cast %40 : vector<8x32xf32> to vector<2x4x32xf32>
    %42 = vector.shape_cast %2 : vector<1x32xf32> to vector<1x1x32xf32>
    %43 = vector.broadcast %42 : vector<1x1x32xf32> to vector<2x4x32xf32>
    %44 = arith.addf %41, %43 : vector<2x4x32xf32>
    %cst_22 = arith.constant 0.000000e+00 : f32
    %45 = vector.broadcast %cst_22 : f32 to vector<2x4x32xf32>
    %46 = arith.cmpf oge, %44, %45 : vector<2x4x32xf32>
    %cst_23 = arith.constant 2.000000e-01 : f32
    %47 = vector.broadcast %cst_23 : f32 to vector<2x4x32xf32>
    %48 = arith.mulf %44, %47 : vector<2x4x32xf32>
    %49 = arith.select %46, %44, %48 : vector<2x4x32xi1>, vector<2x4x32xf32>
    "tpu.trace_start"() <{level = 10 : i32, message = "bts,bsc->btc"}> : () -> ()
    %cst_24 = arith.constant dense<0.000000e+00> : vector<2x4x32xf32>
    %50 = tpu.matmul %14, %49, %cst_24 {dimension_numbers = #tpu.dot_dimension_numbers<[2], [1], [1], [2], [0, 0, 0, 1, 1, 2], [0], [0]>} : vector<2x4x4xf32>, vector<2x4x32xf32>, vector<2x4x32xf32> -> vector<2x4x32xf32>
    "tpu.trace_stop"() : () -> ()
    %51 = vector.shape_cast %50 : vector<2x4x32xf32> to vector<8x32xf32>
    %52 = vector.extract_strided_slice %3 {offsets = [0, 0, 0], sizes = [1, 32, 32], strides = [1, 1, 1]} : vector<3x32x32xf32> to vector<1x32x32xf32>
    %53 = vector.shape_cast %52 : vector<1x32x32xf32> to vector<32x32xf32>
    %cst_25 = arith.constant dense<0.000000e+00> : vector<8x32xf32>
    %54 = tpu.matmul %51, %53, %cst_25 {dimension_numbers = #tpu.dot_dimension_numbers<[1], [0], [0], [1], [0, 0, 1, 1], [], []>} : vector<8x32xf32>, vector<32x32xf32>, vector<8x32xf32> -> vector<8x32xf32>
    %55 = vector.shape_cast %49 : vector<2x4x32xf32> to vector<8x32xf32>
    %56 = vector.extract_strided_slice %3 {offsets = [1, 0, 0], sizes = [1, 32, 32], strides = [1, 1, 1]} : vector<3x32x32xf32> to vector<1x32x32xf32>
    %57 = vector.shape_cast %56 : vector<1x32x32xf32> to vector<32x32xf32>
    %cst_26 = arith.constant dense<0.000000e+00> : vector<8x32xf32>
    %58 = tpu.matmul %55, %57, %cst_26 {dimension_numbers = #tpu.dot_dimension_numbers<[1], [0], [0], [1], [0, 0, 1, 1], [], []>} : vector<8x32xf32>, vector<32x32xf32>, vector<8x32xf32> -> vector<8x32xf32>
    %59 = arith.addf %54, %58 : vector<8x32xf32>
    "tpu.trace_start"() <{level = 10 : i32, message = "bts,bsc->btc"}> : () -> ()
    %cst_27 = arith.constant dense<0.000000e+00> : vector<2x4x32xf32>
    %60 = tpu.matmul %34, %49, %cst_27 {dimension_numbers = #tpu.dot_dimension_numbers<[2], [1], [1], [2], [0, 0, 0, 1, 1, 2], [0], [0]>} : vector<2x4x4xf32>, vector<2x4x32xf32>, vector<2x4x32xf32> -> vector<2x4x32xf32>
    "tpu.trace_stop"() : () -> ()
    %61 = vector.shape_cast %60 : vector<2x4x32xf32> to vector<8x32xf32>
    %62 = vector.extract_strided_slice %3 {offsets = [2, 0, 0], sizes = [1, 32, 32], strides = [1, 1, 1]} : vector<3x32x32xf32> to vector<1x32x32xf32>
    %63 = vector.shape_cast %62 : vector<1x32x32xf32> to vector<32x32xf32>
    %cst_28 = arith.constant dense<0.000000e+00> : vector<8x32xf32>
    %64 = tpu.matmul %61, %63, %cst_28 {dimension_numbers = #tpu.dot_dimension_numbers<[1], [0], [0], [1], [0, 0, 1, 1], [], []>} : vector<8x32xf32>, vector<32x32xf32>, vector<8x32xf32> -> vector<8x32xf32>
    %65 = arith.addf %59, %64 : vector<8x32xf32>
    %66 = vector.shape_cast %65 : vector<8x32xf32> to vector<2x4x32xf32>
    %67 = vector.shape_cast %4 : vector<1x32xf32> to vector<1x1x32xf32>
    %68 = vector.broadcast %67 : vector<1x1x32xf32> to vector<2x4x32xf32>
    %69 = arith.addf %66, %68 : vector<2x4x32xf32>
    %70 = arith.addf %69, %0 : vector<2x4x32xf32>
    %c0_29 = arith.constant 0 : index
    %c0_30 = arith.constant 0 : index
    %c0_31 = arith.constant 0 : index
    %71 = vector.load %arg5[%c0_29, %c0_30, %c0_31] : memref<3x32x32xf32, #tpu.memory_space<vmem>>, vector<3x32x32xf32>
    %c0_32 = arith.constant 0 : index
    %c0_33 = arith.constant 0 : index
    %72 = vector.load %arg6[%c0_32, %c0_33] : memref<1x32xf32, #tpu.memory_space<vmem>>, vector<1x32xf32>
    %c0_34 = arith.constant 0 : index
    %c0_35 = arith.constant 0 : index
    %c0_36 = arith.constant 0 : index
    %73 = vector.load %arg7[%c0_34, %c0_35, %c0_36] : memref<3x32x32xf32, #tpu.memory_space<vmem>>, vector<3x32x32xf32>
    %c0_37 = arith.constant 0 : index
    %c0_38 = arith.constant 0 : index
    %74 = vector.load %arg8[%c0_37, %c0_38] : memref<1x32xf32, #tpu.memory_space<vmem>>, vector<1x32xf32>
    "tpu.trace_start"() <{level = 10 : i32, message = "bts,bsc->btc"}> : () -> ()
    %cst_39 = arith.constant dense<0.000000e+00> : vector<2x4x32xf32>
    %75 = tpu.matmul %14, %70, %cst_39 {dimension_numbers = #tpu.dot_dimension_numbers<[2], [1], [1], [2], [0, 0, 0, 1, 1, 2], [0], [0]>} : vector<2x4x4xf32>, vector<2x4x32xf32>, vector<2x4x32xf32> -> vector<2x4x32xf32>
    "tpu.trace_stop"() : () -> ()
    %76 = vector.shape_cast %75 : vector<2x4x32xf32> to vector<8x32xf32>
    %77 = vector.extract_strided_slice %71 {offsets = [0, 0, 0], sizes = [1, 32, 32], strides = [1, 1, 1]} : vector<3x32x32xf32> to vector<1x32x32xf32>
    %78 = vector.shape_cast %77 : vector<1x32x32xf32> to vector<32x32xf32>
    %cst_40 = arith.constant dense<0.000000e+00> : vector<8x32xf32>
    %79 = tpu.matmul %76, %78, %cst_40 {dimension_numbers = #tpu.dot_dimension_numbers<[1], [0], [0], [1], [0, 0, 1, 1], [], []>} : vector<8x32xf32>, vector<32x32xf32>, vector<8x32xf32> -> vector<8x32xf32>
    %80 = vector.shape_cast %70 : vector<2x4x32xf32> to vector<8x32xf32>
    %81 = vector.extract_strided_slice %71 {offsets = [1, 0, 0], sizes = [1, 32, 32], strides = [1, 1, 1]} : vector<3x32x32xf32> to vector<1x32x32xf32>
    %82 = vector.shape_cast %81 : vector<1x32x32xf32> to vector<32x32xf32>
    %cst_41 = arith.constant dense<0.000000e+00> : vector<8x32xf32>
    %83 = tpu.matmul %80, %82, %cst_41 {dimension_numbers = #tpu.dot_dimension_numbers<[1], [0], [0], [1], [0, 0, 1, 1], [], []>} : vector<8x32xf32>, vector<32x32xf32>, vector<8x32xf32> -> vector<8x32xf32>
    %84 = arith.addf %79, %83 : vector<8x32xf32>
    "tpu.trace_start"() <{level = 10 : i32, message = "bts,bsc->btc"}> : () -> ()
    %cst_42 = arith.constant dense<0.000000e+00> : vector<2x4x32xf32>
    %85 = tpu.matmul %34, %70, %cst_42 {dimension_numbers = #tpu.dot_dimension_numbers<[2], [1], [1], [2], [0, 0, 0, 1, 1, 2], [0], [0]>} : vector<2x4x4xf32>, vector<2x4x32xf32>, vector<2x4x32xf32> -> vector<2x4x32xf32>
    "tpu.trace_stop"() : () -> ()
    %86 = vector.shape_cast %85 : vector<2x4x32xf32> to vector<8x32xf32>
    %87 = vector.extract_strided_slice %71 {offsets = [2, 0, 0], sizes = [1, 32, 32], strides = [1, 1, 1]} : vector<3x32x32xf32> to vector<1x32x32xf32>
    %88 = vector.shape_cast %87 : vector<1x32x32xf32> to vector<32x32xf32>
    %cst_43 = arith.constant dense<0.000000e+00> : vector<8x32xf32>
    %89 = tpu.matmul %86, %88, %cst_43 {dimension_numbers = #tpu.dot_dimension_numbers<[1], [0], [0], [1], [0, 0, 1, 1], [], []>} : vector<8x32xf32>, vector<32x32xf32>, vector<8x32xf32> -> vector<8x32xf32>
    %90 = arith.addf %84, %89 : vector<8x32xf32>
    %91 = vector.shape_cast %90 : vector<8x32xf32> to vector<2x4x32xf32>
    %92 = vector.shape_cast %72 : vector<1x32xf32> to vector<1x1x32xf32>
    %93 = vector.broadcast %92 : vector<1x1x32xf32> to vector<2x4x32xf32>
    %94 = arith.addf %91, %93 : vector<2x4x32xf32>
    %cst_44 = arith.constant 0.000000e+00 : f32
    %95 = vector.broadcast %cst_44 : f32 to vector<2x4x32xf32>
    %96 = arith.cmpf oge, %94, %95 : vector<2x4x32xf32>
    %cst_45 = arith.constant 2.000000e-01 : f32
    %97 = vector.broadcast %cst_45 : f32 to vector<2x4x32xf32>
    %98 = arith.mulf %94, %97 : vector<2x4x32xf32>
    %99 = arith.select %96, %94, %98 : vector<2x4x32xi1>, vector<2x4x32xf32>
    "tpu.trace_start"() <{level = 10 : i32, message = "bts,bsc->btc"}> : () -> ()
    %cst_46 = arith.constant dense<0.000000e+00> : vector<2x4x32xf32>
    %100 = tpu.matmul %14, %99, %cst_46 {dimension_numbers = #tpu.dot_dimension_numbers<[2], [1], [1], [2], [0, 0, 0, 1, 1, 2], [0], [0]>} : vector<2x4x4xf32>, vector<2x4x32xf32>, vector<2x4x32xf32> -> vector<2x4x32xf32>
    "tpu.trace_stop"() : () -> ()
    %101 = vector.shape_cast %100 : vector<2x4x32xf32> to vector<8x32xf32>
    %102 = vector.extract_strided_slice %73 {offsets = [0, 0, 0], sizes = [1, 32, 32], strides = [1, 1, 1]} : vector<3x32x32xf32> to vector<1x32x32xf32>
    %103 = vector.shape_cast %102 : vector<1x32x32xf32> to vector<32x32xf32>
    %cst_47 = arith.constant dense<0.000000e+00> : vector<8x32xf32>
    %104 = tpu.matmul %101, %103, %cst_47 {dimension_numbers = #tpu.dot_dimension_numbers<[1], [0], [0], [1], [0, 0, 1, 1], [], []>} : vector<8x32xf32>, vector<32x32xf32>, vector<8x32xf32> -> vector<8x32xf32>
    %105 = vector.shape_cast %99 : vector<2x4x32xf32> to vector<8x32xf32>
    %106 = vector.extract_strided_slice %73 {offsets = [1, 0, 0], sizes = [1, 32, 32], strides = [1, 1, 1]} : vector<3x32x32xf32> to vector<1x32x32xf32>
    %107 = vector.shape_cast %106 : vector<1x32x32xf32> to vector<32x32xf32>
    %cst_48 = arith.constant dense<0.000000e+00> : vector<8x32xf32>
    %108 = tpu.matmul %105, %107, %cst_48 {dimension_numbers = #tpu.dot_dimension_numbers<[1], [0], [0], [1], [0, 0, 1, 1], [], []>} : vector<8x32xf32>, vector<32x32xf32>, vector<8x32xf32> -> vector<8x32xf32>
    %109 = arith.addf %104, %108 : vector<8x32xf32>
    "tpu.trace_start"() <{level = 10 : i32, message = "bts,bsc->btc"}> : () -> ()
    %cst_49 = arith.constant dense<0.000000e+00> : vector<2x4x32xf32>
    %110 = tpu.matmul %34, %99, %cst_49 {dimension_numbers = #tpu.dot_dimension_numbers<[2], [1], [1], [2], [0, 0, 0, 1, 1, 2], [0], [0]>} : vector<2x4x4xf32>, vector<2x4x32xf32>, vector<2x4x32xf32> -> vector<2x4x32xf32>
    "tpu.trace_stop"() : () -> ()
    %111 = vector.shape_cast %110 : vector<2x4x32xf32> to vector<8x32xf32>
    %112 = vector.extract_strided_slice %73 {offsets = [2, 0, 0], sizes = [1, 32, 32], strides = [1, 1, 1]} : vector<3x32x32xf32> to vector<1x32x32xf32>
    %113 = vector.shape_cast %112 : vector<1x32x32xf32> to vector<32x32xf32>
    %cst_50 = arith.constant dense<0.000000e+00> : vector<8x32xf32>
    %114 = tpu.matmul %111, %113, %cst_50 {dimension_numbers = #tpu.dot_dimension_numbers<[1], [0], [0], [1], [0, 0, 1, 1], [], []>} : vector<8x32xf32>, vector<32x32xf32>, vector<8x32xf32> -> vector<8x32xf32>
    %115 = arith.addf %109, %114 : vector<8x32xf32>
    %116 = vector.shape_cast %115 : vector<8x32xf32> to vector<2x4x32xf32>
    %117 = vector.shape_cast %74 : vector<1x32xf32> to vector<1x1x32xf32>
    %118 = vector.broadcast %117 : vector<1x1x32xf32> to vector<2x4x32xf32>
    %119 = arith.addf %116, %118 : vector<2x4x32xf32>
    %120 = arith.addf %119, %70 : vector<2x4x32xf32>
    %c0_51 = arith.constant 0 : index
    %c0_52 = arith.constant 0 : index
    %c0_53 = arith.constant 0 : index
    %121 = vector.load %arg9[%c0_51, %c0_52, %c0_53] : memref<3x32x32xf32, #tpu.memory_space<vmem>>, vector<3x32x32xf32>
    %c0_54 = arith.constant 0 : index
    %c0_55 = arith.constant 0 : index
    %122 = vector.load %arg10[%c0_54, %c0_55] : memref<1x32xf32, #tpu.memory_space<vmem>>, vector<1x32xf32>
    %123 = tpu.iota {dimensions = array<i32: 1>} : vector<2x8x4xi32>
    %124 = tpu.iota {dimensions = array<i32: 2>} : vector<2x8x4xi32>
    %c2_i32 = arith.constant 2 : i32
    %125 = vector.broadcast %c2_i32 : i32 to vector<2x8x4xi32>
    %126 = arith.muli %125, %124 : vector<2x8x4xi32>
    %127 = arith.cmpi eq, %123, %126 : vector<2x8x4xi32>
    %c2_i32_56 = arith.constant 2 : i32
    %128 = vector.broadcast %c2_i32_56 : i32 to vector<2x8x4xi32>
    %129 = arith.muli %128, %124 : vector<2x8x4xi32>
    %c1_i32_57 = arith.constant 1 : i32
    %130 = vector.broadcast %c1_i32_57 : i32 to vector<2x8x4xi32>
    %131 = arith.addi %129, %130 : vector<2x8x4xi32>
    %132 = arith.cmpi eq, %123, %131 : vector<2x8x4xi32>
    %133 = arith.ori %127, %132 : vector<2x8x4xi1>
    %cst_58 = arith.constant 1.000000e+00 : f32
    %cst_59 = arith.constant 0.000000e+00 : f32
    %134 = vector.broadcast %cst_58 : f32 to vector<2x8x4xf32>
    %135 = vector.broadcast %cst_59 : f32 to vector<2x8x4xf32>
    %136 = arith.select %133, %134, %135 : vector<2x8x4xi1>, vector<2x8x4xf32>
    "tpu.trace_start"() <{level = 10 : i32, message = "bts,bsc->btc"}> : () -> ()
    %cst_60 = arith.constant dense<0.000000e+00> : vector<2x8x32xf32>
    %137 = tpu.matmul %136, %120, %cst_60 {dimension_numbers = #tpu.dot_dimension_numbers<[2], [1], [1], [2], [0, 0, 0, 1, 1, 2], [0], [0]>} : vector<2x8x4xf32>, vector<2x4x32xf32>, vector<2x8x32xf32> -> vector<2x8x32xf32>
    "tpu.trace_stop"() : () -> ()
    %138 = tpu.iota {dimensions = array<i32: 1>} : vector<2x8x8xi32>
    %139 = tpu.iota {dimensions = array<i32: 2>} : vector<2x8x8xi32>
    %c1_i32_61 = arith.constant 1 : i32
    %140 = vector.broadcast %c1_i32_61 : i32 to vector<2x8x8xi32>
    %141 = arith.muli %140, %138 : vector<2x8x8xi32>
    %c-1_i32_62 = arith.constant -1 : i32
    %142 = vector.broadcast %c-1_i32_62 : i32 to vector<2x8x8xi32>
    %143 = arith.addi %141, %142 : vector<2x8x8xi32>
    %144 = arith.cmpi eq, %139, %143 : vector<2x8x8xi32>
    %cst_63 = arith.constant 1.000000e+00 : f32
    %cst_64 = arith.constant 0.000000e+00 : f32
    %145 = vector.broadcast %cst_63 : f32 to vector<2x8x8xf32>
    %146 = vector.broadcast %cst_64 : f32 to vector<2x8x8xf32>
    %147 = arith.select %144, %145, %146 : vector<2x8x8xi1>, vector<2x8x8xf32>
    "tpu.trace_start"() <{level = 10 : i32, message = "bts,bsc->btc"}> : () -> ()
    %cst_65 = arith.constant dense<0.000000e+00> : vector<2x8x32xf32>
    %148 = tpu.matmul %147, %137, %cst_65 {dimension_numbers = #tpu.dot_dimension_numbers<[2], [1], [1], [2], [0, 0, 0, 1, 1, 2], [0], [0]>} : vector<2x8x8xf32>, vector<2x8x32xf32>, vector<2x8x32xf32> -> vector<2x8x32xf32>
    "tpu.trace_stop"() : () -> ()
    %149 = vector.shape_cast %148 : vector<2x8x32xf32> to vector<16x32xf32>
    %150 = vector.extract_strided_slice %121 {offsets = [0, 0, 0], sizes = [1, 32, 32], strides = [1, 1, 1]} : vector<3x32x32xf32> to vector<1x32x32xf32>
    %151 = vector.shape_cast %150 : vector<1x32x32xf32> to vector<32x32xf32>
    %cst_66 = arith.constant dense<0.000000e+00> : vector<16x32xf32>
    %152 = tpu.matmul %149, %151, %cst_66 {dimension_numbers = #tpu.dot_dimension_numbers<[1], [0], [0], [1], [0, 0, 1, 1], [], []>} : vector<16x32xf32>, vector<32x32xf32>, vector<16x32xf32> -> vector<16x32xf32>
    %153 = vector.shape_cast %137 : vector<2x8x32xf32> to vector<16x32xf32>
    %154 = vector.extract_strided_slice %121 {offsets = [1, 0, 0], sizes = [1, 32, 32], strides = [1, 1, 1]} : vector<3x32x32xf32> to vector<1x32x32xf32>
    %155 = vector.shape_cast %154 : vector<1x32x32xf32> to vector<32x32xf32>
    %cst_67 = arith.constant dense<0.000000e+00> : vector<16x32xf32>
    %156 = tpu.matmul %153, %155, %cst_67 {dimension_numbers = #tpu.dot_dimension_numbers<[1], [0], [0], [1], [0, 0, 1, 1], [], []>} : vector<16x32xf32>, vector<32x32xf32>, vector<16x32xf32> -> vector<16x32xf32>
    %157 = arith.addf %152, %156 : vector<16x32xf32>
    %158 = tpu.iota {dimensions = array<i32: 1>} : vector<2x8x8xi32>
    %159 = tpu.iota {dimensions = array<i32: 2>} : vector<2x8x8xi32>
    %c1_i32_68 = arith.constant 1 : i32
    %160 = vector.broadcast %c1_i32_68 : i32 to vector<2x8x8xi32>
    %161 = arith.muli %160, %158 : vector<2x8x8xi32>
    %c1_i32_69 = arith.constant 1 : i32
    %162 = vector.broadcast %c1_i32_69 : i32 to vector<2x8x8xi32>
    %163 = arith.addi %161, %162 : vector<2x8x8xi32>
    %164 = arith.cmpi eq, %159, %163 : vector<2x8x8xi32>
    %cst_70 = arith.constant 1.000000e+00 : f32
    %cst_71 = arith.constant 0.000000e+00 : f32
    %165 = vector.broadcast %cst_70 : f32 to vector<2x8x8xf32>
    %166 = vector.broadcast %cst_71 : f32 to vector<2x8x8xf32>
    %167 = arith.select %164, %165, %166 : vector<2x8x8xi1>, vector<2x8x8xf32>
    "tpu.trace_start"() <{level = 10 : i32, message = "bts,bsc->btc"}> : () -> ()
    %cst_72 = arith.constant dense<0.000000e+00> : vector<2x8x32xf32>
    %168 = tpu.matmul %167, %137, %cst_72 {dimension_numbers = #tpu.dot_dimension_numbers<[2], [1], [1], [2], [0, 0, 0, 1, 1, 2], [0], [0]>} : vector<2x8x8xf32>, vector<2x8x32xf32>, vector<2x8x32xf32> -> vector<2x8x32xf32>
    "tpu.trace_stop"() : () -> ()
    %169 = vector.shape_cast %168 : vector<2x8x32xf32> to vector<16x32xf32>
    %170 = vector.extract_strided_slice %121 {offsets = [2, 0, 0], sizes = [1, 32, 32], strides = [1, 1, 1]} : vector<3x32x32xf32> to vector<1x32x32xf32>
    %171 = vector.shape_cast %170 : vector<1x32x32xf32> to vector<32x32xf32>
    %cst_73 = arith.constant dense<0.000000e+00> : vector<16x32xf32>
    %172 = tpu.matmul %169, %171, %cst_73 {dimension_numbers = #tpu.dot_dimension_numbers<[1], [0], [0], [1], [0, 0, 1, 1], [], []>} : vector<16x32xf32>, vector<32x32xf32>, vector<16x32xf32> -> vector<16x32xf32>
    %173 = arith.addf %157, %172 : vector<16x32xf32>
    %174 = vector.shape_cast %173 : vector<16x32xf32> to vector<2x8x32xf32>
    %175 = vector.shape_cast %122 : vector<1x32xf32> to vector<1x1x32xf32>
    %176 = vector.broadcast %175 : vector<1x1x32xf32> to vector<2x8x32xf32>
    %177 = arith.addf %174, %176 : vector<2x8x32xf32>
    %cst_74 = arith.constant 0.000000e+00 : f32
    %178 = vector.broadcast %cst_74 : f32 to vector<2x8x32xf32>
    %179 = arith.cmpf oge, %177, %178 : vector<2x8x32xf32>
    %cst_75 = arith.constant 2.000000e-01 : f32
    %180 = vector.broadcast %cst_75 : f32 to vector<2x8x32xf32>
    %181 = arith.mulf %177, %180 : vector<2x8x32xf32>
    %182 = arith.select %179, %177, %181 : vector<2x8x32xi1>, vector<2x8x32xf32>
    %c0_76 = arith.constant 0 : index
    %c0_77 = arith.constant 0 : index
    %c0_78 = arith.constant 0 : index
    %183 = vector.load %arg11[%c0_76, %c0_77, %c0_78] : memref<3x32x16xf32, #tpu.memory_space<vmem>>, vector<3x32x16xf32>
    %c0_79 = arith.constant 0 : index
    %c0_80 = arith.constant 0 : index
    %184 = vector.load %arg12[%c0_79, %c0_80] : memref<1x16xf32, #tpu.memory_space<vmem>>, vector<1x16xf32>
    %185 = tpu.iota {dimensions = array<i32: 1>} : vector<2x16x8xi32>
    %186 = tpu.iota {dimensions = array<i32: 2>} : vector<2x16x8xi32>
    %c2_i32_81 = arith.constant 2 : i32
    %187 = vector.broadcast %c2_i32_81 : i32 to vector<2x16x8xi32>
    %188 = arith.muli %187, %186 : vector<2x16x8xi32>
    %189 = arith.cmpi eq, %185, %188 : vector<2x16x8xi32>
    %c2_i32_82 = arith.constant 2 : i32
    %190 = vector.broadcast %c2_i32_82 : i32 to vector<2x16x8xi32>
    %191 = arith.muli %190, %186 : vector<2x16x8xi32>
    %c1_i32_83 = arith.constant 1 : i32
    %192 = vector.broadcast %c1_i32_83 : i32 to vector<2x16x8xi32>
    %193 = arith.addi %191, %192 : vector<2x16x8xi32>
    %194 = arith.cmpi eq, %185, %193 : vector<2x16x8xi32>
    %195 = arith.ori %189, %194 : vector<2x16x8xi1>
    %cst_84 = arith.constant 1.000000e+00 : f32
    %cst_85 = arith.constant 0.000000e+00 : f32
    %196 = vector.broadcast %cst_84 : f32 to vector<2x16x8xf32>
    %197 = vector.broadcast %cst_85 : f32 to vector<2x16x8xf32>
    %198 = arith.select %195, %196, %197 : vector<2x16x8xi1>, vector<2x16x8xf32>
    "tpu.trace_start"() <{level = 10 : i32, message = "bts,bsc->btc"}> : () -> ()
    %cst_86 = arith.constant dense<0.000000e+00> : vector<2x16x32xf32>
    %199 = tpu.matmul %198, %182, %cst_86 {dimension_numbers = #tpu.dot_dimension_numbers<[2], [1], [1], [2], [0, 0, 0, 1, 1, 2], [0], [0]>} : vector<2x16x8xf32>, vector<2x8x32xf32>, vector<2x16x32xf32> -> vector<2x16x32xf32>
    "tpu.trace_stop"() : () -> ()
    %200 = tpu.iota {dimensions = array<i32: 1>} : vector<2x16x16xi32>
    %201 = tpu.iota {dimensions = array<i32: 2>} : vector<2x16x16xi32>
    %c1_i32_87 = arith.constant 1 : i32
    %202 = vector.broadcast %c1_i32_87 : i32 to vector<2x16x16xi32>
    %203 = arith.muli %202, %200 : vector<2x16x16xi32>
    %c-1_i32_88 = arith.constant -1 : i32
    %204 = vector.broadcast %c-1_i32_88 : i32 to vector<2x16x16xi32>
    %205 = arith.addi %203, %204 : vector<2x16x16xi32>
    %206 = arith.cmpi eq, %201, %205 : vector<2x16x16xi32>
    %cst_89 = arith.constant 1.000000e+00 : f32
    %cst_90 = arith.constant 0.000000e+00 : f32
    %207 = vector.broadcast %cst_89 : f32 to vector<2x16x16xf32>
    %208 = vector.broadcast %cst_90 : f32 to vector<2x16x16xf32>
    %209 = arith.select %206, %207, %208 : vector<2x16x16xi1>, vector<2x16x16xf32>
    "tpu.trace_start"() <{level = 10 : i32, message = "bts,bsc->btc"}> : () -> ()
    %cst_91 = arith.constant dense<0.000000e+00> : vector<2x16x32xf32>
    %210 = tpu.matmul %209, %199, %cst_91 {dimension_numbers = #tpu.dot_dimension_numbers<[2], [1], [1], [2], [0, 0, 0, 1, 1, 2], [0], [0]>} : vector<2x16x16xf32>, vector<2x16x32xf32>, vector<2x16x32xf32> -> vector<2x16x32xf32>
    "tpu.trace_stop"() : () -> ()
    %211 = vector.shape_cast %210 : vector<2x16x32xf32> to vector<32x32xf32>
    %212 = vector.extract_strided_slice %183 {offsets = [0, 0, 0], sizes = [1, 32, 16], strides = [1, 1, 1]} : vector<3x32x16xf32> to vector<1x32x16xf32>
    %213 = vector.shape_cast %212 : vector<1x32x16xf32> to vector<32x16xf32>
    %cst_92 = arith.constant dense<0.000000e+00> : vector<32x16xf32>
    %214 = tpu.matmul %211, %213, %cst_92 {dimension_numbers = #tpu.dot_dimension_numbers<[1], [0], [0], [1], [0, 0, 1, 1], [], []>} : vector<32x32xf32>, vector<32x16xf32>, vector<32x16xf32> -> vector<32x16xf32>
    %215 = vector.shape_cast %199 : vector<2x16x32xf32> to vector<32x32xf32>
    %216 = vector.extract_strided_slice %183 {offsets = [1, 0, 0], sizes = [1, 32, 16], strides = [1, 1, 1]} : vector<3x32x16xf32> to vector<1x32x16xf32>
    %217 = vector.shape_cast %216 : vector<1x32x16xf32> to vector<32x16xf32>
    %cst_93 = arith.constant dense<0.000000e+00> : vector<32x16xf32>
    %218 = tpu.matmul %215, %217, %cst_93 {dimension_numbers = #tpu.dot_dimension_numbers<[1], [0], [0], [1], [0, 0, 1, 1], [], []>} : vector<32x32xf32>, vector<32x16xf32>, vector<32x16xf32> -> vector<32x16xf32>
    %219 = arith.addf %214, %218 : vector<32x16xf32>
    %220 = tpu.iota {dimensions = array<i32: 1>} : vector<2x16x16xi32>
    %221 = tpu.iota {dimensions = array<i32: 2>} : vector<2x16x16xi32>
    %c1_i32_94 = arith.constant 1 : i32
    %222 = vector.broadcast %c1_i32_94 : i32 to vector<2x16x16xi32>
    %223 = arith.muli %222, %220 : vector<2x16x16xi32>
    %c1_i32_95 = arith.constant 1 : i32
    %224 = vector.broadcast %c1_i32_95 : i32 to vector<2x16x16xi32>
    %225 = arith.addi %223, %224 : vector<2x16x16xi32>
    %226 = arith.cmpi eq, %221, %225 : vector<2x16x16xi32>
    %cst_96 = arith.constant 1.000000e+00 : f32
    %cst_97 = arith.constant 0.000000e+00 : f32
    %227 = vector.broadcast %cst_96 : f32 to vector<2x16x16xf32>
    %228 = vector.broadcast %cst_97 : f32 to vector<2x16x16xf32>
    %229 = arith.select %226, %227, %228 : vector<2x16x16xi1>, vector<2x16x16xf32>
    "tpu.trace_start"() <{level = 10 : i32, message = "bts,bsc->btc"}> : () -> ()
    %cst_98 = arith.constant dense<0.000000e+00> : vector<2x16x32xf32>
    %230 = tpu.matmul %229, %199, %cst_98 {dimension_numbers = #tpu.dot_dimension_numbers<[2], [1], [1], [2], [0, 0, 0, 1, 1, 2], [0], [0]>} : vector<2x16x16xf32>, vector<2x16x32xf32>, vector<2x16x32xf32> -> vector<2x16x32xf32>
    "tpu.trace_stop"() : () -> ()
    %231 = vector.shape_cast %230 : vector<2x16x32xf32> to vector<32x32xf32>
    %232 = vector.extract_strided_slice %183 {offsets = [2, 0, 0], sizes = [1, 32, 16], strides = [1, 1, 1]} : vector<3x32x16xf32> to vector<1x32x16xf32>
    %233 = vector.shape_cast %232 : vector<1x32x16xf32> to vector<32x16xf32>
    %cst_99 = arith.constant dense<0.000000e+00> : vector<32x16xf32>
    %234 = tpu.matmul %231, %233, %cst_99 {dimension_numbers = #tpu.dot_dimension_numbers<[1], [0], [0], [1], [0, 0, 1, 1], [], []>} : vector<32x32xf32>, vector<32x16xf32>, vector<32x16xf32> -> vector<32x16xf32>
    %235 = arith.addf %219, %234 : vector<32x16xf32>
    %236 = vector.shape_cast %235 : vector<32x16xf32> to vector<2x16x16xf32>
    %237 = vector.shape_cast %184 : vector<1x16xf32> to vector<1x1x16xf32>
    %238 = vector.broadcast %237 : vector<1x1x16xf32> to vector<2x16x16xf32>
    %239 = arith.addf %236, %238 : vector<2x16x16xf32>
    %cst_100 = arith.constant 0.000000e+00 : f32
    %240 = vector.broadcast %cst_100 : f32 to vector<2x16x16xf32>
    %241 = arith.cmpf oge, %239, %240 : vector<2x16x16xf32>
    %cst_101 = arith.constant 2.000000e-01 : f32
    %242 = vector.broadcast %cst_101 : f32 to vector<2x16x16xf32>
    %243 = arith.mulf %239, %242 : vector<2x16x16xf32>
    %244 = arith.select %241, %239, %243 : vector<2x16x16xi1>, vector<2x16x16xf32>
    %c0_102 = arith.constant 0 : index
    %c0_103 = arith.constant 0 : index
    %c0_104 = arith.constant 0 : index
    %245 = vector.load %arg13[%c0_102, %c0_103, %c0_104] : memref<3x16x16xf32, #tpu.memory_space<vmem>>, vector<3x16x16xf32>
    %c0_105 = arith.constant 0 : index
    %c0_106 = arith.constant 0 : index
    %246 = vector.load %arg14[%c0_105, %c0_106] : memref<1x16xf32, #tpu.memory_space<vmem>>, vector<1x16xf32>
    "tpu.trace_start"() <{level = 10 : i32, message = "bts,bsc->btc"}> : () -> ()
    %cst_107 = arith.constant dense<0.000000e+00> : vector<2x16x16xf32>
    %247 = tpu.matmul %209, %244, %cst_107 {dimension_numbers = #tpu.dot_dimension_numbers<[2], [1], [1], [2], [0, 0, 0, 1, 1, 2], [0], [0]>} : vector<2x16x16xf32>, vector<2x16x16xf32>, vector<2x16x16xf32> -> vector<2x16x16xf32>
    "tpu.trace_stop"() : () -> ()
    %248 = vector.shape_cast %247 : vector<2x16x16xf32> to vector<32x16xf32>
    %249 = vector.extract_strided_slice %245 {offsets = [0, 0, 0], sizes = [1, 16, 16], strides = [1, 1, 1]} : vector<3x16x16xf32> to vector<1x16x16xf32>
    %250 = vector.shape_cast %249 : vector<1x16x16xf32> to vector<16x16xf32>
    %cst_108 = arith.constant dense<0.000000e+00> : vector<32x16xf32>
    %251 = tpu.matmul %248, %250, %cst_108 {dimension_numbers = #tpu.dot_dimension_numbers<[1], [0], [0], [1], [0, 0, 1, 1], [], []>} : vector<32x16xf32>, vector<16x16xf32>, vector<32x16xf32> -> vector<32x16xf32>
    %252 = vector.shape_cast %244 : vector<2x16x16xf32> to vector<32x16xf32>
    %253 = vector.extract_strided_slice %245 {offsets = [1, 0, 0], sizes = [1, 16, 16], strides = [1, 1, 1]} : vector<3x16x16xf32> to vector<1x16x16xf32>
    %254 = vector.shape_cast %253 : vector<1x16x16xf32> to vector<16x16xf32>
    %cst_109 = arith.constant dense<0.000000e+00> : vector<32x16xf32>
    %255 = tpu.matmul %252, %254, %cst_109 {dimension_numbers = #tpu.dot_dimension_numbers<[1], [0], [0], [1], [0, 0, 1, 1], [], []>} : vector<32x16xf32>, vector<16x16xf32>, vector<32x16xf32> -> vector<32x16xf32>
    %256 = arith.addf %251, %255 : vector<32x16xf32>
    "tpu.trace_start"() <{level = 10 : i32, message = "bts,bsc->btc"}> : () -> ()
    %cst_110 = arith.constant dense<0.000000e+00> : vector<2x16x16xf32>
    %257 = tpu.matmul %229, %244, %cst_110 {dimension_numbers = #tpu.dot_dimension_numbers<[2], [1], [1], [2], [0, 0, 0, 1, 1, 2], [0], [0]>} : vector<2x16x16xf32>, vector<2x16x16xf32>, vector<2x16x16xf32> -> vector<2x16x16xf32>
    "tpu.trace_stop"() : () -> ()
    %258 = vector.shape_cast %257 : vector<2x16x16xf32> to vector<32x16xf32>
    %259 = vector.extract_strided_slice %245 {offsets = [2, 0, 0], sizes = [1, 16, 16], strides = [1, 1, 1]} : vector<3x16x16xf32> to vector<1x16x16xf32>
    %260 = vector.shape_cast %259 : vector<1x16x16xf32> to vector<16x16xf32>
    %cst_111 = arith.constant dense<0.000000e+00> : vector<32x16xf32>
    %261 = tpu.matmul %258, %260, %cst_111 {dimension_numbers = #tpu.dot_dimension_numbers<[1], [0], [0], [1], [0, 0, 1, 1], [], []>} : vector<32x16xf32>, vector<16x16xf32>, vector<32x16xf32> -> vector<32x16xf32>
    %262 = arith.addf %256, %261 : vector<32x16xf32>
    %263 = vector.shape_cast %262 : vector<32x16xf32> to vector<2x16x16xf32>
    %264 = vector.shape_cast %246 : vector<1x16xf32> to vector<1x1x16xf32>
    %265 = vector.broadcast %264 : vector<1x1x16xf32> to vector<2x16x16xf32>
    %266 = arith.addf %263, %265 : vector<2x16x16xf32>
    %c0_112 = arith.constant 0 : index
    %c0_113 = arith.constant 0 : index
    %c0_114 = arith.constant 0 : index
    %267 = vector.load %arg15[%c0_112, %c0_113, %c0_114] : memref<2x16x16xf32, #tpu.memory_space<vmem>>, vector<2x16x16xf32>
    tpu.vector_store %arg15[%c0_112, %c0_113, %c0_114], %266 {strides = array<i32>} : memref<2x16x16xf32, #tpu.memory_space<vmem>>, vector<2x16x16xf32>,
    return
  }
}

module attributes {stable_mosaic.version = 11 : i64} {
  func.func @kernel(%arg0: memref<2x16x16xf32, #tpu.memory_space<vmem>>, %arg1: memref<4x16x32xf32, #tpu.memory_space<vmem>>, %arg2: memref<1x32xf32, #tpu.memory_space<vmem>>, %arg3: memref<3x32x32xf32, #tpu.memory_space<vmem>>, %arg4: memref<1x32xf32, #tpu.memory_space<vmem>>, %arg5: memref<3x32x32xf32, #tpu.memory_space<vmem>>, %arg6: memref<1x32xf32, #tpu.memory_space<vmem>>, %arg7: memref<4x32x32xf32, #tpu.memory_space<vmem>>, %arg8: memref<1x32xf32, #tpu.memory_space<vmem>>, %arg9: memref<3x32x32xf32, #tpu.memory_space<vmem>>, %arg10: memref<1x32xf32, #tpu.memory_space<vmem>>, %arg11: memref<3x32x32xf32, #tpu.memory_space<vmem>>, %arg12: memref<1x32xf32, #tpu.memory_space<vmem>>, %arg13: memref<2x4x32xf32, #tpu.memory_space<vmem>>) attributes {dimension_semantics = [], scalar_prefetch = 0 : i64, scratch_operands = 0 : i64, tpu.core_type = #tpu.core_type<tc>} {
    %c0 = arith.constant 0 : index
    %c0_0 = arith.constant 0 : index
    %c0_1 = arith.constant 0 : index
    %0 = vector.load %arg0[%c0, %c0_0, %c0_1] : memref<2x16x16xf32, #tpu.memory_space<vmem>>, vector<2x16x16xf32>
    %c0_2 = arith.constant 0 : index
    %c0_3 = arith.constant 0 : index
    %c0_4 = arith.constant 0 : index
    %1 = vector.load %arg1[%c0_2, %c0_3, %c0_4] : memref<4x16x32xf32, #tpu.memory_space<vmem>>, vector<4x16x32xf32>
    %c0_5 = arith.constant 0 : index
    %c0_6 = arith.constant 0 : index
    %2 = vector.load %arg2[%c0_5, %c0_6] : memref<1x32xf32, #tpu.memory_space<vmem>>, vector<1x32xf32>
    %c0_7 = arith.constant 0 : index
    %c0_8 = arith.constant 0 : index
    %c0_9 = arith.constant 0 : index
    %3 = vector.load %arg3[%c0_7, %c0_8, %c0_9] : memref<3x32x32xf32, #tpu.memory_space<vmem>>, vector<3x32x32xf32>
    %c0_10 = arith.constant 0 : index
    %c0_11 = arith.constant 0 : index
    %4 = vector.load %arg4[%c0_10, %c0_11] : memref<1x32xf32, #tpu.memory_space<vmem>>, vector<1x32xf32>
    %c0_12 = arith.constant 0 : index
    %c0_13 = arith.constant 0 : index
    %c0_14 = arith.constant 0 : index
    %5 = vector.load %arg5[%c0_12, %c0_13, %c0_14] : memref<3x32x32xf32, #tpu.memory_space<vmem>>, vector<3x32x32xf32>
    %c0_15 = arith.constant 0 : index
    %c0_16 = arith.constant 0 : index
    %6 = vector.load %arg6[%c0_15, %c0_16] : memref<1x32xf32, #tpu.memory_space<vmem>>, vector<1x32xf32>
    %7 = tpu.iota {dimensions = array<i32: 1>} : vector<2x8x16xi32>
    %8 = tpu.iota {dimensions = array<i32: 2>} : vector<2x8x16xi32>
    %c2_i32 = arith.constant 2 : i32
    %9 = vector.broadcast %c2_i32 : i32 to vector<2x8x16xi32>
    %10 = arith.muli %9, %7 : vector<2x8x16xi32>
    %c-1_i32 = arith.constant -1 : i32
    %11 = vector.broadcast %c-1_i32 : i32 to vector<2x8x16xi32>
    %12 = arith.addi %10, %11 : vector<2x8x16xi32>
    %13 = arith.cmpi eq, %8, %12 : vector<2x8x16xi32>
    %cst = arith.constant 1.000000e+00 : f32
    %cst_17 = arith.constant 0.000000e+00 : f32
    %14 = vector.broadcast %cst : f32 to vector<2x8x16xf32>
    %15 = vector.broadcast %cst_17 : f32 to vector<2x8x16xf32>
    %16 = arith.select %13, %14, %15 : vector<2x8x16xi1>, vector<2x8x16xf32>
    "tpu.trace_start"() <{level = 10 : i32, message = "bts,bsc->btc"}> : () -> ()
    %cst_18 = arith.constant dense<0.000000e+00> : vector<2x8x16xf32>
    %17 = tpu.matmul %16, %0, %cst_18 {dimension_numbers = #tpu.dot_dimension_numbers<[2], [1], [1], [2], [0, 0, 0, 1, 1, 2], [0], [0]>} : vector<2x8x16xf32>, vector<2x16x16xf32>, vector<2x8x16xf32> -> vector<2x8x16xf32>
    "tpu.trace_stop"() : () -> ()
    %18 = vector.shape_cast %17 : vector<2x8x16xf32> to vector<16x16xf32>
    %19 = vector.extract_strided_slice %1 {offsets = [0, 0, 0], sizes = [1, 16, 32], strides = [1, 1, 1]} : vector<4x16x32xf32> to vector<1x16x32xf32>
    %20 = vector.shape_cast %19 : vector<1x16x32xf32> to vector<16x32xf32>
    %cst_19 = arith.constant dense<0.000000e+00> : vector<16x32xf32>
    %21 = tpu.matmul %18, %20, %cst_19 {dimension_numbers = #tpu.dot_dimension_numbers<[1], [0], [0], [1], [0, 0, 1, 1], [], []>} : vector<16x16xf32>, vector<16x32xf32>, vector<16x32xf32> -> vector<16x32xf32>
    %22 = tpu.iota {dimensions = array<i32: 1>} : vector<2x8x16xi32>
    %23 = tpu.iota {dimensions = array<i32: 2>} : vector<2x8x16xi32>
    %c2_i32_20 = arith.constant 2 : i32
    %24 = vector.broadcast %c2_i32_20 : i32 to vector<2x8x16xi32>
    %25 = arith.muli %24, %22 : vector<2x8x16xi32>
    %c0_i32 = arith.constant 0 : i32
    %26 = vector.broadcast %c0_i32 : i32 to vector<2x8x16xi32>
    %27 = arith.addi %25, %26 : vector<2x8x16xi32>
    %28 = arith.cmpi eq, %23, %27 : vector<2x8x16xi32>
    %cst_21 = arith.constant 1.000000e+00 : f32
    %cst_22 = arith.constant 0.000000e+00 : f32
    %29 = vector.broadcast %cst_21 : f32 to vector<2x8x16xf32>
    %30 = vector.broadcast %cst_22 : f32 to vector<2x8x16xf32>
    %31 = arith.select %28, %29, %30 : vector<2x8x16xi1>, vector<2x8x16xf32>
    "tpu.trace_start"() <{level = 10 : i32, message = "bts,bsc->btc"}> : () -> ()
    %cst_23 = arith.constant dense<0.000000e+00> : vector<2x8x16xf32>
    %32 = tpu.matmul %31, %0, %cst_23 {dimension_numbers = #tpu.dot_dimension_numbers<[2], [1], [1], [2], [0, 0, 0, 1, 1, 2], [0], [0]>} : vector<2x8x16xf32>, vector<2x16x16xf32>, vector<2x8x16xf32> -> vector<2x8x16xf32>
    "tpu.trace_stop"() : () -> ()
    %33 = vector.shape_cast %32 : vector<2x8x16xf32> to vector<16x16xf32>
    %34 = vector.extract_strided_slice %1 {offsets = [1, 0, 0], sizes = [1, 16, 32], strides = [1, 1, 1]} : vector<4x16x32xf32> to vector<1x16x32xf32>
    %35 = vector.shape_cast %34 : vector<1x16x32xf32> to vector<16x32xf32>
    %cst_24 = arith.constant dense<0.000000e+00> : vector<16x32xf32>
    %36 = tpu.matmul %33, %35, %cst_24 {dimension_numbers = #tpu.dot_dimension_numbers<[1], [0], [0], [1], [0, 0, 1, 1], [], []>} : vector<16x16xf32>, vector<16x32xf32>, vector<16x32xf32> -> vector<16x32xf32>
    %37 = arith.addf %21, %36 : vector<16x32xf32>
    %38 = tpu.iota {dimensions = array<i32: 1>} : vector<2x8x16xi32>
    %39 = tpu.iota {dimensions = array<i32: 2>} : vector<2x8x16xi32>
    %c2_i32_25 = arith.constant 2 : i32
    %40 = vector.broadcast %c2_i32_25 : i32 to vector<2x8x16xi32>
    %41 = arith.muli %40, %38 : vector<2x8x16xi32>
    %c1_i32 = arith.constant 1 : i32
    %42 = vector.broadcast %c1_i32 : i32 to vector<2x8x16xi32>
    %43 = arith.addi %41, %42 : vector<2x8x16xi32>
    %44 = arith.cmpi eq, %39, %43 : vector<2x8x16xi32>
    %cst_26 = arith.constant 1.000000e+00 : f32
    %cst_27 = arith.constant 0.000000e+00 : f32
    %45 = vector.broadcast %cst_26 : f32 to vector<2x8x16xf32>
    %46 = vector.broadcast %cst_27 : f32 to vector<2x8x16xf32>
    %47 = arith.select %44, %45, %46 : vector<2x8x16xi1>, vector<2x8x16xf32>
    "tpu.trace_start"() <{level = 10 : i32, message = "bts,bsc->btc"}> : () -> ()
    %cst_28 = arith.constant dense<0.000000e+00> : vector<2x8x16xf32>
    %48 = tpu.matmul %47, %0, %cst_28 {dimension_numbers = #tpu.dot_dimension_numbers<[2], [1], [1], [2], [0, 0, 0, 1, 1, 2], [0], [0]>} : vector<2x8x16xf32>, vector<2x16x16xf32>, vector<2x8x16xf32> -> vector<2x8x16xf32>
    "tpu.trace_stop"() : () -> ()
    %49 = vector.shape_cast %48 : vector<2x8x16xf32> to vector<16x16xf32>
    %50 = vector.extract_strided_slice %1 {offsets = [2, 0, 0], sizes = [1, 16, 32], strides = [1, 1, 1]} : vector<4x16x32xf32> to vector<1x16x32xf32>
    %51 = vector.shape_cast %50 : vector<1x16x32xf32> to vector<16x32xf32>
    %cst_29 = arith.constant dense<0.000000e+00> : vector<16x32xf32>
    %52 = tpu.matmul %49, %51, %cst_29 {dimension_numbers = #tpu.dot_dimension_numbers<[1], [0], [0], [1], [0, 0, 1, 1], [], []>} : vector<16x16xf32>, vector<16x32xf32>, vector<16x32xf32> -> vector<16x32xf32>
    %53 = arith.addf %37, %52 : vector<16x32xf32>
    %54 = tpu.iota {dimensions = array<i32: 1>} : vector<2x8x16xi32>
    %55 = tpu.iota {dimensions = array<i32: 2>} : vector<2x8x16xi32>
    %c2_i32_30 = arith.constant 2 : i32
    %56 = vector.broadcast %c2_i32_30 : i32 to vector<2x8x16xi32>
    %57 = arith.muli %56, %54 : vector<2x8x16xi32>
    %c2_i32_31 = arith.constant 2 : i32
    %58 = vector.broadcast %c2_i32_31 : i32 to vector<2x8x16xi32>
    %59 = arith.addi %57, %58 : vector<2x8x16xi32>
    %60 = arith.cmpi eq, %55, %59 : vector<2x8x16xi32>
    %cst_32 = arith.constant 1.000000e+00 : f32
    %cst_33 = arith.constant 0.000000e+00 : f32
    %61 = vector.broadcast %cst_32 : f32 to vector<2x8x16xf32>
    %62 = vector.broadcast %cst_33 : f32 to vector<2x8x16xf32>
    %63 = arith.select %60, %61, %62 : vector<2x8x16xi1>, vector<2x8x16xf32>
    "tpu.trace_start"() <{level = 10 : i32, message = "bts,bsc->btc"}> : () -> ()
    %cst_34 = arith.constant dense<0.000000e+00> : vector<2x8x16xf32>
    %64 = tpu.matmul %63, %0, %cst_34 {dimension_numbers = #tpu.dot_dimension_numbers<[2], [1], [1], [2], [0, 0, 0, 1, 1, 2], [0], [0]>} : vector<2x8x16xf32>, vector<2x16x16xf32>, vector<2x8x16xf32> -> vector<2x8x16xf32>
    "tpu.trace_stop"() : () -> ()
    %65 = vector.shape_cast %64 : vector<2x8x16xf32> to vector<16x16xf32>
    %66 = vector.extract_strided_slice %1 {offsets = [3, 0, 0], sizes = [1, 16, 32], strides = [1, 1, 1]} : vector<4x16x32xf32> to vector<1x16x32xf32>
    %67 = vector.shape_cast %66 : vector<1x16x32xf32> to vector<16x32xf32>
    %cst_35 = arith.constant dense<0.000000e+00> : vector<16x32xf32>
    %68 = tpu.matmul %65, %67, %cst_35 {dimension_numbers = #tpu.dot_dimension_numbers<[1], [0], [0], [1], [0, 0, 1, 1], [], []>} : vector<16x16xf32>, vector<16x32xf32>, vector<16x32xf32> -> vector<16x32xf32>
    %69 = arith.addf %53, %68 : vector<16x32xf32>
    %70 = vector.shape_cast %69 : vector<16x32xf32> to vector<2x8x32xf32>
    %71 = vector.shape_cast %2 : vector<1x32xf32> to vector<1x1x32xf32>
    %72 = vector.broadcast %71 : vector<1x1x32xf32> to vector<2x8x32xf32>
    %73 = arith.addf %70, %72 : vector<2x8x32xf32>
    %cst_36 = arith.constant 0.000000e+00 : f32
    %74 = vector.broadcast %cst_36 : f32 to vector<2x8x32xf32>
    %75 = arith.cmpf oge, %73, %74 : vector<2x8x32xf32>
    %cst_37 = arith.constant 2.000000e-01 : f32
    %76 = vector.broadcast %cst_37 : f32 to vector<2x8x32xf32>
    %77 = arith.mulf %73, %76 : vector<2x8x32xf32>
    %78 = arith.select %75, %73, %77 : vector<2x8x32xi1>, vector<2x8x32xf32>
    %79 = tpu.iota {dimensions = array<i32: 1>} : vector<2x8x8xi32>
    %80 = tpu.iota {dimensions = array<i32: 2>} : vector<2x8x8xi32>
    %c1_i32_38 = arith.constant 1 : i32
    %81 = vector.broadcast %c1_i32_38 : i32 to vector<2x8x8xi32>
    %82 = arith.muli %81, %79 : vector<2x8x8xi32>
    %c-1_i32_39 = arith.constant -1 : i32
    %83 = vector.broadcast %c-1_i32_39 : i32 to vector<2x8x8xi32>
    %84 = arith.addi %82, %83 : vector<2x8x8xi32>
    %85 = arith.cmpi eq, %80, %84 : vector<2x8x8xi32>
    %cst_40 = arith.constant 1.000000e+00 : f32
    %cst_41 = arith.constant 0.000000e+00 : f32
    %86 = vector.broadcast %cst_40 : f32 to vector<2x8x8xf32>
    %87 = vector.broadcast %cst_41 : f32 to vector<2x8x8xf32>
    %88 = arith.select %85, %86, %87 : vector<2x8x8xi1>, vector<2x8x8xf32>
    "tpu.trace_start"() <{level = 10 : i32, message = "bts,bsc->btc"}> : () -> ()
    %cst_42 = arith.constant dense<0.000000e+00> : vector<2x8x32xf32>
    %89 = tpu.matmul %88, %78, %cst_42 {dimension_numbers = #tpu.dot_dimension_numbers<[2], [1], [1], [2], [0, 0, 0, 1, 1, 2], [0], [0]>} : vector<2x8x8xf32>, vector<2x8x32xf32>, vector<2x8x32xf32> -> vector<2x8x32xf32>
    "tpu.trace_stop"() : () -> ()
    %90 = vector.shape_cast %89 : vector<2x8x32xf32> to vector<16x32xf32>
    %91 = vector.extract_strided_slice %3 {offsets = [0, 0, 0], sizes = [1, 32, 32], strides = [1, 1, 1]} : vector<3x32x32xf32> to vector<1x32x32xf32>
    %92 = vector.shape_cast %91 : vector<1x32x32xf32> to vector<32x32xf32>
    %cst_43 = arith.constant dense<0.000000e+00> : vector<16x32xf32>
    %93 = tpu.matmul %90, %92, %cst_43 {dimension_numbers = #tpu.dot_dimension_numbers<[1], [0], [0], [1], [0, 0, 1, 1], [], []>} : vector<16x32xf32>, vector<32x32xf32>, vector<16x32xf32> -> vector<16x32xf32>
    %94 = vector.shape_cast %78 : vector<2x8x32xf32> to vector<16x32xf32>
    %95 = vector.extract_strided_slice %3 {offsets = [1, 0, 0], sizes = [1, 32, 32], strides = [1, 1, 1]} : vector<3x32x32xf32> to vector<1x32x32xf32>
    %96 = vector.shape_cast %95 : vector<1x32x32xf32> to vector<32x32xf32>
    %cst_44 = arith.constant dense<0.000000e+00> : vector<16x32xf32>
    %97 = tpu.matmul %94, %96, %cst_44 {dimension_numbers = #tpu.dot_dimension_numbers<[1], [0], [0], [1], [0, 0, 1, 1], [], []>} : vector<16x32xf32>, vector<32x32xf32>, vector<16x32xf32> -> vector<16x32xf32>
    %98 = arith.addf %93, %97 : vector<16x32xf32>
    %99 = tpu.iota {dimensions = array<i32: 1>} : vector<2x8x8xi32>
    %100 = tpu.iota {dimensions = array<i32: 2>} : vector<2x8x8xi32>
    %c1_i32_45 = arith.constant 1 : i32
    %101 = vector.broadcast %c1_i32_45 : i32 to vector<2x8x8xi32>
    %102 = arith.muli %101, %99 : vector<2x8x8xi32>
    %c1_i32_46 = arith.constant 1 : i32
    %103 = vector.broadcast %c1_i32_46 : i32 to vector<2x8x8xi32>
    %104 = arith.addi %102, %103 : vector<2x8x8xi32>
    %105 = arith.cmpi eq, %100, %104 : vector<2x8x8xi32>
    %cst_47 = arith.constant 1.000000e+00 : f32
    %cst_48 = arith.constant 0.000000e+00 : f32
    %106 = vector.broadcast %cst_47 : f32 to vector<2x8x8xf32>
    %107 = vector.broadcast %cst_48 : f32 to vector<2x8x8xf32>
    %108 = arith.select %105, %106, %107 : vector<2x8x8xi1>, vector<2x8x8xf32>
    "tpu.trace_start"() <{level = 10 : i32, message = "bts,bsc->btc"}> : () -> ()
    %cst_49 = arith.constant dense<0.000000e+00> : vector<2x8x32xf32>
    %109 = tpu.matmul %108, %78, %cst_49 {dimension_numbers = #tpu.dot_dimension_numbers<[2], [1], [1], [2], [0, 0, 0, 1, 1, 2], [0], [0]>} : vector<2x8x8xf32>, vector<2x8x32xf32>, vector<2x8x32xf32> -> vector<2x8x32xf32>
    "tpu.trace_stop"() : () -> ()
    %110 = vector.shape_cast %109 : vector<2x8x32xf32> to vector<16x32xf32>
    %111 = vector.extract_strided_slice %3 {offsets = [2, 0, 0], sizes = [1, 32, 32], strides = [1, 1, 1]} : vector<3x32x32xf32> to vector<1x32x32xf32>
    %112 = vector.shape_cast %111 : vector<1x32x32xf32> to vector<32x32xf32>
    %cst_50 = arith.constant dense<0.000000e+00> : vector<16x32xf32>
    %113 = tpu.matmul %110, %112, %cst_50 {dimension_numbers = #tpu.dot_dimension_numbers<[1], [0], [0], [1], [0, 0, 1, 1], [], []>} : vector<16x32xf32>, vector<32x32xf32>, vector<16x32xf32> -> vector<16x32xf32>
    %114 = arith.addf %98, %113 : vector<16x32xf32>
    %115 = vector.shape_cast %114 : vector<16x32xf32> to vector<2x8x32xf32>
    %116 = vector.shape_cast %4 : vector<1x32xf32> to vector<1x1x32xf32>
    %117 = vector.broadcast %116 : vector<1x1x32xf32> to vector<2x8x32xf32>
    %118 = arith.addf %115, %117 : vector<2x8x32xf32>
    %cst_51 = arith.constant 0.000000e+00 : f32
    %119 = vector.broadcast %cst_51 : f32 to vector<2x8x32xf32>
    %120 = arith.cmpf oge, %118, %119 : vector<2x8x32xf32>
    %cst_52 = arith.constant 2.000000e-01 : f32
    %121 = vector.broadcast %cst_52 : f32 to vector<2x8x32xf32>
    %122 = arith.mulf %118, %121 : vector<2x8x32xf32>
    %123 = arith.select %120, %118, %122 : vector<2x8x32xi1>, vector<2x8x32xf32>
    "tpu.trace_start"() <{level = 10 : i32, message = "bts,bsc->btc"}> : () -> ()
    %cst_53 = arith.constant dense<0.000000e+00> : vector<2x8x32xf32>
    %124 = tpu.matmul %88, %123, %cst_53 {dimension_numbers = #tpu.dot_dimension_numbers<[2], [1], [1], [2], [0, 0, 0, 1, 1, 2], [0], [0]>} : vector<2x8x8xf32>, vector<2x8x32xf32>, vector<2x8x32xf32> -> vector<2x8x32xf32>
    "tpu.trace_stop"() : () -> ()
    %125 = vector.shape_cast %124 : vector<2x8x32xf32> to vector<16x32xf32>
    %126 = vector.extract_strided_slice %5 {offsets = [0, 0, 0], sizes = [1, 32, 32], strides = [1, 1, 1]} : vector<3x32x32xf32> to vector<1x32x32xf32>
    %127 = vector.shape_cast %126 : vector<1x32x32xf32> to vector<32x32xf32>
    %cst_54 = arith.constant dense<0.000000e+00> : vector<16x32xf32>
    %128 = tpu.matmul %125, %127, %cst_54 {dimension_numbers = #tpu.dot_dimension_numbers<[1], [0], [0], [1], [0, 0, 1, 1], [], []>} : vector<16x32xf32>, vector<32x32xf32>, vector<16x32xf32> -> vector<16x32xf32>
    %129 = vector.shape_cast %123 : vector<2x8x32xf32> to vector<16x32xf32>
    %130 = vector.extract_strided_slice %5 {offsets = [1, 0, 0], sizes = [1, 32, 32], strides = [1, 1, 1]} : vector<3x32x32xf32> to vector<1x32x32xf32>
    %131 = vector.shape_cast %130 : vector<1x32x32xf32> to vector<32x32xf32>
    %cst_55 = arith.constant dense<0.000000e+00> : vector<16x32xf32>
    %132 = tpu.matmul %129, %131, %cst_55 {dimension_numbers = #tpu.dot_dimension_numbers<[1], [0], [0], [1], [0, 0, 1, 1], [], []>} : vector<16x32xf32>, vector<32x32xf32>, vector<16x32xf32> -> vector<16x32xf32>
    %133 = arith.addf %128, %132 : vector<16x32xf32>
    "tpu.trace_start"() <{level = 10 : i32, message = "bts,bsc->btc"}> : () -> ()
    %cst_56 = arith.constant dense<0.000000e+00> : vector<2x8x32xf32>
    %134 = tpu.matmul %108, %123, %cst_56 {dimension_numbers = #tpu.dot_dimension_numbers<[2], [1], [1], [2], [0, 0, 0, 1, 1, 2], [0], [0]>} : vector<2x8x8xf32>, vector<2x8x32xf32>, vector<2x8x32xf32> -> vector<2x8x32xf32>
    "tpu.trace_stop"() : () -> ()
    %135 = vector.shape_cast %134 : vector<2x8x32xf32> to vector<16x32xf32>
    %136 = vector.extract_strided_slice %5 {offsets = [2, 0, 0], sizes = [1, 32, 32], strides = [1, 1, 1]} : vector<3x32x32xf32> to vector<1x32x32xf32>
    %137 = vector.shape_cast %136 : vector<1x32x32xf32> to vector<32x32xf32>
    %cst_57 = arith.constant dense<0.000000e+00> : vector<16x32xf32>
    %138 = tpu.matmul %135, %137, %cst_57 {dimension_numbers = #tpu.dot_dimension_numbers<[1], [0], [0], [1], [0, 0, 1, 1], [], []>} : vector<16x32xf32>, vector<32x32xf32>, vector<16x32xf32> -> vector<16x32xf32>
    %139 = arith.addf %133, %138 : vector<16x32xf32>
    %140 = vector.shape_cast %139 : vector<16x32xf32> to vector<2x8x32xf32>
    %141 = vector.shape_cast %6 : vector<1x32xf32> to vector<1x1x32xf32>
    %142 = vector.broadcast %141 : vector<1x1x32xf32> to vector<2x8x32xf32>
    %143 = arith.addf %140, %142 : vector<2x8x32xf32>
    %144 = arith.addf %143, %78 : vector<2x8x32xf32>
    %c0_58 = arith.constant 0 : index
    %c0_59 = arith.constant 0 : index
    %c0_60 = arith.constant 0 : index
    %145 = vector.load %arg7[%c0_58, %c0_59, %c0_60] : memref<4x32x32xf32, #tpu.memory_space<vmem>>, vector<4x32x32xf32>
    %c0_61 = arith.constant 0 : index
    %c0_62 = arith.constant 0 : index
    %146 = vector.load %arg8[%c0_61, %c0_62] : memref<1x32xf32, #tpu.memory_space<vmem>>, vector<1x32xf32>
    %c0_63 = arith.constant 0 : index
    %c0_64 = arith.constant 0 : index
    %c0_65 = arith.constant 0 : index
    %147 = vector.load %arg9[%c0_63, %c0_64, %c0_65] : memref<3x32x32xf32, #tpu.memory_space<vmem>>, vector<3x32x32xf32>
    %c0_66 = arith.constant 0 : index
    %c0_67 = arith.constant 0 : index
    %148 = vector.load %arg10[%c0_66, %c0_67] : memref<1x32xf32, #tpu.memory_space<vmem>>, vector<1x32xf32>
    %c0_68 = arith.constant 0 : index
    %c0_69 = arith.constant 0 : index
    %c0_70 = arith.constant 0 : index
    %149 = vector.load %arg11[%c0_68, %c0_69, %c0_70] : memref<3x32x32xf32, #tpu.memory_space<vmem>>, vector<3x32x32xf32>
    %c0_71 = arith.constant 0 : index
    %c0_72 = arith.constant 0 : index
    %150 = vector.load %arg12[%c0_71, %c0_72] : memref<1x32xf32, #tpu.memory_space<vmem>>, vector<1x32xf32>
    %151 = tpu.iota {dimensions = array<i32: 1>} : vector<2x4x8xi32>
    %152 = tpu.iota {dimensions = array<i32: 2>} : vector<2x4x8xi32>
    %c2_i32_73 = arith.constant 2 : i32
    %153 = vector.broadcast %c2_i32_73 : i32 to vector<2x4x8xi32>
    %154 = arith.muli %153, %151 : vector<2x4x8xi32>
    %c-1_i32_74 = arith.constant -1 : i32
    %155 = vector.broadcast %c-1_i32_74 : i32 to vector<2x4x8xi32>
    %156 = arith.addi %154, %155 : vector<2x4x8xi32>
    %157 = arith.cmpi eq, %152, %156 : vector<2x4x8xi32>
    %cst_75 = arith.constant 1.000000e+00 : f32
    %cst_76 = arith.constant 0.000000e+00 : f32
    %158 = vector.broadcast %cst_75 : f32 to vector<2x4x8xf32>
    %159 = vector.broadcast %cst_76 : f32 to vector<2x4x8xf32>
    %160 = arith.select %157, %158, %159 : vector<2x4x8xi1>, vector<2x4x8xf32>
    "tpu.trace_start"() <{level = 10 : i32, message = "bts,bsc->btc"}> : () -> ()
    %cst_77 = arith.constant dense<0.000000e+00> : vector<2x4x32xf32>
    %161 = tpu.matmul %160, %144, %cst_77 {dimension_numbers = #tpu.dot_dimension_numbers<[2], [1], [1], [2], [0, 0, 0, 1, 1, 2], [0], [0]>} : vector<2x4x8xf32>, vector<2x8x32xf32>, vector<2x4x32xf32> -> vector<2x4x32xf32>
    "tpu.trace_stop"() : () -> ()
    %162 = vector.shape_cast %161 : vector<2x4x32xf32> to vector<8x32xf32>
    %163 = vector.extract_strided_slice %145 {offsets = [0, 0, 0], sizes = [1, 32, 32], strides = [1, 1, 1]} : vector<4x32x32xf32> to vector<1x32x32xf32>
    %164 = vector.shape_cast %163 : vector<1x32x32xf32> to vector<32x32xf32>
    %cst_78 = arith.constant dense<0.000000e+00> : vector<8x32xf32>
    %165 = tpu.matmul %162, %164, %cst_78 {dimension_numbers = #tpu.dot_dimension_numbers<[1], [0], [0], [1], [0, 0, 1, 1], [], []>} : vector<8x32xf32>, vector<32x32xf32>, vector<8x32xf32> -> vector<8x32xf32>
    %166 = tpu.iota {dimensions = array<i32: 1>} : vector<2x4x8xi32>
    %167 = tpu.iota {dimensions = array<i32: 2>} : vector<2x4x8xi32>
    %c2_i32_79 = arith.constant 2 : i32
    %168 = vector.broadcast %c2_i32_79 : i32 to vector<2x4x8xi32>
    %169 = arith.muli %168, %166 : vector<2x4x8xi32>
    %c0_i32_80 = arith.constant 0 : i32
    %170 = vector.broadcast %c0_i32_80 : i32 to vector<2x4x8xi32>
    %171 = arith.addi %169, %170 : vector<2x4x8xi32>
    %172 = arith.cmpi eq, %167, %171 : vector<2x4x8xi32>
    %cst_81 = arith.constant 1.000000e+00 : f32
    %cst_82 = arith.constant 0.000000e+00 : f32
    %173 = vector.broadcast %cst_81 : f32 to vector<2x4x8xf32>
    %174 = vector.broadcast %cst_82 : f32 to vector<2x4x8xf32>
    %175 = arith.select %172, %173, %174 : vector<2x4x8xi1>, vector<2x4x8xf32>
    "tpu.trace_start"() <{level = 10 : i32, message = "bts,bsc->btc"}> : () -> ()
    %cst_83 = arith.constant dense<0.000000e+00> : vector<2x4x32xf32>
    %176 = tpu.matmul %175, %144, %cst_83 {dimension_numbers = #tpu.dot_dimension_numbers<[2], [1], [1], [2], [0, 0, 0, 1, 1, 2], [0], [0]>} : vector<2x4x8xf32>, vector<2x8x32xf32>, vector<2x4x32xf32> -> vector<2x4x32xf32>
    "tpu.trace_stop"() : () -> ()
    %177 = vector.shape_cast %176 : vector<2x4x32xf32> to vector<8x32xf32>
    %178 = vector.extract_strided_slice %145 {offsets = [1, 0, 0], sizes = [1, 32, 32], strides = [1, 1, 1]} : vector<4x32x32xf32> to vector<1x32x32xf32>
    %179 = vector.shape_cast %178 : vector<1x32x32xf32> to vector<32x32xf32>
    %cst_84 = arith.constant dense<0.000000e+00> : vector<8x32xf32>
    %180 = tpu.matmul %177, %179, %cst_84 {dimension_numbers = #tpu.dot_dimension_numbers<[1], [0], [0], [1], [0, 0, 1, 1], [], []>} : vector<8x32xf32>, vector<32x32xf32>, vector<8x32xf32> -> vector<8x32xf32>
    %181 = arith.addf %165, %180 : vector<8x32xf32>
    %182 = tpu.iota {dimensions = array<i32: 1>} : vector<2x4x8xi32>
    %183 = tpu.iota {dimensions = array<i32: 2>} : vector<2x4x8xi32>
    %c2_i32_85 = arith.constant 2 : i32
    %184 = vector.broadcast %c2_i32_85 : i32 to vector<2x4x8xi32>
    %185 = arith.muli %184, %182 : vector<2x4x8xi32>
    %c1_i32_86 = arith.constant 1 : i32
    %186 = vector.broadcast %c1_i32_86 : i32 to vector<2x4x8xi32>
    %187 = arith.addi %185, %186 : vector<2x4x8xi32>
    %188 = arith.cmpi eq, %183, %187 : vector<2x4x8xi32>
    %cst_87 = arith.constant 1.000000e+00 : f32
    %cst_88 = arith.constant 0.000000e+00 : f32
    %189 = vector.broadcast %cst_87 : f32 to vector<2x4x8xf32>
    %190 = vector.broadcast %cst_88 : f32 to vector<2x4x8xf32>
    %191 = arith.select %188, %189, %190 : vector<2x4x8xi1>, vector<2x4x8xf32>
    "tpu.trace_start"() <{level = 10 : i32, message = "bts,bsc->btc"}> : () -> ()
    %cst_89 = arith.constant dense<0.000000e+00> : vector<2x4x32xf32>
    %192 = tpu.matmul %191, %144, %cst_89 {dimension_numbers = #tpu.dot_dimension_numbers<[2], [1], [1], [2], [0, 0, 0, 1, 1, 2], [0], [0]>} : vector<2x4x8xf32>, vector<2x8x32xf32>, vector<2x4x32xf32> -> vector<2x4x32xf32>
    "tpu.trace_stop"() : () -> ()
    %193 = vector.shape_cast %192 : vector<2x4x32xf32> to vector<8x32xf32>
    %194 = vector.extract_strided_slice %145 {offsets = [2, 0, 0], sizes = [1, 32, 32], strides = [1, 1, 1]} : vector<4x32x32xf32> to vector<1x32x32xf32>
    %195 = vector.shape_cast %194 : vector<1x32x32xf32> to vector<32x32xf32>
    %cst_90 = arith.constant dense<0.000000e+00> : vector<8x32xf32>
    %196 = tpu.matmul %193, %195, %cst_90 {dimension_numbers = #tpu.dot_dimension_numbers<[1], [0], [0], [1], [0, 0, 1, 1], [], []>} : vector<8x32xf32>, vector<32x32xf32>, vector<8x32xf32> -> vector<8x32xf32>
    %197 = arith.addf %181, %196 : vector<8x32xf32>
    %198 = tpu.iota {dimensions = array<i32: 1>} : vector<2x4x8xi32>
    %199 = tpu.iota {dimensions = array<i32: 2>} : vector<2x4x8xi32>
    %c2_i32_91 = arith.constant 2 : i32
    %200 = vector.broadcast %c2_i32_91 : i32 to vector<2x4x8xi32>
    %201 = arith.muli %200, %198 : vector<2x4x8xi32>
    %c2_i32_92 = arith.constant 2 : i32
    %202 = vector.broadcast %c2_i32_92 : i32 to vector<2x4x8xi32>
    %203 = arith.addi %201, %202 : vector<2x4x8xi32>
    %204 = arith.cmpi eq, %199, %203 : vector<2x4x8xi32>
    %cst_93 = arith.constant 1.000000e+00 : f32
    %cst_94 = arith.constant 0.000000e+00 : f32
    %205 = vector.broadcast %cst_93 : f32 to vector<2x4x8xf32>
    %206 = vector.broadcast %cst_94 : f32 to vector<2x4x8xf32>
    %207 = arith.select %204, %205, %206 : vector<2x4x8xi1>, vector<2x4x8xf32>
    "tpu.trace_start"() <{level = 10 : i32, message = "bts,bsc->btc"}> : () -> ()
    %cst_95 = arith.constant dense<0.000000e+00> : vector<2x4x32xf32>
    %208 = tpu.matmul %207, %144, %cst_95 {dimension_numbers = #tpu.dot_dimension_numbers<[2], [1], [1], [2], [0, 0, 0, 1, 1, 2], [0], [0]>} : vector<2x4x8xf32>, vector<2x8x32xf32>, vector<2x4x32xf32> -> vector<2x4x32xf32>
    "tpu.trace_stop"() : () -> ()
    %209 = vector.shape_cast %208 : vector<2x4x32xf32> to vector<8x32xf32>
    %210 = vector.extract_strided_slice %145 {offsets = [3, 0, 0], sizes = [1, 32, 32], strides = [1, 1, 1]} : vector<4x32x32xf32> to vector<1x32x32xf32>
    %211 = vector.shape_cast %210 : vector<1x32x32xf32> to vector<32x32xf32>
    %cst_96 = arith.constant dense<0.000000e+00> : vector<8x32xf32>
    %212 = tpu.matmul %209, %211, %cst_96 {dimension_numbers = #tpu.dot_dimension_numbers<[1], [0], [0], [1], [0, 0, 1, 1], [], []>} : vector<8x32xf32>, vector<32x32xf32>, vector<8x32xf32> -> vector<8x32xf32>
    %213 = arith.addf %197, %212 : vector<8x32xf32>
    %214 = vector.shape_cast %213 : vector<8x32xf32> to vector<2x4x32xf32>
    %215 = vector.shape_cast %146 : vector<1x32xf32> to vector<1x1x32xf32>
    %216 = vector.broadcast %215 : vector<1x1x32xf32> to vector<2x4x32xf32>
    %217 = arith.addf %214, %216 : vector<2x4x32xf32>
    %cst_97 = arith.constant 0.000000e+00 : f32
    %218 = vector.broadcast %cst_97 : f32 to vector<2x4x32xf32>
    %219 = arith.cmpf oge, %217, %218 : vector<2x4x32xf32>
    %cst_98 = arith.constant 2.000000e-01 : f32
    %220 = vector.broadcast %cst_98 : f32 to vector<2x4x32xf32>
    %221 = arith.mulf %217, %220 : vector<2x4x32xf32>
    %222 = arith.select %219, %217, %221 : vector<2x4x32xi1>, vector<2x4x32xf32>
    %223 = tpu.iota {dimensions = array<i32: 1>} : vector<2x4x4xi32>
    %224 = tpu.iota {dimensions = array<i32: 2>} : vector<2x4x4xi32>
    %c1_i32_99 = arith.constant 1 : i32
    %225 = vector.broadcast %c1_i32_99 : i32 to vector<2x4x4xi32>
    %226 = arith.muli %225, %223 : vector<2x4x4xi32>
    %c-1_i32_100 = arith.constant -1 : i32
    %227 = vector.broadcast %c-1_i32_100 : i32 to vector<2x4x4xi32>
    %228 = arith.addi %226, %227 : vector<2x4x4xi32>
    %229 = arith.cmpi eq, %224, %228 : vector<2x4x4xi32>
    %cst_101 = arith.constant 1.000000e+00 : f32
    %cst_102 = arith.constant 0.000000e+00 : f32
    %230 = vector.broadcast %cst_101 : f32 to vector<2x4x4xf32>
    %231 = vector.broadcast %cst_102 : f32 to vector<2x4x4xf32>
    %232 = arith.select %229, %230, %231 : vector<2x4x4xi1>, vector<2x4x4xf32>
    "tpu.trace_start"() <{level = 10 : i32, message = "bts,bsc->btc"}> : () -> ()
    %cst_103 = arith.constant dense<0.000000e+00> : vector<2x4x32xf32>
    %233 = tpu.matmul %232, %222, %cst_103 {dimension_numbers = #tpu.dot_dimension_numbers<[2], [1], [1], [2], [0, 0, 0, 1, 1, 2], [0], [0]>} : vector<2x4x4xf32>, vector<2x4x32xf32>, vector<2x4x32xf32> -> vector<2x4x32xf32>
    "tpu.trace_stop"() : () -> ()
    %234 = vector.shape_cast %233 : vector<2x4x32xf32> to vector<8x32xf32>
    %235 = vector.extract_strided_slice %147 {offsets = [0, 0, 0], sizes = [1, 32, 32], strides = [1, 1, 1]} : vector<3x32x32xf32> to vector<1x32x32xf32>
    %236 = vector.shape_cast %235 : vector<1x32x32xf32> to vector<32x32xf32>
    %cst_104 = arith.constant dense<0.000000e+00> : vector<8x32xf32>
    %237 = tpu.matmul %234, %236, %cst_104 {dimension_numbers = #tpu.dot_dimension_numbers<[1], [0], [0], [1], [0, 0, 1, 1], [], []>} : vector<8x32xf32>, vector<32x32xf32>, vector<8x32xf32> -> vector<8x32xf32>
    %238 = vector.shape_cast %222 : vector<2x4x32xf32> to vector<8x32xf32>
    %239 = vector.extract_strided_slice %147 {offsets = [1, 0, 0], sizes = [1, 32, 32], strides = [1, 1, 1]} : vector<3x32x32xf32> to vector<1x32x32xf32>
    %240 = vector.shape_cast %239 : vector<1x32x32xf32> to vector<32x32xf32>
    %cst_105 = arith.constant dense<0.000000e+00> : vector<8x32xf32>
    %241 = tpu.matmul %238, %240, %cst_105 {dimension_numbers = #tpu.dot_dimension_numbers<[1], [0], [0], [1], [0, 0, 1, 1], [], []>} : vector<8x32xf32>, vector<32x32xf32>, vector<8x32xf32> -> vector<8x32xf32>
    %242 = arith.addf %237, %241 : vector<8x32xf32>
    %243 = tpu.iota {dimensions = array<i32: 1>} : vector<2x4x4xi32>
    %244 = tpu.iota {dimensions = array<i32: 2>} : vector<2x4x4xi32>
    %c1_i32_106 = arith.constant 1 : i32
    %245 = vector.broadcast %c1_i32_106 : i32 to vector<2x4x4xi32>
    %246 = arith.muli %245, %243 : vector<2x4x4xi32>
    %c1_i32_107 = arith.constant 1 : i32
    %247 = vector.broadcast %c1_i32_107 : i32 to vector<2x4x4xi32>
    %248 = arith.addi %246, %247 : vector<2x4x4xi32>
    %249 = arith.cmpi eq, %244, %248 : vector<2x4x4xi32>
    %cst_108 = arith.constant 1.000000e+00 : f32
    %cst_109 = arith.constant 0.000000e+00 : f32
    %250 = vector.broadcast %cst_108 : f32 to vector<2x4x4xf32>
    %251 = vector.broadcast %cst_109 : f32 to vector<2x4x4xf32>
    %252 = arith.select %249, %250, %251 : vector<2x4x4xi1>, vector<2x4x4xf32>
    "tpu.trace_start"() <{level = 10 : i32, message = "bts,bsc->btc"}> : () -> ()
    %cst_110 = arith.constant dense<0.000000e+00> : vector<2x4x32xf32>
    %253 = tpu.matmul %252, %222, %cst_110 {dimension_numbers = #tpu.dot_dimension_numbers<[2], [1], [1], [2], [0, 0, 0, 1, 1, 2], [0], [0]>} : vector<2x4x4xf32>, vector<2x4x32xf32>, vector<2x4x32xf32> -> vector<2x4x32xf32>
    "tpu.trace_stop"() : () -> ()
    %254 = vector.shape_cast %253 : vector<2x4x32xf32> to vector<8x32xf32>
    %255 = vector.extract_strided_slice %147 {offsets = [2, 0, 0], sizes = [1, 32, 32], strides = [1, 1, 1]} : vector<3x32x32xf32> to vector<1x32x32xf32>
    %256 = vector.shape_cast %255 : vector<1x32x32xf32> to vector<32x32xf32>
    %cst_111 = arith.constant dense<0.000000e+00> : vector<8x32xf32>
    %257 = tpu.matmul %254, %256, %cst_111 {dimension_numbers = #tpu.dot_dimension_numbers<[1], [0], [0], [1], [0, 0, 1, 1], [], []>} : vector<8x32xf32>, vector<32x32xf32>, vector<8x32xf32> -> vector<8x32xf32>
    %258 = arith.addf %242, %257 : vector<8x32xf32>
    %259 = vector.shape_cast %258 : vector<8x32xf32> to vector<2x4x32xf32>
    %260 = vector.shape_cast %148 : vector<1x32xf32> to vector<1x1x32xf32>
    %261 = vector.broadcast %260 : vector<1x1x32xf32> to vector<2x4x32xf32>
    %262 = arith.addf %259, %261 : vector<2x4x32xf32>
    %cst_112 = arith.constant 0.000000e+00 : f32
    %263 = vector.broadcast %cst_112 : f32 to vector<2x4x32xf32>
    %264 = arith.cmpf oge, %262, %263 : vector<2x4x32xf32>
    %cst_113 = arith.constant 2.000000e-01 : f32
    %265 = vector.broadcast %cst_113 : f32 to vector<2x4x32xf32>
    %266 = arith.mulf %262, %265 : vector<2x4x32xf32>
    %267 = arith.select %264, %262, %266 : vector<2x4x32xi1>, vector<2x4x32xf32>
    "tpu.trace_start"() <{level = 10 : i32, message = "bts,bsc->btc"}> : () -> ()
    %cst_114 = arith.constant dense<0.000000e+00> : vector<2x4x32xf32>
    %268 = tpu.matmul %232, %267, %cst_114 {dimension_numbers = #tpu.dot_dimension_numbers<[2], [1], [1], [2], [0, 0, 0, 1, 1, 2], [0], [0]>} : vector<2x4x4xf32>, vector<2x4x32xf32>, vector<2x4x32xf32> -> vector<2x4x32xf32>
    "tpu.trace_stop"() : () -> ()
    %269 = vector.shape_cast %268 : vector<2x4x32xf32> to vector<8x32xf32>
    %270 = vector.extract_strided_slice %149 {offsets = [0, 0, 0], sizes = [1, 32, 32], strides = [1, 1, 1]} : vector<3x32x32xf32> to vector<1x32x32xf32>
    %271 = vector.shape_cast %270 : vector<1x32x32xf32> to vector<32x32xf32>
    %cst_115 = arith.constant dense<0.000000e+00> : vector<8x32xf32>
    %272 = tpu.matmul %269, %271, %cst_115 {dimension_numbers = #tpu.dot_dimension_numbers<[1], [0], [0], [1], [0, 0, 1, 1], [], []>} : vector<8x32xf32>, vector<32x32xf32>, vector<8x32xf32> -> vector<8x32xf32>
    %273 = vector.shape_cast %267 : vector<2x4x32xf32> to vector<8x32xf32>
    %274 = vector.extract_strided_slice %149 {offsets = [1, 0, 0], sizes = [1, 32, 32], strides = [1, 1, 1]} : vector<3x32x32xf32> to vector<1x32x32xf32>
    %275 = vector.shape_cast %274 : vector<1x32x32xf32> to vector<32x32xf32>
    %cst_116 = arith.constant dense<0.000000e+00> : vector<8x32xf32>
    %276 = tpu.matmul %273, %275, %cst_116 {dimension_numbers = #tpu.dot_dimension_numbers<[1], [0], [0], [1], [0, 0, 1, 1], [], []>} : vector<8x32xf32>, vector<32x32xf32>, vector<8x32xf32> -> vector<8x32xf32>
    %277 = arith.addf %272, %276 : vector<8x32xf32>
    "tpu.trace_start"() <{level = 10 : i32, message = "bts,bsc->btc"}> : () -> ()
    %cst_117 = arith.constant dense<0.000000e+00> : vector<2x4x32xf32>
    %278 = tpu.matmul %252, %267, %cst_117 {dimension_numbers = #tpu.dot_dimension_numbers<[2], [1], [1], [2], [0, 0, 0, 1, 1, 2], [0], [0]>} : vector<2x4x4xf32>, vector<2x4x32xf32>, vector<2x4x32xf32> -> vector<2x4x32xf32>
    "tpu.trace_stop"() : () -> ()
    %279 = vector.shape_cast %278 : vector<2x4x32xf32> to vector<8x32xf32>
    %280 = vector.extract_strided_slice %149 {offsets = [2, 0, 0], sizes = [1, 32, 32], strides = [1, 1, 1]} : vector<3x32x32xf32> to vector<1x32x32xf32>
    %281 = vector.shape_cast %280 : vector<1x32x32xf32> to vector<32x32xf32>
    %cst_118 = arith.constant dense<0.000000e+00> : vector<8x32xf32>
    %282 = tpu.matmul %279, %281, %cst_118 {dimension_numbers = #tpu.dot_dimension_numbers<[1], [0], [0], [1], [0, 0, 1, 1], [], []>} : vector<8x32xf32>, vector<32x32xf32>, vector<8x32xf32> -> vector<8x32xf32>
    %283 = arith.addf %277, %282 : vector<8x32xf32>
    %284 = vector.shape_cast %283 : vector<8x32xf32> to vector<2x4x32xf32>
    %285 = vector.shape_cast %150 : vector<1x32xf32> to vector<1x1x32xf32>
    %286 = vector.broadcast %285 : vector<1x1x32xf32> to vector<2x4x32xf32>
    %287 = arith.addf %284, %286 : vector<2x4x32xf32>
    %288 = arith.addf %287, %222 : vector<2x4x32xf32>
    %c0_119 = arith.constant 0 : index
    %c0_120 = arith.constant 0 : index
    %c0_121 = arith.constant 0 : index
    %289 = vector.load %arg13[%c0_119, %c0_120, %c0_121] : memref<2x4x32xf32, #tpu.memory_space<vmem>>, vector<2x4x32xf32>
    tpu.vector_store %arg13[%c0_119, %c0_120, %c0_121], %288 {strides = array<i32>} : memref<2x4x32xf32, #tpu.memory_space<vmem>>, vector<2x4x32xf32>,
    return
  }
}

</mosaic_0001>

<bundles_post_ra>
// kernel: vae_conv_forward.4
= control target key start
LH: loop header
LB: loop body
LE: loop exit
PB: predicated region body
PF: predicated region fallthrough
CT: control target
= control target key end

     0   :  { %14 = vsyncpa [#allocation3], 0  ;;  %s422_s0 = inlined_call_operand.vmem [shape: f32[2,4,32], index: 0, kind: input, shape index: {}]   ;;  %s423_s1 = inlined_call_operand.hbm [shape: f32[32,32], index: 1, kind: input, shape index: {}]   ;;  %s424_s2 = inlined_call_operand.vmem [shape: f32[1,32], index: 2, kind: input, shape index: {}]   ;;  %s425_s3 = inlined_call_operand.hbm [shape: f32[32,32], index: 3, kind: input, shape index: {}]   ;;  %s426_s4 = inlined_call_operand.vmem [shape: f32[1,32], index: 4, kind: input, shape index: {}]   ;;  %s427_s5 = inlined_call_operand.vmem [shape: f32[2,4,32], index: 5, kind: input, shape index: {}]   ;;  %s428_s6 = inlined_call_operand.vmem [shape: f32[2,4,32], index: 6, kind: output, shape index: {0}]   ;;  %s429_s7 = inlined_call_operand.hbm [shape: f32[2,4,32], index: 7, kind: output, shape index: {1}]   ;;  %s430_s8 = inlined_call_operand.hbm [shape: f32[2,4,32], index: 8, kind: output, shape index: {2}]  }
   0x1   :  { %15 = vsyncpa [#allocation6], 0 }
   0x2   :  { %16 = vsyncpa [#allocation4], 0 }
   0x3   :  { %17 = vsyncpa [#allocation9], 0  ;;  %s24_s29 = sshll.u32 %s423_s1, 4  ;;  %s327_s30 = smov [#allocation2]   ;;  %s25_s29 = int_to_ptr.hbm [resolvable:$true] %s24_s29 }
   0x4   :  { %s26_s9 = sshll.u32 %s327_s30, 4  ;;  %s39_s12 = sshll.u32 %s425_s3, 4  ;;  %s27_s9 = int_to_ptr.vmem [resolvable:$true] %s26_s9  ;;  %s40_s12 = int_to_ptr.hbm [resolvable:$true] %s39_s12 }
   0x5   :  { %s328_s13 = smov 128   ;;  %s329_s14 = smov 8  }
   0x6   :  { %32 = dma.hbm_to_vmem [thread:$0]  %s25_s29, 512, %s27_s9, [#allocation3], %s328_s13, %s328_s13, %s329_s14  }
   0x7   :  { %s330_s15 = smov [#allocation5]  }
   0x8   :  { %s41_s16 = sshll.u32 %s330_s15, 4  ;;  %s42_s16 = int_to_ptr.vmem [resolvable:$true] %s41_s16 }
   0x9   :  { %47 = dma.hbm_to_vmem [thread:$0]  %s40_s12, 512, %s42_s16, [#allocation6], %s328_s13, %s328_s13, %s329_s14  }
   0xa   :  { %319 = dma.done.wait [#allocation3], 512  }
   0xb   :  { %320 = vsyncadd [#allocation3], 4294966784 }
   0xc   :  { %321 = dma.done.wait [#allocation6], 512  }
   0xd   :  { %322 = vsyncadd [#allocation6], 4294966784  ;;  %v102_v0 = vld [vmem:[#allocation5 + $0x18] sm:$0xff]  ;;  %v101_v1 = vld [vmem:[#allocation5 + $0x10] sm:$0xff]  ;;  %vm76_vm0 = vcmask 261120   ;;  %s331_s20 = smov [#allocation7]  }
   0xe   :  { %125 = vmatpush.msra.mxu1 %v102_v0  ;;  %v60_v2 = vld [vmem:[%s422_s0] sm:$0xf]  ;;  %v61_v3 = vld [vmem:[%s422_s0 + $0x4] sm:$0xf]  ;;  %v100_v4 = vld [vmem:[#allocation5 + $0x8] sm:$0xff]  ;;  %s173_s21 = sshll.u32 %s331_s20, 4  ;;  %s174_s21 = int_to_ptr.vmem [resolvable:$true] %s173_s21 }
   0xf   :  { %72 = vst [vmem:[#allocation1] ss:$2 sm:$0xff] %v60_v2  ;;  %v65_v5 = vld [vmem:[#allocation2 + $0x18] sm:$0xff]  ;;  %v64_v6 = vld [vmem:[#allocation2 + $0x10] sm:$0xff]  ;;  %v99_v7 = vld [vmem:[#allocation5] sm:$0xff]  ;;  %s175_s24 = sshll.u32 %s429_s7, 4  ;;  %s176_s24 = int_to_ptr.hbm [resolvable:$true] %s175_s24 }
  0x10   :  { %126 = vmatpush.msra.mxu1 %v101_v1  ;;  %74 = vst [vmem:[#allocation1 + $0x1] ss:$2 sm:$0xff] %v61_v3  ;;  %91 = vmatpush.msra.mxu0 %v65_v5  ;;  %v63_v8 = vld [vmem:[#allocation2 + $0x8] sm:$0xff]  ;;  %v62_v9 = vld [vmem:[#allocation2] sm:$0xff]  ;;  %v220_v12 = vld [vmem:[%s424_s2] ss:$0 sm:$0xff] }
  0x11   :  { %vm154_vm1 = vcmask 257024   ;;  %v219_v16 = vld [vmem:[%s426_s4] ss:$0 sm:$0xff]  ;;  %s332_s2 = smov 64   ;;  %s333_s27 = smov 4  }
  0x12   :  { %127 = vmatpush.msra.mxu1 %v100_v4  ;;  %92 = vmatpush.msra.mxu0 %v64_v6  ;;  %s334_s28 = smov [#allocation8]   ;;  %s188_s9 = sshll.u32 %s430_s8, 4  ;;  %v136_v22 = vld [vmem:[%s427_s5] sm:$0xf]  ;;  %v137_v24 = vld [vmem:[%s427_s5 + $0x4] sm:$0xf]  ;;  %s189_s9 = int_to_ptr.hbm [resolvable:$true] %s188_s9 }
  0x13   :  { %s186_s7 = sshll.u32 %s334_s28, 4  ;;  %s187_s7 = int_to_ptr.vmem [resolvable:$true] %s186_s7 }
  0x14   :  { %128 = vmatpush.msra.mxu1 %v99_v7  ;;  %93 = vmatpush.msra.mxu0 %v63_v8 }
  0x16   :  { %94 = vmatpush.msra.mxu0 %v62_v9 }
  0x17   :  { %v75_v10 = vld.sshfl [vmem:[#allocation1] sm:$0xff pattern:$0x75316420] }
  0x18   :  { %107 = vst [vmem:[#allocation1] ss:$2 sm:$0xff] %v60_v2  ;;  %209 = vmatmul.msk.f32.vlgmr.msra.gmra.mxu0 %vm76_vm0, %v75_v10 }
  0x19   :  { %109 = vst [vmem:[#allocation1 + $0x1] ss:$2 sm:$0xff] %v61_v3 }
  0x20   :  { %v110_v11 = vld.sshfl [vmem:[#allocation1] sm:$0xff pattern:$0x75316420] }
  0x21   :  { %210 = vmatmul.msk.f32.vlgmr.msra.gmra.mxu1 %vm76_vm0, %v110_v11 }
  0x95   :  { %v96_v13 = vpop.f32.mrf.mxu0 }
  0x96   :  { %v97_v14 = vadd.f32 %v220_v12, %v96_v13 }
  0x98   :  { %v152_v15 = vrot.slane %v97_v14, 4  ;;  %155 = vst.msk [vmem:[#allocation7] sm:$0xf] %vm154_vm1, %v97_v14 }
  0x9a   :  { %156 = vst.msk [vmem:[#allocation7 + $0x4] sm:$0xf] %vm154_vm1, %v152_v15 }
  0x9b   :  { %181 = dma.vmem_to_hbm [thread:$0]  %s174_s21, 128, %s176_s24, [#allocation4], %s332_s2, %s332_s2, %s333_s27  }
  0x9e   :  { %v130_v17 = vpop.f32.mrf.mxu1 }
  0x9f   :  { %v131_v18 = vadd.f32 %v219_v16, %v130_v17 }
  0xa1   :  { %v133_v19 = vmul.f32 0.5, %v131_v18  ;;  %v158_v20 = vrot.slane %v131_v18, 4  ;;  %160 = vst.msk [vmem:[#allocation8] sm:$0xf] %vm154_vm1, %v131_v18 }
  0xa3   :  { %v134_v21 = vmul.f32 1.442695, %v133_v19  ;;  %161 = vst.msk [vmem:[#allocation8 + $0x4] sm:$0xf] %vm154_vm1, %v158_v20 }
  0xa4   :  { %194 = dma.vmem_to_hbm [thread:$0]  %s187_s7, 128, %s189_s9, [#allocation9], %s332_s2, %s332_s2, %s333_s27  }
  0xa5   :  { %221 = vpow2.f32 %v134_v21 }
  0xab   :  { %v222_v23 = vpop.eup %221 }
  0xac   :  { %v139_v25 = vrot.slane %v222_v23, 4  ;;  %v141_v26 = vmul.f32 %v222_v23, %v136_v22 }
  0xae   :  { %v142_v27 = vmul.f32 %v139_v25, %v137_v24  ;;  %145 = vst [vmem:[#allocation1] ss:$2 sm:$0xff] %v141_v26 }
  0xb0   :  { %147 = vst [vmem:[#allocation1 + $0x1] ss:$2 sm:$0xff] %v142_v27 }
  0xb7   :  { %v148_v28 = vld.sshfl [vmem:[#allocation1] sm:$0xff pattern:$0x75316420] }
  0xb8   :  { %v150_v29 = vadd.f32 %v148_v28, %v97_v14 }
  0xba   :  { %v163_v30 = vrot.slane %v150_v29, 4  ;;  %165 = vst.msk [vmem:[%s428_s6] sm:$0xf] %vm154_vm1, %v150_v29 }
  0xbc   :  { %166 = vst.msk [vmem:[%s428_s6 + $0x4] sm:$0xf] %vm154_vm1, %v163_v30 }
  0xbd   :  { %323 = dma.done.wait [#allocation4], 128  }
  0xbe   :  { %324 = vsyncadd [#allocation4], 4294967168 }
  0xbf   :  { %325 = dma.done.wait [#allocation9], 128  }
  0xc0   :  { %326 = vsyncadd [#allocation9], 4294967168 }
  0xc1   :  { %205 = vsyncpa [#allocation3], 1 }
  0xc2   :  { %206 = vsyncpa [#allocation6], 1 }
  0xc3   :  { %207 = vsyncpa [#allocation4], 1 }
  0xc4   :  { %208 = vsyncpa [#allocation9], 1 }

// kernel: vae_conv_forward.3
= control target key start
LH: loop header
LB: loop body
LE: loop exit
PB: predicated region body
PF: predicated region fallthrough
CT: control target
= control target key end

     0   :  { %18 = vsyncpa [#allocation3], 0  ;;  %s2165_s0 = inlined_call_operand.hbm [shape: f32[2,16,16], index: 0, kind: input, shape index: {}]   ;;  %s2166_s1 = inlined_call_operand.hbm [shape: f32[4,16,32], index: 1, kind: input, shape index: {}]   ;;  %s2167_s2 = inlined_call_operand.vmem [shape: f32[1,32], index: 2, kind: input, shape index: {}]   ;;  %s2168_s3 = inlined_call_operand.hbm [shape: f32[3,32,32], index: 3, kind: input, shape index: {}]   ;;  %s2169_s4 = inlined_call_operand.vmem [shape: f32[1,32], index: 4, kind: input, shape index: {}]   ;;  %s2170_s5 = inlined_call_operand.hbm [shape: f32[3,32,32], index: 5, kind: input, shape index: {}]   ;;  %s2171_s6 = inlined_call_operand.vmem [shape: f32[1,32], index: 6, kind: input, shape index: {}]   ;;  %s2172_s7 = inlined_call_operand.hbm [shape: f32[4,32,32], index: 7, kind: input, shape index: {}]   ;;  %s2173_s8 = inlined_call_operand.vmem [shape: f32[1,32], index: 8, kind: input, shape index: {}]   ;;  %s2174_s9 = inlined_call_operand.hbm [shape: f32[3,32,32], index: 9, kind: input, shape index: {}]   ;;  %s2175_s10 = inlined_call_operand.vmem [shape: f32[1,32], index: 10, kind: input, shape index: {}]   ;;  %s2176_s11 = inlined_call_operand.hbm [shape: f32[3,32,32], index: 11, kind: input, shape index: {}]   ;;  %s2177_s12 = inlined_call_operand.vmem [shape: f32[1,32], index: 12, kind: input, shape index: {}]   ;;  %s2178_s13 = inlined_call_operand.vmem [shape: f32[2,4,32], index: 13, kind: output, shape index: {}]  }
   0x1   :  { %19 = vsyncpa [#allocation5], 0 }
   0x2   :  { %20 = vsyncpa [#allocation8], 0 }
   0x3   :  { %21 = vsyncpa [#allocation11], 0  ;;  %s39_s27 = sshll.u32 %s2166_s1, 4  ;;  %s1862_s28 = smov [#allocation4]   ;;  %s40_s27 = int_to_ptr.hbm [resolvable:$true] %s39_s27 }
   0x4   :  { %s41_s29 = sshll.u32 %s1862_s28, 4  ;;  %s69_s15 = sshll.u32 %s2170_s5, 4  ;;  %s42_s29 = int_to_ptr.vmem [resolvable:$true] %s41_s29  ;;  %s70_s15 = int_to_ptr.hbm [resolvable:$true] %s69_s15 }
   0x5   :  { %s1863_s16 = smov 128   ;;  %s1864_s17 = smov 8  }
   0x6   :  { %47 = dma.hbm_to_vmem [thread:$0]  %s40_s27, 1024, %s42_s29, [#allocation5], %s1863_s16, %s1863_s16, %s1864_s17  }
   0x7   :  { %s1865_s18 = smov [#allocation7]   ;;  %s99_s1 = sshll.u32 %s2174_s9, 4  ;;  %s100_s1 = int_to_ptr.hbm [resolvable:$true] %s99_s1 }
   0x8   :  { %s71_s19 = sshll.u32 %s1865_s18, 4  ;;  %s26_s23 = sshll.u32 %s2165_s0, 4  ;;  %s72_s19 = int_to_ptr.vmem [resolvable:$true] %s71_s19  ;;  %s27_s23 = int_to_ptr.hbm [resolvable:$true] %s26_s23 }
   0x9   :  { %77 = dma.hbm_to_vmem [thread:$0]  %s70_s15, 1536, %s72_s19, [#allocation8], %s1863_s16, %s1863_s16, %s1864_s17  }
   0xa   :  { %s1866_s24 = smov [#allocation10]   ;;  %s1867_s26 = smov [#allocation2]  }
   0xb   :  { %s101_s25 = sshll.u32 %s1866_s24, 4  ;;  %s28_s9 = sshll.u32 %s1867_s26, 4  ;;  %s102_s25 = int_to_ptr.vmem [resolvable:$true] %s101_s25  ;;  %s29_s9 = int_to_ptr.vmem [resolvable:$true] %s28_s9 }
   0xc   :  { %107 = dma.hbm_to_vmem [thread:$0]  %s100_s1, 1536, %s102_s25, [#allocation11], %s1863_s16, %s1863_s16, %s1864_s17  }
   0xd   :  { %s54_s29 = sshll.u32 %s2168_s3, 4  ;;  %s84_s14 = sshll.u32 %s2172_s7, 4  ;;  %s55_s29 = int_to_ptr.hbm [resolvable:$true] %s54_s29  ;;  %s85_s14 = int_to_ptr.hbm [resolvable:$true] %s84_s14 }
   0xe   :  { %34 = dma.hbm_to_vmem [thread:$0]  %s27_s23, 512, %s29_s9, [#allocation3], %s1863_s16, %s1863_s16, %s1864_s17  }
   0xf   :  { %s1868_s15 = smov [#allocation6]   ;;  %s1869_s19 = smov [#allocation9]  }
  0x10   :  { %s56_s18 = sshll.u32 %s1868_s15, 4  ;;  %s86_s3 = sshll.u32 %s1869_s19, 4  ;;  %s57_s18 = int_to_ptr.vmem [resolvable:$true] %s56_s18  ;;  %s87_s3 = int_to_ptr.vmem [resolvable:$true] %s86_s3 }
  0x11   :  { %62 = dma.hbm_to_vmem [thread:$0]  %s55_s29, 1536, %s57_s18, [#allocation5], %s1863_s16, %s1863_s16, %s1864_s17  }
  0x12   :  { %s114_s1 = sshll.u32 %s2176_s11, 4  ;;  %s1870_s7 = smov [#allocation12]   ;;  %s115_s1 = int_to_ptr.hbm [resolvable:$true] %s114_s1 }
  0x13   :  { %92 = dma.hbm_to_vmem [thread:$0]  %s85_s14, 2048, %s87_s3, [#allocation8], %s1863_s16, %s1863_s16, %s1864_s17  }
  0x14   :  { %s116_s5 = sshll.u32 %s1870_s7, 4  ;;  %s117_s5 = int_to_ptr.vmem [resolvable:$true] %s116_s5 }
  0x15   :  { %122 = dma.hbm_to_vmem [thread:$0]  %s115_s1, 1536, %s117_s5, [#allocation11], %s1863_s16, %s1863_s16, %s1864_s17  }
  0x16   :  { %1854 = dma.done.wait [#allocation3], 512  }
  0x17   :  { %1855 = vsyncadd [#allocation3], 4294966784 }
  0x18   :  { %1856 = dma.done.wait [#allocation5], 2560  }
  0x19   :  { %1857 = vsyncadd [#allocation5], 4294964736 }
  0x1a   :  { %1858 = dma.done.wait [#allocation8], 3584  }
  0x1b   :  { %1859 = vsyncadd [#allocation8], 4294963712 }
  0x1c   :  { %1860 = dma.done.wait [#allocation11], 3072  }
  0x1d   :  { %1861 = vsyncadd [#allocation11], 4294964224  ;;  %v192_v0 = vlaneseq  ;;  %v154_v5 = vld [vmem:[#allocation2 + $0x8] sm:$0xff]  ;;  %v156_v6 = vld [vmem:[#allocation2 + $0x18] sm:$0xff]  ;;  %vm200_vm1 = vcmask 130048   ;;  %v1871_v9 = vmov 0.0  }
  0x1e   :  { %v153_v7 = vld [vmem:[#allocation2] sm:$0xff]  ;;  %263 = vmatpush.msra.mxu2 %v154_v5  ;;  %283 = vmatpush.msra.mxu3 %v156_v6  ;;  %v155_v8 = vld [vmem:[#allocation2 + $0x10] sm:$0xff]  ;;  %v160_v13 = vld [vmem:[#allocation4 + $0x18] sm:$0xff]  ;;  %vm559_vm7 = vcmask 261120   ;;  %vm515_vm8 = vcmask 64512   ;;  %vm1224_vm14 = vcmask 1043456  }
  0x1f   :  { %v1984_v1 = vshrl.u32 %v192_v0, 7  ;;  %v1986_v2 = vand.u32 127, %v192_v0  ;;  %218 = vmatpush.msra.mxu0 %v154_v5  ;;  %238 = vmatpush.msra.mxu1 %v156_v6  ;;  %v158_v14 = vld [vmem:[#allocation4 + $0x8] sm:$0xff]  ;;  %v159_v18 = vld [vmem:[#allocation4 + $0x10] sm:$0xff]  ;;  %v157_v19 = vld [vmem:[#allocation4] sm:$0xff] }
  0x20   :  { %264 = vmatpush.msra.mxu2 %v153_v7  ;;  %284 = vmatpush.msra.mxu3 %v155_v8  ;;  %v162_v20 = vld [vmem:[#allocation4 + $0x28] sm:$0xff]  ;;  %v161_v21 = vld [vmem:[#allocation4 + $0x20] sm:$0xff]  ;;  %v164_v22 = vld [vmem:[#allocation4 + $0x38] sm:$0xff] }
  0x21   :  { %v196_v3 = vmul.u32 2, %v1984_v1  ;;  %219 = vmatpush.msra.mxu0 %v153_v7  ;;  %239 = vmatpush.msra.mxu1 %v155_v8  ;;  %v163_v23 = vld [vmem:[#allocation4 + $0x30] sm:$0xff]  ;;  %v173_v31 = vld [vmem:[#allocation6 + $0x38] sm:$0xff]  ;;  %v171_v33 = vld [vmem:[#allocation6 + $0x28] sm:$0xff]  ;;  %v512_v45 = vadd.s32 4294967295, %v1984_v1  ;;  %v618_v60 = vadd.s32 1, %v1984_v1 }
  0x22   :  { %367 = vmatpush.msrb.mxu2 %v154_v5  ;;  %387 = vmatpush.msrb.mxu3 %v156_v6  ;;  %v172_v32 = vld [vmem:[#allocation6 + $0x30] sm:$0xff]  ;;  %v170_v34 = vld [vmem:[#allocation6 + $0x20] sm:$0xff]  ;;  %v1680_v44 = vld [vmem:[%s2167_s2] ss:$0 sm:$0xff] }
  0x23   :  { %vm244_vm0 = vcmp.eq.s32.totalorder %v1986_v2, %v196_v3  ;;  %v197_v4 = vadd.s32 4294967295, %v196_v3  ;;  %v347_v12 = vadd.s32 1, %v196_v3  ;;  %309 = vmatpush.msrb.mxu0 %v160_v13  ;;  %v424_v16 = vadd.s32 2, %v196_v3  ;;  %338 = vmatpush.msrb.mxu1 %v158_v14  ;;  %v169_v52 = vld [vmem:[#allocation6 + $0x18] sm:$0xff]  ;;  %v168_v53 = vld [vmem:[#allocation6 + $0x10] sm:$0xff]  ;;  %v167_v54 = vld [vmem:[#allocation6 + $0x8] sm:$0xff] }
  0x24   :  { %v1991_v10 = vsel %vm244_vm0, 1.0, %v1871_v9  ;;  %368 = vmatpush.msrb.mxu2 %v153_v7  ;;  %388 = vmatpush.msrb.mxu3 %v155_v8  ;;  %vm513_vm5 = vcmp.eq.s32.totalorder %v1986_v2, %v512_v45  ;;  %v166_v55 = vld [vmem:[#allocation6] sm:$0xff]  ;;  %vm619_vm10 = vcmp.eq.s32.totalorder %v1986_v2, %v618_v60  ;;  %v176_v3 = vld [vmem:[#allocation6 + $0x50] sm:$0xff]  ;;  %v184_v13 = vld [vmem:[#allocation7 + $0x28] sm:$0xff]  ;;  %vm1221_vm0 = vcmask 31744  }
  0x25   :  { %vm198_vm2 = vcmp.eq.s32.totalorder %v1986_v2, %v197_v4  ;;  %1602 = vmatmul.msk.f32.vlgmr.msra.gmra.mxu2 %vm200_vm1, %v1991_v10  ;;  %1603 = vmatmul.msk.f32.vlgmr.msra.gmra.mxu3 %vm200_vm1, %v1991_v10  ;;  %vm348_vm3 = vcmp.eq.s32.totalorder %v1986_v2, %v347_v12  ;;  %vm425_vm4 = vcmp.eq.s32.totalorder %v1986_v2, %v424_v16  ;;  %v2035_v50 = vsel %vm513_vm5, 1.0, %v1871_v9  ;;  %v177_v2 = vld [vmem:[#allocation6 + $0x58] sm:$0xff]  ;;  %v175_v4 = vld [vmem:[#allocation6 + $0x48] sm:$0xff]  ;;  %v185_v12 = vld [vmem:[#allocation7 + $0x30] sm:$0xff] }
  0x26   :  { %v1995_v11 = vsel %vm198_vm2, 1.0, %v1871_v9  ;;  %v2007_v15 = vsel %vm348_vm3, 1.0, %v1871_v9  ;;  %444 = vmatpush.msra.mxu3 %v154_v5  ;;  %v2015_v17 = vsel %vm425_vm4, 1.0, %v1871_v9  ;;  %310 = vmatpush.msrb.mxu0 %v159_v18  ;;  %v2055_v0 = vsel %vm619_vm10, 1.0, %v1871_v9  ;;  %v174_v5 = vld [vmem:[#allocation6 + $0x40] sm:$0xff]  ;;  %v186_v9 = vld [vmem:[#allocation7 + $0x38] sm:$0xff] }
  0x27   :  { %1600 = vmatmul.msk.f32.vlgmr.msra.gmra.mxu0 %vm200_vm1, %v1995_v11  ;;  %1601 = vmatmul.msk.f32.vlgmr.msra.gmra.mxu1 %vm200_vm1, %v1995_v11  ;;  %v183_v14 = vld [vmem:[#allocation7 + $0x20] sm:$0xff]  ;;  %vm1589_vm3 = vcmask 257024  }
  0x28   :  { %445 = vmatpush.msra.mxu3 %v153_v7  ;;  %339 = vmatpush.msrb.mxu1 %v157_v19 }
  0x29   :  { %464 = vmatpush.msra.mxu0 %v156_v6  ;;  %413 = vmatpush.msra.mxu2 %v162_v20  ;;  %v1681_v20 = vld [vmem:[%s2169_s4] ss:$0 sm:$0xff] }
  0x2a   :  { %490 = vmatpush.msra.mxu1 %v164_v22 }
  0x2b   :  { %465 = vmatpush.msra.mxu0 %v155_v8  ;;  %414 = vmatpush.msra.mxu2 %v161_v21 }
  0x2c   :  { %491 = vmatpush.msra.mxu1 %v163_v23 }
  0x2d   :  { %1608 = vmatmul.msk.f32.vlgmr.msrb.gmra.mxu2 %vm200_vm1, %v2007_v15  ;;  %1609 = vmatmul.msk.f32.vlgmr.msrb.gmra.mxu3 %vm200_vm1, %v2007_v15 }
  0x2e   :  { %578 = vmatpush.msrb.mxu2 %v173_v31 }
  0x30   :  { %579 = vmatpush.msrb.mxu2 %v172_v32  ;;  %v181_v32 = vld [vmem:[#allocation7 + $0x10] sm:$0xff] }
  0x32   :  { %580 = vmatpush.msrb.mxu2 %v171_v33 }
  0x34   :  { %581 = vmatpush.msrb.mxu2 %v170_v34  ;;  %v180_v34 = vld [vmem:[#allocation7 + $0x8] sm:$0xff] }
  0x35   :  { %1612 = vmatmul.msk.f32.vlgmr.msra.gmra.mxu3 %vm200_vm1, %v2015_v17 }
  0xa4   :  { %v221_v24 = vpop.f32.mrf.mxu0  ;;  %v241_v27 = vpop.f32.mrf.mxu1 }
  0xa5   :  { %1606 = vmatmul.msk.f32.vlgmr.msrb.gmra.mxu1 %vm200_vm1, %v221_v24 }
  0xa8   :  { %v266_v25 = vpop.f32.mrf.mxu2  ;;  %v286_v26 = vpop.f32.mrf.mxu3 }
  0xa9   :  { %1604 = vmatmul.msk.f32.vlgmr.msrb.gmra.mxu0 %vm200_vm1, %v266_v25 }
  0xad   :  { %1607 = vmatmul.msk.f32.gmra.mxu1 %vm200_vm1, %v241_v27 }
  0xb0   :  { %v370_v28 = vpop.f32.mrf.mxu2  ;;  %v390_v29 = vpop.f32.mrf.mxu3 }
  0xb1   :  { %1605 = vmatmul.msk.f32.gmra.mxu0 %vm200_vm1, %v286_v26  ;;  %1610 = vmatmul.msk.f32.vlgmr.msra.gmra.mxu2 %vm200_vm1, %v370_v28 }
  0xb8   :  { %v447_v30 = vpop.f32.mrf.mxu3 }
  0xb9   :  { %1611 = vmatmul.msk.f32.gmra.mxu2 %vm200_vm1, %v390_v29  ;;  %1613 = vmatmul.msk.f32.vlgmr.msra.gmra.mxu0 %vm200_vm1, %v2015_v17  ;;  %v182_v29 = vld [vmem:[#allocation7 + $0x18] sm:$0xff] }
  0xba   :  { %1614 = vmatmul.msk.f32.vlgmr.msra.gmra.mxu1 %vm200_vm1, %v447_v30 }
 0x122   :  { %v341_v35 = vpop.f32.mrf.mxu1 }
 0x126   :  { %v312_v36 = vpop.f32.mrf.mxu0 }
 0x127   :  { %v342_v40 = vadd.f32 %v341_v35, %v312_v36 }
 0x12a   :  { %v344_v37 = vpop.f32.mrf.mxu1 }
 0x12e   :  { %v315_v38 = vpop.f32.mrf.mxu0 }
 0x12f   :  { %v345_v39 = vadd.f32 %v344_v37, %v315_v38  ;;  %v179_v37 = vld [vmem:[#allocation7] sm:$0xff]  ;;  %v190_v38 = vld [vmem:[#allocation7 + $0x58] sm:$0xff] }
 0x134   :  { %v416_v41 = vpop.f32.mrf.mxu2 }
 0x135   :  { %v422_v42 = vadd.f32 %v416_v41, %v342_v40  ;;  %v188_v40 = vld [vmem:[#allocation7 + $0x48] sm:$0xff]  ;;  %v187_v41 = vld [vmem:[#allocation7 + $0x40] sm:$0xff] }
 0x136   :  { %v467_v43 = vpop.f32.mrf.mxu0 }
 0x137   :  { %v493_v46 = vpop.f32.mrf.mxu1  ;;  %1615 = vmatmul.msk.f32.gmra.mxu1 %vm200_vm1, %v467_v43 }
 0x138   :  { %v499_v47 = vadd.f32 %v493_v46, %v422_v42 }
 0x13a   :  { %v504_v48 = vadd.f32 %v1680_v44, %v499_v47 }
 0x13c   :  { %v508_v49 = vmul.f32 0.2, %v504_v48  ;;  %vm506_vm6 = vcmp.ge.f32.partialorder %v504_v48, 0.0  ;;  %v419_v56 = vpop.f32.mrf.mxu2 }
 0x13d   :  { %v423_v57 = vadd.f32 %v419_v56, %v345_v39  ;;  %v189_v39 = vld [vmem:[#allocation7 + $0x50] sm:$0xff] }
 0x13e   :  { %v2037_v51 = vsel %vm506_vm6, %v504_v48, %v508_v49  ;;  %v1682_v49 = vld [vmem:[%s2171_s6] ss:$0 sm:$0xff] }
 0x13f   :  { %534 = vmatpush.msrb.mxu3 %v2037_v51  ;;  %1618 = vmatmul.msk.f32.vlgmr.msrb.gmra.mxu2 %vm559_vm7, %v2037_v51 }
 0x140   :  { %1616 = vmatmul.msk.f32.vlgmr.msrb.gmra.mxu3 %vm515_vm8, %v2035_v50 }
 0x141   :  { %607 = vmatpush.msra.mxu3 %v169_v52 }
 0x143   :  { %608 = vmatpush.msra.mxu3 %v168_v53 }
 0x145   :  { %609 = vmatpush.msra.mxu3 %v167_v54 }
 0x147   :  { %610 = vmatpush.msra.mxu3 %v166_v55 }
 0x149   :  { %764 = vmatpush.msrb.mxu3 %v186_v9  ;;  %v891_v9 = vld [vmem:[#allocation9 + $0x48] sm:$0xff] }
 0x14b   :  { %765 = vmatpush.msrb.mxu3 %v185_v12  ;;  %v890_v12 = vld [vmem:[#allocation9 + $0x40] sm:$0xff] }
 0x14d   :  { %766 = vmatpush.msrb.mxu3 %v184_v13 }
 0x14f   :  { %767 = vmatpush.msrb.mxu3 %v183_v14 }
 0x1b4   :  { %v496_v58 = vpop.f32.mrf.mxu1 }
 0x1b5   :  { %v500_v59 = vadd.f32 %v496_v58, %v423_v57  ;;  %v885_v58 = vld [vmem:[#allocation9 + $0x18] sm:$0xff] }
 0x1b7   :  { %v505_v61 = vadd.f32 %v1680_v44, %v500_v59 }
 0x1b9   :  { %v509_v62 = vmul.f32 0.2, %v505_v61  ;;  %vm507_vm9 = vcmp.ge.f32.partialorder %v505_v61, 0.0 }
 0x1bb   :  { %v2046_v63 = vsel %vm507_vm9, %v505_v61, %v509_v62  ;;  %v884_v61 = vld [vmem:[#allocation9 + $0x10] sm:$0xff] }
 0x1bc   :  { %554 = vmatpush.msrb.mxu0 %v2046_v63  ;;  %1619 = vmatmul.msk.f32.gmra.mxu2 %vm559_vm7, %v2046_v63 }
 0x1bd   :  { %659 = vmatpush.msrb.mxu1 %v2046_v63  ;;  %1617 = vmatmul.msk.f32.vlgmr.msrb.gmra.mxu0 %vm515_vm8, %v2035_v50 }
 0x1be   :  { %639 = vmatpush.msra.mxu0 %v2037_v51  ;;  %1623 = vmatmul.msk.f32.vlgmr.msrb.gmra.mxu1 %vm515_vm8, %v2055_v0 }
 0x1c0   :  { %682 = vmatpush.msrb.mxu0 %v177_v2  ;;  %v882_v2 = vld [vmem:[#allocation9] sm:$0xff] }
 0x1c2   :  { %683 = vmatpush.msrb.mxu0 %v176_v3  ;;  %v583_v18 = vpop.f32.mrf.mxu2 }
 0x1c3   :  { %v536_v1 = vpop.f32.mrf.mxu3 }
 0x1c4   :  { %1620 = vmatmul.msk.f32.vlgmr.msra.gmra.mxu3 %vm559_vm7, %v536_v1  ;;  %684 = vmatpush.msrb.mxu0 %v175_v4  ;;  %v883_v1 = vld [vmem:[#allocation9 + $0x8] sm:$0xff]  ;;  %v888_v4 = vld [vmem:[#allocation9 + $0x30] sm:$0xff] }
 0x1c5   :  { %1622 = vmatmul.msk.f32.vlgmr.msra.gmra.mxu0 %vm515_vm8, %v2055_v0 }
 0x1c6   :  { %685 = vmatpush.msrb.mxu0 %v174_v5  ;;  %v887_v5 = vld [vmem:[#allocation9 + $0x28] sm:$0xff] }
 0x23a   :  { %v556_v6 = vpop.f32.mrf.mxu0 }
 0x23b   :  { %1621 = vmatmul.msk.f32.gmra.mxu3 %vm559_vm7, %v556_v6  ;;  %v661_v8 = vpop.f32.mrf.mxu1  ;;  %v886_v6 = vld [vmem:[#allocation9 + $0x20] sm:$0xff] }
 0x23f   :  { %v586_v26 = vpop.f32.mrf.mxu2 }
 0x242   :  { %v641_v7 = vpop.f32.mrf.mxu0 }
 0x243   :  { %1624 = vmatmul.msk.f32.vlgmr.msrb.gmra.mxu0 %vm559_vm7, %v641_v7 }
 0x247   :  { %v612_v16 = vpop.f32.mrf.mxu3 }
 0x248   :  { %v613_v19 = vadd.f32 %v612_v16, %v583_v18 }
 0x24b   :  { %1625 = vmatmul.msk.f32.gmra.mxu0 %vm559_vm7, %v661_v8  ;;  %v892_v8 = vld [vmem:[#allocation9 + $0x50] sm:$0xff] }
 0x2be   :  { %v615_v24 = vpop.f32.mrf.mxu3 }
 0x2bf   :  { %v616_v27 = vadd.f32 %v615_v24, %v586_v26  ;;  %v895_v24 = vld [vmem:[#allocation9 + $0x68] sm:$0xff] }
 0x2c0   :  { %v687_v21 = vpop.f32.mrf.mxu0 }
 0x2c1   :  { %v693_v22 = vadd.f32 %v687_v21, %v613_v19 }
 0x2c3   :  { %v698_v23 = vadd.f32 %v1681_v20, %v693_v22  ;;  %v897_v22 = vld [vmem:[#allocation9 + $0x78] sm:$0xff] }
 0x2c5   :  { %v702_v25 = vmul.f32 0.2, %v698_v23  ;;  %vm700_vm11 = vcmp.ge.f32.partialorder %v698_v23, 0.0 }
 0x2c7   :  { %v704_v28 = vsel %vm700_vm11, %v698_v23, %v702_v25  ;;  %v896_v23 = vld [vmem:[#allocation9 + $0x70] sm:$0xff]  ;;  %v894_v25 = vld [vmem:[#allocation9 + $0x60] sm:$0xff] }
 0x2c8   :  { %v690_v30 = vpop.f32.mrf.mxu0  ;;  %721 = vmatpush.msra.mxu1 %v704_v28  ;;  %1628 = vmatmul.msk.f32.vlgmr.msrb.gmra.mxu3 %vm559_vm7, %v704_v28 }
 0x2c9   :  { %v694_v31 = vadd.f32 %v690_v30, %v616_v27  ;;  %1626 = vmatmul.msk.f32.vlgmr.msra.gmra.mxu1 %vm515_vm8, %v2035_v50  ;;  %v904_v30 = vld [vmem:[#allocation10 + $0x28] sm:$0xff] }
 0x2ca   :  { %793 = vmatpush.msrb.mxu1 %v182_v29  ;;  %v906_v29 = vld [vmem:[#allocation10 + $0x38] sm:$0xff] }
 0x2cb   :  { %v699_v33 = vadd.f32 %v1681_v20, %v694_v31  ;;  %v903_v31 = vld [vmem:[#allocation10 + $0x20] sm:$0xff] }
 0x2cc   :  { %794 = vmatpush.msrb.mxu1 %v181_v32 }
 0x2cd   :  { %v703_v35 = vmul.f32 0.2, %v699_v33  ;;  %vm701_vm12 = vcmp.ge.f32.partialorder %v699_v33, 0.0 }
 0x2ce   :  { %795 = vmatpush.msrb.mxu1 %v180_v34 }
 0x2cf   :  { %v705_v36 = vsel %vm701_vm12, %v699_v33, %v703_v35 }
 0x2d0   :  { %741 = vmatpush.msra.mxu2 %v705_v36  ;;  %1629 = vmatmul.msk.f32.gmra.mxu3 %vm559_vm7, %v705_v36 }
 0x2d1   :  { %839 = vmatpush.msra.mxu0 %v705_v36  ;;  %1627 = vmatmul.msk.f32.vlgmr.msra.gmra.mxu2 %vm515_vm8, %v2035_v50  ;;  %v1683_v36 = vld [vmem:[%s2173_s8] ss:$0 sm:$0xff] }
 0x2d2   :  { %819 = vmatpush.msrb.mxu2 %v704_v28  ;;  %1633 = vmatmul.msk.f32.vlgmr.msra.gmra.mxu0 %vm515_vm8, %v2055_v0 }
 0x2d3   :  { %796 = vmatpush.msrb.mxu1 %v179_v37 }
 0x2d4   :  { %862 = vmatpush.msra.mxu2 %v190_v38 }
 0x2d6   :  { %863 = vmatpush.msra.mxu2 %v189_v39 }
 0x2d8   :  { %864 = vmatpush.msra.mxu2 %v188_v40 }
 0x2d9   :  { %1632 = vmatmul.msk.f32.vlgmr.msrb.gmra.mxu2 %vm515_vm8, %v2055_v0 }
 0x2da   :  { %865 = vmatpush.msra.mxu2 %v187_v41 }
 0x346   :  { %v723_v42 = vpop.f32.mrf.mxu1 }
 0x347   :  { %1630 = vmatmul.msk.f32.vlgmr.msrb.gmra.mxu1 %vm559_vm7, %v723_v42 }
 0x34b   :  { %v769_v46 = vpop.f32.mrf.mxu3 }
 0x34f   :  { %v841_v45 = vpop.f32.mrf.mxu0 }
 0x353   :  { %v772_v57 = vpop.f32.mrf.mxu3 }
 0x354   :  { %v743_v43 = vpop.f32.mrf.mxu2 }
 0x355   :  { %1631 = vmatmul.msk.f32.gmra.mxu1 %vm559_vm7, %v743_v43 }
 0x35c   :  { %v821_v44 = vpop.f32.mrf.mxu2 }
 0x35d   :  { %1634 = vmatmul.msk.f32.vlgmr.msra.gmra.mxu2 %vm559_vm7, %v821_v44 }
 0x365   :  { %1635 = vmatmul.msk.f32.gmra.mxu2 %vm559_vm7, %v841_v45 }
 0x3c4   :  { %v798_v47 = vpop.f32.mrf.mxu1 }
 0x3c5   :  { %v799_v48 = vadd.f32 %v798_v47, %v769_v46  ;;  %v902_v47 = vld [vmem:[#allocation10 + $0x18] sm:$0xff] }
 0x3d2   :  { %v801_v55 = vpop.f32.mrf.mxu1 }
 0x3d3   :  { %v802_v59 = vadd.f32 %v801_v55, %v772_v57  ;;  %v908_v55 = vld [vmem:[#allocation10 + $0x48] sm:$0xff] }
 0x3e0   :  { %v867_v52 = vpop.f32.mrf.mxu2 }
 0x3e1   :  { %v873_v53 = vadd.f32 %v867_v52, %v799_v48  ;;  %v901_v48 = vld [vmem:[#allocation10 + $0x10] sm:$0xff]  ;;  %v899_v52 = vld [vmem:[#allocation10] sm:$0xff] }
 0x3e3   :  { %v878_v54 = vadd.f32 %v1682_v49, %v873_v53  ;;  %v910_v53 = vld [vmem:[#allocation10 + $0x58] sm:$0xff] }
 0x3e5   :  { %v880_v56 = vadd.f32 %v878_v54, %v2037_v51  ;;  %v909_v54 = vld [vmem:[#allocation10 + $0x50] sm:$0xff] }
 0x3e7   :  { %942 = vmatpush.msra.mxu3 %v880_v56  ;;  %984 = vmatpush.msra.mxu1 %v880_v56 }
 0x3e8   :  { %1082 = vmatpush.msrb.mxu2 %v880_v56  ;;  %v870_v60 = vpop.f32.mrf.mxu2  ;;  %1636 = vmatmul.msk.f32.vlgmr.msra.gmra.mxu3 %vm515_vm8, %v1995_v11 }
 0x3e9   :  { %v874_v62 = vadd.f32 %v870_v60, %v802_v59  ;;  %1057 = vmatpush.msrb.mxu1 %v885_v58  ;;  %1642 = vmatmul.msk.f32.vlgmr.msrb.gmra.mxu2 %vm515_vm8, %v2007_v15 }
 0x3ea   :  { %1638 = vmatmul.msk.f32.vlgmr.msra.gmra.mxu1 %vm515_vm8, %v1991_v10 }
 0x3eb   :  { %v879_v51 = vadd.f32 %v1682_v49, %v874_v62  ;;  %1058 = vmatpush.msrb.mxu1 %v884_v61  ;;  %v900_v49 = vld [vmem:[#allocation10 + $0x8] sm:$0xff] }
 0x3ed   :  { %v881_v3 = vadd.f32 %v879_v51, %v2046_v63  ;;  %1059 = vmatpush.msrb.mxu1 %v883_v1  ;;  %v889_v63 = vld [vmem:[#allocation9 + $0x38] sm:$0xff]  ;;  %v918_v51 = vld [vmem:[#allocation12 + $0x30] sm:$0xff] }
 0x3ee   :  { %v919_v1 = vld [vmem:[#allocation12 + $0x38] sm:$0xff] }
 0x3ef   :  { %1060 = vmatpush.msrb.mxu1 %v882_v2  ;;  %962 = vmatpush.msrb.mxu0 %v881_v3  ;;  %v917_v2 = vld [vmem:[#allocation12 + $0x28] sm:$0xff] }
 0x3f0   :  { %1004 = vmatpush.msrb.mxu3 %v881_v3  ;;  %1173 = vmatpush.msra.mxu2 %v881_v3 }
 0x3f1   :  { %1153 = vmatpush.msra.mxu1 %v880_v56  ;;  %1639 = vmatmul.msk.f32.vlgmr.msrb.gmra.mxu3 %vm515_vm8, %v1991_v10  ;;  %v893_v10 = vld [vmem:[#allocation9 + $0x58] sm:$0xff]  ;;  %v907_v56 = vld [vmem:[#allocation10 + $0x40] sm:$0xff] }
 0x3f2   :  { %1102 = vmatpush.msra.mxu3 %v881_v3  ;;  %1637 = vmatmul.msk.f32.vlgmr.msrb.gmra.mxu0 %vm515_vm8, %v1995_v11  ;;  %v916_v3 = vld [vmem:[#allocation12 + $0x20] sm:$0xff] }
 0x3f3   :  { %1646 = vmatmul.msk.f32.vlgmr.msra.gmra.mxu2 %vm515_vm8, %v2015_v17  ;;  %1029 = vmatpush.msra.mxu0 %v889_v63 }
 0x3f4   :  { %1198 = vmatpush.msrb.mxu3 %v897_v22  ;;  %1289 = vmatpush.msrb.mxu2 %v906_v29  ;;  %v923_v22 = vld [vmem:[#allocation12 + $0x58] sm:$0xff] }
 0x3f5   :  { %1030 = vmatpush.msra.mxu0 %v888_v4 }
 0x3f6   :  { %1199 = vmatpush.msrb.mxu3 %v896_v23  ;;  %v922_v23 = vld [vmem:[#allocation12 + $0x50] sm:$0xff] }
 0x3f7   :  { %1031 = vmatpush.msra.mxu0 %v887_v5 }
 0x3f8   :  { %1200 = vmatpush.msrb.mxu3 %v895_v24  ;;  %v920_v24 = vld [vmem:[#allocation12 + $0x40] sm:$0xff] }
 0x3f9   :  { %1643 = vmatmul.msk.f32.vlgmr.msra.gmra.mxu3 %vm515_vm8, %v2007_v15  ;;  %1032 = vmatpush.msra.mxu0 %v886_v6  ;;  %v1684_v6 = vld [vmem:[%s2175_s10] ss:$0 sm:$0xff] }
 0x3fa   :  { %1201 = vmatpush.msrb.mxu3 %v894_v25 }
 0x3fb   :  { %1127 = vmatpush.msrb.mxu0 %v893_v10 }
 0x3fc   :  { %1317 = vmatpush.msra.mxu3 %v902_v47 }
 0x3fd   :  { %1128 = vmatpush.msrb.mxu0 %v892_v8 }
 0x3fe   :  { %1318 = vmatpush.msra.mxu3 %v901_v48 }
 0x3ff   :  { %1129 = vmatpush.msrb.mxu0 %v891_v9 }
 0x400   :  { %1319 = vmatpush.msra.mxu3 %v900_v49 }
 0x401   :  { %1130 = vmatpush.msrb.mxu0 %v890_v12 }
 0x402   :  { %1320 = vmatpush.msra.mxu3 %v899_v52 }
 0x467   :  { %v986_v7 = vpop.f32.mrf.mxu1 }
 0x468   :  { %1011 = vst [vmem:[#allocation1] ss:$2 sm:$0xff] %v986_v7 }
 0x46b   :  { %v944_v11 = vpop.f32.mrf.mxu3 }
 0x46c   :  { %v1084_v16 = vpop.f32.mrf.mxu2 }
 0x46f   :  { %v964_v13 = vpop.f32.mrf.mxu0 }
 0x474   :  { %v1006_v15 = vpop.f32.mrf.mxu3 }
 0x475   :  { %1013 = vst [vmem:[#allocation1 + $0x1] ss:$2 sm:$0xff] %v1006_v15 }
 0x476   :  { %v1175_v21 = vpop.f32.mrf.mxu2 }
 0x47c   :  { %v1014_v14 = vld.sshfl [vmem:[#allocation1] sm:$0xff pattern:$0x75316420]  ;;  %v1104_v18 = vpop.f32.mrf.mxu3 }
 0x47d   :  { %1039 = vst [vmem:[#allocation1] ss:$2 sm:$0xff] %v944_v11  ;;  %1640 = vmatmul.msk.f32.vlgmr.msra.gmra.mxu0 %vm559_vm7, %v1014_v14 }
 0x47e   :  { %1041 = vst [vmem:[#allocation1 + $0x1] ss:$2 sm:$0xff] %v964_v13 }
 0x485   :  { %v1042_v19 = vld.sshfl [vmem:[#allocation1] sm:$0xff pattern:$0x75316420] }
 0x486   :  { %1109 = vst [vmem:[#allocation1] ss:$2 sm:$0xff] %v1084_v16  ;;  %1641 = vmatmul.msk.f32.vlgmr.msrb.gmra.mxu1 %vm559_vm7, %v1042_v19  ;;  %v914_v19 = vld [vmem:[#allocation12 + $0x10] sm:$0xff] }
 0x487   :  { %1111 = vst [vmem:[#allocation1 + $0x1] ss:$2 sm:$0xff] %v1104_v18  ;;  %v915_v18 = vld [vmem:[#allocation12 + $0x18] sm:$0xff] }
 0x48e   :  { %v1112_v20 = vld.sshfl [vmem:[#allocation1] sm:$0xff pattern:$0x75316420]  ;;  %1645 = vmatmul.msk.f32.vlgmr.msra.gmra.mxu1 %vm515_vm8, %v2015_v17  ;;  %v905_v17 = vld [vmem:[#allocation10 + $0x30] sm:$0xff] }
 0x48f   :  { %1644 = vmatmul.msk.f32.vlgmr.msrb.gmra.mxu0 %vm559_vm7, %v1112_v20  ;;  %1182 = vst [vmem:[#allocation1 + $0x1] ss:$2 sm:$0xff] %v1175_v21  ;;  %1290 = vmatpush.msrb.mxu2 %v905_v17  ;;  %v913_v20 = vld [vmem:[#allocation12 + $0x8] sm:$0xff]  ;;  %v912_v21 = vld [vmem:[#allocation12] sm:$0xff] }
 0x491   :  { %1291 = vmatpush.msrb.mxu2 %v904_v30 }
 0x493   :  { %1292 = vmatpush.msrb.mxu2 %v903_v31 }
 0x495   :  { %1387 = vmatpush.msra.mxu2 %v910_v53 }
 0x497   :  { %1388 = vmatpush.msra.mxu2 %v909_v54 }
 0x499   :  { %1389 = vmatpush.msra.mxu2 %v908_v55 }
 0x49b   :  { %1390 = vmatpush.msra.mxu2 %v907_v56 }
 0x4fa   :  { %v1034_v32 = vpop.f32.mrf.mxu0 }
 0x503   :  { %v1062_v26 = vpop.f32.mrf.mxu1 }
 0x504   :  { %v1063_v34 = vadd.f32 %v1062_v26, %v1034_v32  ;;  %v1685_v32 = vld [vmem:[%s2177_s12] ss:$0 sm:$0xff] }
 0x50b   :  { %v1155_v27 = vpop.f32.mrf.mxu1 }
 0x50c   :  { %1180 = vst [vmem:[#allocation1] ss:$2 sm:$0xff] %v1155_v27  ;;  %v1132_v33 = vpop.f32.mrf.mxu0 }
 0x50d   :  { %v1135_v35 = vadd.f32 %v1132_v33, %v1063_v34 }
 0x513   :  { %v1183_v28 = vld.sshfl [vmem:[#allocation1] sm:$0xff pattern:$0x75316420] }
 0x514   :  { %1647 = vmatmul.msk.f32.vlgmr.msrb.gmra.mxu3 %vm559_vm7, %v1183_v28 }
 0x597   :  { %v1203_v37 = vpop.f32.mrf.mxu3 }
 0x598   :  { %v1206_v38 = vadd.f32 %v1203_v37, %v1135_v35 }
 0x59a   :  { %v1208_v39 = vrot.slane %v1206_v38, 4  ;;  %v1213_v40 = vadd.f32 %v1683_v36, %v1206_v38 }
 0x59c   :  { %v1214_v41 = vadd.f32 %v1683_v36, %v1208_v39  ;;  %vm1215_vm13 = vcmp.ge.f32.partialorder %v1213_v40, 0.0  ;;  %v1217_v42 = vmul.f32 0.2, %v1213_v40 }
 0x59e   :  { %v1218_v43 = vmul.f32 0.2, %v1214_v41  ;;  %v2111_v44 = vsel %vm1215_vm13, %v1213_v40, %v1217_v42  ;;  %vm1216_vm15 = vcmp.ge.f32.partialorder %v1214_v41, 0.0 }
 0x59f   :  { %1648 = vmatpush.msk.msra.mxu0 %vm1224_vm14, %v2111_v44  ;;  %1271 = vst [vmem:[#allocation1] ss:$2 sm:$0xff] %v2111_v44 }
 0x5a0   :  { %v2118_v45 = vsel %vm1216_vm15, %v1214_v41, %v1218_v43  ;;  %1649 = vmatmul.msk.f32.vlgmr.msra.gmra.mxu0 %vm1221_vm0, %v2035_v50 }
 0x5a1   :  { %1654 = vmatpush.msk.msrb.mxu0 %vm1224_vm14, %v2111_v44  ;;  %1650 = vmatpush.msk.msrb.mxu1 %vm1224_vm14, %v2118_v45  ;;  %1273 = vst [vmem:[#allocation1 + $0x1] ss:$2 sm:$0xff] %v2118_v45 }
 0x5a2   :  { %1651 = vmatmul.msk.f32.vlgmr.msrb.gmra.mxu1 %vm1221_vm0, %v2035_v50 }
 0x5a3   :  { %1656 = vmatpush.msk.msra.mxu1 %vm1224_vm14, %v2118_v45 }
 0x5a5   :  { %1474 = vmatpush.msrb.mxu1 %v919_v1 }
 0x5a7   :  { %1475 = vmatpush.msrb.mxu1 %v918_v51 }
 0x5a8   :  { %v1274_v46 = vld.sshfl [vmem:[#allocation1] sm:$0xff pattern:$0x75316420]  ;;  %1655 = vmatmul.msk.f32.vlgmr.msrb.gmra.mxu0 %vm1221_vm0, %v2055_v0 }
 0x5a9   :  { %1652 = vmatmul.msk.f32.vlgmr.msrb.gmra.mxu2 %vm559_vm7, %v1274_v46  ;;  %1476 = vmatpush.msrb.mxu1 %v917_v2 }
 0x5aa   :  { %1657 = vmatmul.msk.f32.vlgmr.msra.gmra.mxu1 %vm1221_vm0, %v2055_v0  ;;  %1502 = vmatpush.msrb.mxu2 %v915_v18 }
 0x5ab   :  { %1477 = vmatpush.msrb.mxu1 %v916_v3 }
 0x5ac   :  { %1503 = vmatpush.msrb.mxu2 %v914_v19 }
 0x5ad   :  { %1570 = vmatpush.msra.mxu1 %v923_v22 }
 0x5ae   :  { %1504 = vmatpush.msrb.mxu2 %v913_v20 }
 0x5af   :  { %1571 = vmatpush.msra.mxu1 %v922_v23 }
 0x5b0   :  { %1505 = vmatpush.msrb.mxu2 %v912_v21 }
 0x61d   :  { %v1245_v57 = vpop.f32.mrf.mxu0 }
 0x61e   :  { %1299 = vst [vmem:[#allocation1] ss:$2 sm:$0xff] %v1245_v57 }
 0x61f   :  { %v1268_v58 = vpop.f32.mrf.mxu1 }
 0x620   :  { %1301 = vst [vmem:[#allocation1 + $0x1] ss:$2 sm:$0xff] %v1268_v58 }
 0x625   :  { %v1344_v59 = vpop.f32.mrf.mxu0 }
 0x627   :  { %v1302_v60 = vld.sshfl [vmem:[#allocation1] sm:$0xff pattern:$0x75316420]  ;;  %v1364_v61 = vpop.f32.mrf.mxu1 }
 0x628   :  { %1369 = vst [vmem:[#allocation1] ss:$2 sm:$0xff] %v1344_v59  ;;  %1653 = vmatmul.msk.f32.vlgmr.msra.gmra.mxu3 %vm559_vm7, %v1302_v60 }
 0x629   :  { %1371 = vst [vmem:[#allocation1 + $0x1] ss:$2 sm:$0xff] %v1364_v61 }
 0x62c   :  { %v1294_v63 = vpop.f32.mrf.mxu2 }
 0x630   :  { %v1372_v62 = vld.sshfl [vmem:[#allocation1] sm:$0xff pattern:$0x75316420] }
 0x631   :  { %1658 = vmatmul.msk.f32.vlgmr.msra.gmra.mxu2 %vm559_vm7, %v1372_v62 }
 0x6ab   :  { %v1322_v4 = vpop.f32.mrf.mxu3 }
 0x6ac   :  { %v1323_v5 = vadd.f32 %v1322_v4, %v1294_v63 }
 0x6b4   :  { %v1392_v7 = vpop.f32.mrf.mxu2 }
 0x6b5   :  { %v1395_v10 = vadd.f32 %v1392_v7, %v1323_v5 }
 0x6b7   :  { %v1397_v8 = vrot.slane %v1395_v10, 4  ;;  %v1402_v11 = vadd.f32 %v1684_v6, %v1395_v10 }
 0x6b9   :  { %v1403_v9 = vadd.f32 %v1684_v6, %v1397_v8  ;;  %vm1404_vm1 = vcmp.ge.f32.partialorder %v1402_v11, 0.0  ;;  %v1406_v12 = vmul.f32 0.2, %v1402_v11 }
 0x6bb   :  { %v1407_v15 = vmul.f32 0.2, %v1403_v9  ;;  %v1408_v13 = vsel %vm1404_vm1, %v1402_v11, %v1406_v12  ;;  %vm1405_vm2 = vcmp.ge.f32.partialorder %v1403_v9, 0.0 }
 0x6bc   :  { %1659 = vmatpush.msk.msrb.mxu3 %vm1224_vm14, %v1408_v13  ;;  %1456 = vst [vmem:[#allocation1] ss:$2 sm:$0xff] %v1408_v13 }
 0x6bd   :  { %1660 = vmatmul.msk.f32.vlgmr.msrb.gmra.mxu3 %vm1221_vm0, %v2035_v50  ;;  %v1409_v14 = vsel %vm1405_vm2, %v1403_v9, %v1407_v15 }
 0x6be   :  { %1665 = vmatpush.msk.msra.mxu3 %vm1224_vm14, %v1408_v13  ;;  %1661 = vmatpush.msk.msra.mxu0 %vm1224_vm14, %v1409_v14  ;;  %1458 = vst [vmem:[#allocation1 + $0x1] ss:$2 sm:$0xff] %v1409_v14 }
 0x6bf   :  { %1662 = vmatmul.msk.f32.vlgmr.msra.gmra.mxu0 %vm1221_vm0, %v2035_v50  ;;  %v921_v50 = vld [vmem:[#allocation12 + $0x48] sm:$0xff] }
 0x6c0   :  { %1667 = vmatpush.msk.msrb.mxu0 %vm1224_vm14, %v1409_v14  ;;  %1572 = vmatpush.msra.mxu1 %v921_v50 }
 0x6c2   :  { %1573 = vmatpush.msra.mxu1 %v920_v24 }
 0x6c5   :  { %1666 = vmatmul.msk.f32.vlgmr.msra.gmra.mxu3 %vm1221_vm0, %v2055_v0  ;;  %v1459_v16 = vld.sshfl [vmem:[#allocation1] sm:$0xff pattern:$0x75316420] }
 0x6c6   :  { %1663 = vmatmul.msk.f32.vlgmr.msrb.gmra.mxu1 %vm559_vm7, %v1459_v16 }
 0x6c7   :  { %1668 = vmatmul.msk.f32.vlgmr.msrb.gmra.mxu0 %vm1221_vm0, %v2055_v0 }
 0x73c   :  { %v1453_v25 = vpop.f32.mrf.mxu0 }
 0x73d   :  { %1486 = vst [vmem:[#allocation1 + $0x1] ss:$2 sm:$0xff] %v1453_v25 }
 0x740   :  { %v1430_v26 = vpop.f32.mrf.mxu3 }
 0x741   :  { %1484 = vst [vmem:[#allocation1] ss:$2 sm:$0xff] %v1430_v26 }
 0x743   :  { %v1479_v17 = vpop.f32.mrf.mxu1 }
 0x744   :  { %v1547_v0 = vpop.f32.mrf.mxu0 }
 0x748   :  { %v1527_v27 = vpop.f32.mrf.mxu3  ;;  %v1487_v28 = vld.sshfl [vmem:[#allocation1] sm:$0xff pattern:$0x75316420] }
 0x749   :  { %1664 = vmatmul.msk.f32.vlgmr.msrb.gmra.mxu2 %vm559_vm7, %v1487_v28  ;;  %1552 = vst [vmem:[#allocation1] ss:$2 sm:$0xff] %v1527_v27 }
 0x74a   :  { %1554 = vst [vmem:[#allocation1 + $0x1] ss:$2 sm:$0xff] %v1547_v0 }
 0x751   :  { %v1555_v29 = vld.sshfl [vmem:[#allocation1] sm:$0xff pattern:$0x75316420] }
 0x752   :  { %1669 = vmatmul.msk.f32.vlgmr.msra.gmra.mxu1 %vm559_vm7, %v1555_v29 }
 0x7cc   :  { %v1507_v30 = vpop.f32.mrf.mxu2 }
 0x7cd   :  { %v1508_v31 = vadd.f32 %v1507_v30, %v1479_v17 }
 0x7cf   :  { %v1575_v33 = vpop.f32.mrf.mxu1 }
 0x7d0   :  { %v1578_v34 = vadd.f32 %v1575_v33, %v1508_v31 }
 0x7d2   :  { %v1580_v35 = vrot.slane %v1578_v34, 4  ;;  %v1585_v36 = vadd.f32 %v1685_v32, %v1578_v34 }
 0x7d4   :  { %v1586_v37 = vadd.f32 %v1685_v32, %v1580_v35  ;;  %v1587_v38 = vadd.f32 %v1585_v36, %v2111_v44 }
 0x7d6   :  { %v1588_v39 = vadd.f32 %v1586_v37, %v2118_v45  ;;  %1590 = vst.msk [vmem:[%s2178_s13] sm:$0xf] %vm1589_vm3, %v1587_v38 }
 0x7d8   :  { %1591 = vst.msk [vmem:[%s2178_s13 + $0x4] sm:$0xf] %vm1589_vm3, %v1588_v39 }
 0x7d9   :  { %1596 = vsyncpa [#allocation3], 1 }
 0x7da   :  { %1597 = vsyncpa [#allocation5], 1 }
 0x7db   :  { %1598 = vsyncpa [#allocation8], 1 }
 0x7dc   :  { %1599 = vsyncpa [#allocation11], 1 }

// kernel: vae_conv_forward.5
= control target key start
LH: loop header
LB: loop body
LE: loop exit
PB: predicated region body
PF: predicated region fallthrough
CT: control target
= control target key end

     0   :  { %20 = vsyncpa [#allocation3], 0  ;;  %s2556_s0 = inlined_call_operand.vmem [shape: f32[2,4,32], index: 0, kind: input, shape index: {}]   ;;  %s2557_s1 = inlined_call_operand.vmem [shape: f32[3,32,32], index: 1, kind: input, shape index: {}]   ;;  %s2558_s2 = inlined_call_operand.vmem [shape: f32[1,32], index: 2, kind: input, shape index: {}]   ;;  %s2559_s3 = inlined_call_operand.hbm [shape: f32[3,32,32], index: 3, kind: input, shape index: {}]   ;;  %s2560_s4 = inlined_call_operand.vmem [shape: f32[1,32], index: 4, kind: input, shape index: {}]   ;;  %s2561_s5 = inlined_call_operand.hbm [shape: f32[3,32,32], index: 5, kind: input, shape index: {}]   ;;  %s2562_s6 = inlined_call_operand.vmem [shape: f32[1,32], index: 6, kind: input, shape index: {}]   ;;  %s2563_s7 = inlined_call_operand.hbm [shape: f32[3,32,32], index: 7, kind: input, shape index: {}]   ;;  %s2564_s8 = inlined_call_operand.vmem [shape: f32[1,32], index: 8, kind: input, shape index: {}]   ;;  %s2565_s9 = inlined_call_operand.hbm [shape: f32[3,32,32], index: 9, kind: input, shape index: {}]   ;;  %s2566_s10 = inlined_call_operand.hbm [shape: f32[1,32], index: 10, kind: input, shape index: {}]   ;;  %s2567_s11 = inlined_call_operand.vmem [shape: f32[3,32,16], index: 11, kind: input, shape index: {}]   ;;  %s2568_s12 = inlined_call_operand.hbm [shape: f32[1,16], index: 12, kind: input, shape index: {}]   ;;  %s2569_s13 = inlined_call_operand.vmem [shape: f32[3,16,16], index: 13, kind: input, shape index: {}]   ;;  %s2570_s14 = inlined_call_operand.hbm [shape: f32[1,16], index: 14, kind: input, shape index: {}]   ;;  %s2571_s15 = inlined_call_operand.hbm [shape: f32[2,16,16], index: 15, kind: output, shape index: {}]  }
   0x1   :  { %21 = vsyncpa [#allocation6], 0 }
   0x2   :  { %22 = vsyncpa [#allocation9], 0 }
   0x3   :  { %23 = vsyncpa [#allocation12], 0 }
   0x4   :  { %24 = vsyncpa [#allocation4], 0  ;;  %s50_s20 = sshll.u32 %s2561_s5, 4  ;;  %s2109_s21 = smov [#allocation5]   ;;  %s51_s20 = int_to_ptr.hbm [resolvable:$true] %s50_s20 }
   0x5   :  { %s52_s22 = sshll.u32 %s2109_s21, 4  ;;  %s80_s25 = sshll.u32 %s2565_s9, 4  ;;  %s53_s22 = int_to_ptr.vmem [resolvable:$true] %s52_s22  ;;  %s81_s25 = int_to_ptr.hbm [resolvable:$true] %s80_s25 }
   0x6   :  { %s2110_s26 = smov 128   ;;  %s2111_s27 = smov 8  }
   0x7   :  { %58 = dma.hbm_to_vmem [thread:$0]  %s51_s20, 1536, %s53_s22, [#allocation6], %s2110_s26, %s2110_s26, %s2111_s27  }
   0x8   :  { %s2112_s28 = smov [#allocation8]   ;;  %s107_s5 = sshll.u32 %s2568_s12, 4  ;;  %s108_s5 = int_to_ptr.hbm [resolvable:$true] %s107_s5 }
   0x9   :  { %s82_s29 = sshll.u32 %s2112_s28, 4  ;;  %s35_s18 = sshll.u32 %s2559_s3, 4  ;;  %s83_s29 = int_to_ptr.vmem [resolvable:$true] %s82_s29  ;;  %s36_s18 = int_to_ptr.hbm [resolvable:$true] %s35_s18 }
   0xa   :  { %88 = dma.hbm_to_vmem [thread:$0]  %s81_s25, 1536, %s83_s29, [#allocation9], %s2110_s26, %s2110_s26, %s2111_s27  }
   0xb   :  { %s2113_s19 = smov [#allocation11]   ;;  %s2114_s20 = smov [#allocation2]  }
   0xc   :  { %s109_s21 = sshll.u32 %s2113_s19, 4  ;;  %s37_s22 = sshll.u32 %s2114_s20, 4  ;;  %s110_s21 = int_to_ptr.vmem [resolvable:$true] %s109_s21  ;;  %s38_s22 = int_to_ptr.vmem [resolvable:$true] %s37_s22 }
   0xd   :  { %112 = dma.hbm_to_vmem [thread:$0]  %s108_s5, 16, %s110_s21, [#allocation12]  }
   0xe   :  { %s65_s12 = sshll.u32 %s2563_s7, 4  ;;  %s94_s3 = sshll.u32 %s2566_s10, 4  ;;  %s66_s12 = int_to_ptr.hbm [resolvable:$true] %s65_s12  ;;  %s95_s3 = int_to_ptr.hbm [resolvable:$true] %s94_s3 }
   0xf   :  { %43 = dma.hbm_to_vmem [thread:$0]  %s36_s18, 1536, %s38_s22, [#allocation3], %s2110_s26, %s2110_s26, %s2111_s27  }
  0x10   :  { %s2115_s29 = smov [#allocation7]   ;;  %s2116_s16 = smov [#allocation10]  }
  0x11   :  { %s67_s30 = sshll.u32 %s2115_s29, 4  ;;  %s96_s7 = sshll.u32 %s2116_s16, 4  ;;  %s68_s30 = int_to_ptr.vmem [resolvable:$true] %s67_s30  ;;  %s97_s7 = int_to_ptr.vmem [resolvable:$true] %s96_s7 }
  0x12   :  { %73 = dma.hbm_to_vmem [thread:$0]  %s66_s12, 1536, %s68_s30, [#allocation6], %s2110_s26, %s2110_s26, %s2111_s27  }
  0x13   :  { %s120_s17 = sshll.u32 %s2570_s14, 4  ;;  %s2117_s18 = smov [#allocation13]   ;;  %s121_s17 = int_to_ptr.hbm [resolvable:$true] %s120_s17 }
  0x14   :  { %99 = dma.hbm_to_vmem [thread:$0]  %s95_s3, 16, %s97_s7, [#allocation9]  }
  0x15   :  { %s122_s19 = sshll.u32 %s2117_s18, 4  ;;  %s123_s19 = int_to_ptr.vmem [resolvable:$true] %s122_s19 }
  0x16   :  { %125 = dma.hbm_to_vmem [thread:$0]  %s121_s17, 16, %s123_s19, [#allocation12]  }
  0x17   :  { %2099 = dma.done.wait [#allocation3], 1536  }
  0x18   :  { %2100 = vsyncadd [#allocation3], 4294965760 }
  0x19   :  { %2101 = dma.done.wait [#allocation6], 3072  }
  0x1a   :  { %2102 = vsyncadd [#allocation6], 4294964224 }
  0x1b   :  { %2103 = dma.done.wait [#allocation9], 1552  }
  0x1c   :  { %2104 = vsyncadd [#allocation9], 4294965744 }
  0x1d   :  { %2105 = dma.done.wait [#allocation12], 32  }
  0x1e   :  { %2106 = vsyncadd [#allocation12], 4294967264  ;;  %v182_v0 = vlaneseq  ;;  %vm193_vm0 = vcmask 1043456   ;;  %vm189_vm2 = vcmask 31744   ;;  %v2242_v4 = vld [vmem:[%s2556_s0] sm:$0xf] }
  0x1f   :  { %v2247_v5 = vld [vmem:[%s2556_s0 + $0x4] sm:$0xf]  ;;  %v2118_v6 = vmov 0.0   ;;  %v163_v8 = vld [vmem:[%s2557_s1 + $0x38] sm:$0xff]  ;;  %1787 = vmatpush.msk.msra.mxu0 %vm193_vm0, %v2242_v4  ;;  %240 = vst [vmem:[#allocation1] ss:$2 sm:$0xff] %v2242_v4 }
  0x20   :  { %v2233_v1 = vshrl.u32 %v182_v0, 7  ;;  %v2235_v2 = vand.u32 127, %v182_v0  ;;  %1789 = vmatpush.msk.msra.mxu1 %vm193_vm0, %v2247_v5  ;;  %v162_v9 = vld [vmem:[%s2557_s1 + $0x30] sm:$0xff]  ;;  %242 = vst [vmem:[#allocation1 + $0x1] ss:$2 sm:$0xff] %v2247_v5  ;;  %259 = vmatpush.msra.mxu2 %v163_v8  ;;  %v161_v10 = vld [vmem:[%s2557_s1 + $0x28] sm:$0xff] }
  0x21   :  { %v160_v11 = vld [vmem:[%s2557_s1 + $0x20] sm:$0xff]  ;;  %v159_v12 = vld [vmem:[%s2557_s1 + $0x18] sm:$0xff]  ;;  %vm244_vm3 = vcmask 261120   ;;  %v158_v14 = vld [vmem:[%s2557_s1 + $0x10] sm:$0xff]  ;;  %vm1019_vm12 = vcmask 64512   ;;  %s1771_s14 = sshll.u32 %s2571_s15, 4  ;;  %s1772_s14 = int_to_ptr.hbm [resolvable:$true] %s1771_s14 }
  0x22   :  { %v186_v3 = vadd.s32 4294967295, %v2233_v1  ;;  %1795 = vmatpush.msk.msrb.mxu1 %vm193_vm0, %v2247_v5  ;;  %260 = vmatpush.msra.mxu2 %v162_v9  ;;  %v157_v15 = vld [vmem:[%s2557_s1 + $0x8] sm:$0xff]  ;;  %v156_v16 = vld [vmem:[%s2557_s1] sm:$0xff]  ;;  %v295_v17 = vadd.s32 1, %v2233_v1  ;;  %v167_v23 = vld [vmem:[%s2557_s1 + $0x58] sm:$0xff] }
  0x23   :  { %287 = vmatpush.msrb.mxu0 %v159_v12  ;;  %v166_v24 = vld [vmem:[%s2557_s1 + $0x50] sm:$0xff]  ;;  %v165_v25 = vld [vmem:[%s2557_s1 + $0x48] sm:$0xff]  ;;  %v164_v26 = vld [vmem:[%s2557_s1 + $0x40] sm:$0xff] }
  0x24   :  { %vm187_vm1 = vcmp.eq.s32.totalorder %v2235_v2, %v186_v3  ;;  %261 = vmatpush.msra.mxu2 %v161_v10  ;;  %vm296_vm4 = vcmp.eq.s32.totalorder %v2235_v2, %v295_v17  ;;  %v1900_v32 = vld [vmem:[%s2558_s2] ss:$0 sm:$0xff]  ;;  %v175_v43 = vld [vmem:[#allocation2 + $0x30] sm:$0xff]  ;;  %v174_v44 = vld [vmem:[#allocation2 + $0x28] sm:$0xff] }
  0x25   :  { %v2250_v7 = vsel %vm187_vm1, 1.0, %v2118_v6  ;;  %288 = vmatpush.msrb.mxu0 %v158_v14  ;;  %v2294_v18 = vsel %vm296_vm4, 1.0, %v2118_v6  ;;  %v176_v41 = vld [vmem:[#allocation2 + $0x38] sm:$0xff]  ;;  %v173_v45 = vld [vmem:[#allocation2 + $0x20] sm:$0xff]  ;;  %v171_v48 = vld [vmem:[#allocation2 + $0x10] sm:$0xff] }
  0x26   :  { %1788 = vmatmul.msk.f32.vlgmr.msra.gmra.mxu0 %vm189_vm2, %v2250_v7  ;;  %1790 = vmatmul.msk.f32.vlgmr.msra.gmra.mxu1 %vm189_vm2, %v2250_v7  ;;  %v172_v47 = vld [vmem:[#allocation2 + $0x18] sm:$0xff]  ;;  %v170_v49 = vld [vmem:[#allocation2 + $0x8] sm:$0xff]  ;;  %v169_v50 = vld [vmem:[#allocation2] sm:$0xff] }
  0x27   :  { %v243_v13 = vld.sshfl [vmem:[#allocation1] sm:$0xff pattern:$0x75316420]  ;;  %262 = vmatpush.msra.mxu2 %v160_v11  ;;  %289 = vmatpush.msrb.mxu0 %v157_v15  ;;  %v179_v52 = vld [vmem:[#allocation2 + $0x50] sm:$0xff]  ;;  %v178_v53 = vld [vmem:[#allocation2 + $0x48] sm:$0xff] }
  0x28   :  { %1791 = vmatmul.msk.f32.vlgmr.msra.gmra.mxu2 %vm244_vm3, %v243_v13  ;;  %v180_v51 = vld [vmem:[#allocation2 + $0x58] sm:$0xff]  ;;  %v177_v54 = vld [vmem:[#allocation2 + $0x40] sm:$0xff]  ;;  %v569_v62 = vld [vmem:[#allocation5 + $0x30] sm:$0xff] }
  0x29   :  { %290 = vmatpush.msrb.mxu0 %v156_v16  ;;  %361 = vmatpush.msrb.mxu2 %v167_v23  ;;  %v570_v61 = vld [vmem:[#allocation5 + $0x38] sm:$0xff]  ;;  %v568_v63 = vld [vmem:[#allocation5 + $0x28] sm:$0xff]  ;;  %v567_v0 = vld [vmem:[#allocation5 + $0x20] sm:$0xff] }
  0x2a   :  { %v1901_v10 = vld [vmem:[%s2560_s4] ss:$0 sm:$0xff]  ;;  %v573_v23 = vld [vmem:[#allocation5 + $0x50] sm:$0xff] }
  0x2b   :  { %1793 = vmatpush.msk.msra.mxu0 %vm193_vm0, %v2242_v4  ;;  %362 = vmatpush.msrb.mxu2 %v166_v24  ;;  %v572_v24 = vld [vmem:[#allocation5 + $0x48] sm:$0xff] }
  0x2d   :  { %363 = vmatpush.msrb.mxu2 %v165_v25  ;;  %v571_v25 = vld [vmem:[#allocation5 + $0x40] sm:$0xff] }
  0x2e   :  { %1796 = vmatmul.msk.f32.vlgmr.msrb.gmra.mxu1 %vm189_vm2, %v2294_v18 }
  0x2f   :  { %364 = vmatpush.msrb.mxu2 %v164_v26 }
  0x31   :  { %476 = vmatpush.msra.mxu2 %v172_v47 }
  0x33   :  { %477 = vmatpush.msra.mxu2 %v171_v48 }
  0x35   :  { %478 = vmatpush.msra.mxu2 %v170_v49 }
  0x37   :  { %479 = vmatpush.msra.mxu2 %v169_v50  ;;  %v579_v50 = vld [vmem:[#allocation7 + $0x18] sm:$0xff] }
  0xa3   :  { %v214_v19 = vpop.f32.mrf.mxu0  ;;  %v237_v20 = vpop.f32.mrf.mxu1 }
  0xa4   :  { %269 = vst [vmem:[#allocation1] ss:$2 sm:$0xff] %v214_v19  ;;  %v565_v19 = vld [vmem:[#allocation5 + $0x10] sm:$0xff] }
  0xa5   :  { %271 = vst [vmem:[#allocation1 + $0x1] ss:$2 sm:$0xff] %v237_v20  ;;  %v564_v20 = vld [vmem:[#allocation5 + $0x8] sm:$0xff] }
  0xab   :  { %v338_v22 = vpop.f32.mrf.mxu1  ;;  %v264_v30 = vpop.f32.mrf.mxu2 }
  0xac   :  { %v272_v21 = vld.sshfl [vmem:[#allocation1] sm:$0xff pattern:$0x75316420] }
  0xad   :  { %1792 = vmatmul.msk.f32.vlgmr.msrb.gmra.mxu0 %vm244_vm3, %v272_v21  ;;  %345 = vst [vmem:[#allocation1 + $0x1] ss:$2 sm:$0xff] %v338_v22  ;;  %v563_v21 = vld [vmem:[#allocation5] sm:$0xff]  ;;  %v574_v22 = vld [vmem:[#allocation5 + $0x58] sm:$0xff] }
  0xb5   :  { %1794 = vmatmul.msk.f32.vlgmr.msra.gmra.mxu0 %vm189_vm2, %v2294_v18 }
 0x12a   :  { %v292_v27 = vpop.f32.mrf.mxu0 }
 0x12b   :  { %v293_v31 = vadd.f32 %v292_v27, %v264_v30 }
 0x132   :  { %v318_v28 = vpop.f32.mrf.mxu0 }
 0x133   :  { %343 = vst [vmem:[#allocation1] ss:$2 sm:$0xff] %v318_v28 }
 0x13a   :  { %v346_v29 = vld.sshfl [vmem:[#allocation1] sm:$0xff pattern:$0x75316420] }
 0x13b   :  { %1797 = vmatmul.msk.f32.vlgmr.msrb.gmra.mxu2 %vm244_vm3, %v346_v29 }
 0x1be   :  { %v366_v33 = vpop.f32.mrf.mxu2 }
 0x1bf   :  { %v369_v34 = vadd.f32 %v366_v33, %v293_v31  ;;  %v582_v33 = vld [vmem:[#allocation7 + $0x30] sm:$0xff] }
 0x1c1   :  { %v371_v35 = vrot.slane %v369_v34, 4  ;;  %v376_v36 = vadd.f32 %v1900_v32, %v369_v34  ;;  %v581_v34 = vld [vmem:[#allocation7 + $0x28] sm:$0xff] }
 0x1c3   :  { %v377_v37 = vadd.f32 %v1900_v32, %v371_v35  ;;  %vm378_vm5 = vcmp.ge.f32.partialorder %v376_v36, 0.0  ;;  %v380_v38 = vmul.f32 0.2, %v376_v36  ;;  %v583_v32 = vld [vmem:[#allocation7 + $0x38] sm:$0xff]  ;;  %v580_v35 = vld [vmem:[#allocation7 + $0x20] sm:$0xff] }
 0x1c5   :  { %v381_v39 = vmul.f32 0.2, %v377_v37  ;;  %v382_v40 = vsel %vm378_vm5, %v376_v36, %v380_v38  ;;  %vm379_vm6 = vcmp.ge.f32.partialorder %v377_v37, 0.0 }
 0x1c6   :  { %1798 = vmatpush.msk.msra.mxu1 %vm193_vm0, %v382_v40  ;;  %430 = vst [vmem:[#allocation1] ss:$2 sm:$0xff] %v382_v40  ;;  %1804 = vmatpush.msk.msra.mxu3 %vm193_vm0, %v382_v40 }
 0x1c7   :  { %1799 = vmatmul.msk.f32.vlgmr.msra.gmra.mxu1 %vm189_vm2, %v2250_v7  ;;  %v383_v42 = vsel %vm379_vm6, %v377_v37, %v381_v39  ;;  %1805 = vmatmul.msk.f32.vlgmr.msra.gmra.mxu3 %vm189_vm2, %v2294_v18  ;;  %v1902_v39 = vld [vmem:[%s2562_s6] ss:$0 sm:$0xff] }
 0x1c8   :  { %1800 = vmatpush.msk.msrb.mxu0 %vm193_vm0, %v383_v42  ;;  %432 = vst [vmem:[#allocation1 + $0x1] ss:$2 sm:$0xff] %v383_v42  ;;  %448 = vmatpush.msrb.mxu1 %v176_v41 }
 0x1c9   :  { %1801 = vmatmul.msk.f32.vlgmr.msrb.gmra.mxu0 %vm189_vm2, %v2250_v7 }
 0x1ca   :  { %1806 = vmatpush.msk.msra.mxu0 %vm193_vm0, %v383_v42  ;;  %449 = vmatpush.msrb.mxu1 %v175_v43 }
 0x1cc   :  { %450 = vmatpush.msrb.mxu1 %v174_v44  ;;  %653 = vmatpush.msrb.mxu0 %v570_v61 }
 0x1ce   :  { %451 = vmatpush.msrb.mxu1 %v173_v45  ;;  %654 = vmatpush.msrb.mxu0 %v569_v62 }
 0x1cf   :  { %v433_v46 = vld.sshfl [vmem:[#allocation1] sm:$0xff pattern:$0x75316420] }
 0x1d0   :  { %1802 = vmatmul.msk.f32.vlgmr.msrb.gmra.mxu1 %vm244_vm3, %v433_v46  ;;  %655 = vmatpush.msrb.mxu0 %v568_v63 }
 0x1d1   :  { %1807 = vmatmul.msk.f32.vlgmr.msra.gmra.mxu0 %vm189_vm2, %v2294_v18  ;;  %544 = vmatpush.msra.mxu1 %v180_v51  ;;  %v578_v51 = vld [vmem:[#allocation7 + $0x10] sm:$0xff] }
 0x1d2   :  { %656 = vmatpush.msrb.mxu0 %v567_v0  ;;  %v2381_v0 = vmul.u32 2, %v2235_v2 }
 0x1d3   :  { %545 = vmatpush.msra.mxu1 %v179_v52  ;;  %v577_v52 = vld [vmem:[#allocation7 + $0x8] sm:$0xff] }
 0x1d4   :  { %749 = vmatpush.msra.mxu0 %v574_v22  ;;  %vm965_vm9 = vcmp.eq.s32.totalorder %v2233_v1, %v2381_v0  ;;  %v957_v22 = vld [vmem:[#allocation8 + $0x30] sm:$0xff] }
 0x1d5   :  { %546 = vmatpush.msra.mxu1 %v178_v53  ;;  %v576_v53 = vld [vmem:[#allocation7] sm:$0xff] }
 0x1d6   :  { %750 = vmatpush.msra.mxu0 %v573_v23  ;;  %v956_v23 = vld [vmem:[#allocation8 + $0x28] sm:$0xff] }
 0x1d7   :  { %547 = vmatpush.msra.mxu1 %v177_v54  ;;  %v587_v54 = vld [vmem:[#allocation7 + $0x58] sm:$0xff] }
 0x1d8   :  { %751 = vmatpush.msra.mxu0 %v572_v24 }
 0x1da   :  { %752 = vmatpush.msra.mxu0 %v571_v25  ;;  %v954_v25 = vld [vmem:[#allocation8 + $0x18] sm:$0xff] }
 0x244   :  { %v404_v55 = vpop.f32.mrf.mxu1 }
 0x245   :  { %458 = vst [vmem:[#allocation1] ss:$2 sm:$0xff] %v404_v55  ;;  %v586_v55 = vld [vmem:[#allocation7 + $0x50] sm:$0xff] }
 0x246   :  { %v427_v56 = vpop.f32.mrf.mxu0 }
 0x247   :  { %460 = vst [vmem:[#allocation1 + $0x1] ss:$2 sm:$0xff] %v427_v56  ;;  %v585_v56 = vld [vmem:[#allocation7 + $0x48] sm:$0xff] }
 0x24a   :  { %v501_v57 = vpop.f32.mrf.mxu3 }
 0x24d   :  { %v453_v3 = vpop.f32.mrf.mxu1 }
 0x24e   :  { %v461_v58 = vld.sshfl [vmem:[#allocation1] sm:$0xff pattern:$0x75316420]  ;;  %v521_v59 = vpop.f32.mrf.mxu0 }
 0x24f   :  { %526 = vst [vmem:[#allocation1] ss:$2 sm:$0xff] %v501_v57  ;;  %1803 = vmatmul.msk.f32.vlgmr.msra.gmra.mxu2 %vm244_vm3, %v461_v58  ;;  %v584_v57 = vld [vmem:[#allocation7 + $0x40] sm:$0xff] }
 0x250   :  { %528 = vst [vmem:[#allocation1 + $0x1] ss:$2 sm:$0xff] %v521_v59 }
 0x257   :  { %v529_v60 = vld.sshfl [vmem:[#allocation1] sm:$0xff pattern:$0x75316420] }
 0x258   :  { %1808 = vmatmul.msk.f32.vlgmr.msra.gmra.mxu1 %vm244_vm3, %v529_v60 }
 0x2d2   :  { %v481_v8 = vpop.f32.mrf.mxu2 }
 0x2d3   :  { %v482_v9 = vadd.f32 %v481_v8, %v453_v3  ;;  %v2384_v8 = vadd.s32 1, %v2381_v0 }
 0x2d5   :  { %v549_v11 = vpop.f32.mrf.mxu1  ;;  %vm967_vm10 = vcmp.eq.s32.totalorder %v2233_v1, %v2384_v8 }
 0x2d6   :  { %v552_v12 = vadd.f32 %v549_v11, %v482_v9  ;;  %v1903_v11 = vld [vmem:[%s2564_s8] ss:$0 sm:$0xff]  ;;  %vm968_vm11 = vmor %vm965_vm9, %vm967_vm10 }
 0x2d8   :  { %v554_v13 = vrot.slane %v552_v12, 4  ;;  %v559_v14 = vadd.f32 %v1901_v10, %v552_v12 }
 0x2da   :  { %v560_v15 = vadd.f32 %v1901_v10, %v554_v13  ;;  %v2336_v16 = vadd.f32 %v559_v14, %v2242_v4 }
 0x2dc   :  { %v2339_v17 = vadd.f32 %v560_v15, %v2247_v5  ;;  %635 = vst [vmem:[#allocation1] ss:$2 sm:$0xff] %v2336_v16  ;;  %1809 = vmatpush.msk.msrb.mxu2 %vm193_vm0, %v2336_v16  ;;  %v566_v5 = vld [vmem:[#allocation5 + $0x18] sm:$0xff] }
 0x2dd   :  { %1810 = vmatmul.msk.f32.vlgmr.msrb.gmra.mxu2 %vm189_vm2, %v2250_v7  ;;  %681 = vmatpush.msrb.mxu1 %v566_v5 }
 0x2de   :  { %1815 = vmatpush.msk.msra.mxu2 %vm193_vm0, %v2336_v16  ;;  %637 = vst [vmem:[#allocation1 + $0x1] ss:$2 sm:$0xff] %v2339_v17  ;;  %1811 = vmatpush.msk.msrb.mxu3 %vm193_vm0, %v2339_v17 }
 0x2df   :  { %1812 = vmatmul.msk.f32.vlgmr.msrb.gmra.mxu3 %vm189_vm2, %v2250_v7  ;;  %682 = vmatpush.msrb.mxu1 %v565_v19  ;;  %v2395_v19 = vsel %vm968_vm11, 1.0, %v2118_v6 }
 0x2e0   :  { %1817 = vmatpush.msk.msra.mxu3 %vm193_vm0, %v2339_v17 }
 0x2e1   :  { %683 = vmatpush.msrb.mxu1 %v564_v20  ;;  %v958_v20 = vld [vmem:[#allocation8 + $0x38] sm:$0xff] }
 0x2e2   :  { %836 = vmatpush.msrb.mxu3 %v583_v32  ;;  %v959_v32 = vld [vmem:[#allocation8 + $0x40] sm:$0xff] }
 0x2e3   :  { %684 = vmatpush.msrb.mxu1 %v563_v21 }
 0x2e4   :  { %837 = vmatpush.msrb.mxu3 %v582_v33 }
 0x2e5   :  { %v638_v4 = vld.sshfl [vmem:[#allocation1] sm:$0xff pattern:$0x75316420]  ;;  %1816 = vmatmul.msk.f32.vlgmr.msra.gmra.mxu2 %vm189_vm2, %v2294_v18 }
 0x2e6   :  { %1813 = vmatmul.msk.f32.vlgmr.msrb.gmra.mxu0 %vm244_vm3, %v638_v4  ;;  %838 = vmatpush.msrb.mxu3 %v581_v34 }
 0x2e7   :  { %1818 = vmatmul.msk.f32.vlgmr.msra.gmra.mxu3 %vm189_vm2, %v2294_v18  ;;  %864 = vmatpush.msrb.mxu0 %v579_v50  ;;  %v1211_v50 = vld [vmem:[%s2567_s11 + $0x38] sm:$0xff] }
 0x2e8   :  { %839 = vmatpush.msrb.mxu3 %v580_v35 }
 0x2e9   :  { %865 = vmatpush.msrb.mxu0 %v578_v51 }
 0x2ea   :  { %932 = vmatpush.msra.mxu3 %v587_v54  ;;  %v1209_v54 = vld [vmem:[%s2567_s11 + $0x28] sm:$0xff] }
 0x2eb   :  { %866 = vmatpush.msrb.mxu0 %v577_v52 }
 0x2ec   :  { %933 = vmatpush.msra.mxu3 %v586_v55 }
 0x2ed   :  { %867 = vmatpush.msrb.mxu0 %v576_v53 }
 0x2ee   :  { %934 = vmatpush.msra.mxu3 %v585_v56 }
 0x2f0   :  { %935 = vmatpush.msra.mxu3 %v584_v57 }
 0x360   :  { %v609_v26 = vpop.f32.mrf.mxu2 }
 0x361   :  { %663 = vst [vmem:[#allocation1] ss:$2 sm:$0xff] %v609_v26  ;;  %v953_v26 = vld [vmem:[#allocation8 + $0x10] sm:$0xff] }
 0x362   :  { %v632_v27 = vpop.f32.mrf.mxu3 }
 0x363   :  { %665 = vst [vmem:[#allocation1 + $0x1] ss:$2 sm:$0xff] %v632_v27  ;;  %v658_v36 = vpop.f32.mrf.mxu0  ;;  %v952_v27 = vld [vmem:[#allocation8 + $0x8] sm:$0xff] }
 0x368   :  { %v706_v28 = vpop.f32.mrf.mxu2 }
 0x36a   :  { %v726_v29 = vpop.f32.mrf.mxu3  ;;  %v666_v30 = vld.sshfl [vmem:[#allocation1] sm:$0xff pattern:$0x75316420] }
 0x36b   :  { %1814 = vmatmul.msk.f32.vlgmr.msrb.gmra.mxu1 %vm244_vm3, %v666_v30  ;;  %731 = vst [vmem:[#allocation1] ss:$2 sm:$0xff] %v706_v28  ;;  %v951_v28 = vld [vmem:[#allocation8] sm:$0xff]  ;;  %v961_v30 = vld [vmem:[#allocation8 + $0x50] sm:$0xff] }
 0x36c   :  { %733 = vst [vmem:[#allocation1 + $0x1] ss:$2 sm:$0xff] %v726_v29  ;;  %v962_v29 = vld [vmem:[#allocation8 + $0x58] sm:$0xff] }
 0x373   :  { %v734_v31 = vld.sshfl [vmem:[#allocation1] sm:$0xff pattern:$0x75316420] }
 0x374   :  { %1819 = vmatmul.msk.f32.vlgmr.msra.gmra.mxu0 %vm244_vm3, %v734_v31  ;;  %v960_v31 = vld [vmem:[#allocation8 + $0x48] sm:$0xff] }
 0x3e8   :  { %v686_v37 = vpop.f32.mrf.mxu1 }
 0x3e9   :  { %v687_v38 = vadd.f32 %v686_v37, %v658_v36 }
 0x3f1   :  { %v754_v40 = vpop.f32.mrf.mxu0 }
 0x3f2   :  { %v757_v41 = vadd.f32 %v754_v40, %v687_v38  ;;  %v1904_v40 = vld [vmem:[#allocation10] ss:$0 sm:$0xff] }
 0x3f4   :  { %v759_v42 = vrot.slane %v757_v41, 4  ;;  %v764_v43 = vadd.f32 %v1902_v39, %v757_v41 }
 0x3f6   :  { %v765_v44 = vadd.f32 %v1902_v39, %v759_v42  ;;  %vm766_vm7 = vcmp.ge.f32.partialorder %v764_v43, 0.0  ;;  %v768_v45 = vmul.f32 0.2, %v764_v43 }
 0x3f8   :  { %v769_v46 = vmul.f32 0.2, %v765_v44  ;;  %v770_v47 = vsel %vm766_vm7, %v764_v43, %v768_v45  ;;  %vm767_vm8 = vcmp.ge.f32.partialorder %v765_v44, 0.0  ;;  %v1217_v45 = vadd.s32 8, %v2233_v1  ;;  %v1210_v1 = vld [vmem:[%s2567_s11 + $0x30] sm:$0xff] }
 0x3f9   :  { %1820 = vmatpush.msk.msra.mxu1 %vm193_vm0, %v770_v47  ;;  %818 = vst [vmem:[#allocation1] ss:$2 sm:$0xff] %v770_v47 }
 0x3fa   :  { %v771_v48 = vsel %vm767_vm8, %v765_v44, %v769_v46  ;;  %1821 = vmatmul.msk.f32.vlgmr.msra.gmra.mxu1 %vm189_vm2, %v2250_v7  ;;  %vm1218_vm14 = vcmp.eq.s32.totalorder %v1217_v45, %v2381_v0  ;;  %vm1219_vm15 = vcmp.eq.s32.totalorder %v1217_v45, %v2384_v8  ;;  %v1273_v0 = vadd.s32 4294967295, %v1217_v45 }
 0x3fb   :  { %1826 = vmatpush.msk.msrb.mxu1 %vm193_vm0, %v770_v47  ;;  %1822 = vmatpush.msk.msrb.mxu2 %vm193_vm0, %v771_v48  ;;  %820 = vst [vmem:[#allocation1 + $0x1] ss:$2 sm:$0xff] %v771_v48  ;;  %v1410_v8 = vadd.s32 1, %v1217_v45 }
 0x3fc   :  { %1823 = vmatmul.msk.f32.vlgmr.msrb.gmra.mxu2 %vm189_vm2, %v2250_v7  ;;  %vm1274_vm4 = vcmp.eq.s32.totalorder %v2235_v2, %v1273_v0 }
 0x3fd   :  { %1828 = vmatpush.msk.msra.mxu2 %vm193_vm0, %v771_v48  ;;  %vm1411_vm5 = vcmp.eq.s32.totalorder %v2235_v2, %v1410_v8  ;;  %v1205_v2 = vld [vmem:[%s2567_s11 + $0x8] sm:$0xff] }
 0x402   :  { %v821_v49 = vld.sshfl [vmem:[#allocation1] sm:$0xff pattern:$0x75316420]  ;;  %1827 = vmatmul.msk.f32.vlgmr.msrb.gmra.mxu1 %vm189_vm2, %v2294_v18 }
 0x403   :  { %1824 = vmatmul.msk.f32.vlgmr.msrb.gmra.mxu3 %vm244_vm3, %v821_v49 }
 0x404   :  { %1829 = vmatmul.msk.f32.vlgmr.msra.gmra.mxu2 %vm189_vm2, %v2294_v18 }
 0x477   :  { %v792_v58 = vpop.f32.mrf.mxu1 }
 0x478   :  { %846 = vst [vmem:[#allocation1] ss:$2 sm:$0xff] %v792_v58  ;;  %v1208_v58 = vld [vmem:[%s2567_s11 + $0x20] sm:$0xff] }
 0x47f   :  { %v815_v59 = vpop.f32.mrf.mxu2  ;;  %v889_v60 = vpop.f32.mrf.mxu1 }
 0x480   :  { %848 = vst [vmem:[#allocation1 + $0x1] ss:$2 sm:$0xff] %v815_v59 }
 0x486   :  { %v841_v3 = vpop.f32.mrf.mxu3 }
 0x487   :  { %v909_v61 = vpop.f32.mrf.mxu2  ;;  %v849_v62 = vld.sshfl [vmem:[#allocation1] sm:$0xff pattern:$0x75316420] }
 0x488   :  { %1825 = vmatmul.msk.f32.vlgmr.msrb.gmra.mxu0 %vm244_vm3, %v849_v62  ;;  %914 = vst [vmem:[#allocation1] ss:$2 sm:$0xff] %v889_v60 }
 0x489   :  { %916 = vst [vmem:[#allocation1 + $0x1] ss:$2 sm:$0xff] %v909_v61  ;;  %v1207_v61 = vld [vmem:[%s2567_s11 + $0x18] sm:$0xff] }
 0x490   :  { %v917_v63 = vld.sshfl [vmem:[#allocation1] sm:$0xff pattern:$0x75316420] }
 0x491   :  { %1830 = vmatmul.msk.f32.vlgmr.msra.gmra.mxu3 %vm244_vm3, %v917_v63 }
 0x505   :  { %v869_v9 = vpop.f32.mrf.mxu0 }
 0x506   :  { %v870_v10 = vadd.f32 %v869_v9, %v841_v3  ;;  %v2452_v3 = vsel %vm1274_vm4, 1.0, %v2118_v6  ;;  %v2465_v9 = vsel %vm1411_vm5, 1.0, %v2118_v6 }
 0x514   :  { %v937_v12 = vpop.f32.mrf.mxu3 }
 0x515   :  { %v940_v13 = vadd.f32 %v937_v12, %v870_v10  ;;  %v1206_v10 = vld [vmem:[%s2567_s11 + $0x10] sm:$0xff] }
 0x516   :  { %v1214_v12 = vld [vmem:[%s2567_s11 + $0x50] sm:$0xff] }
 0x517   :  { %v942_v14 = vrot.slane %v940_v13, 4  ;;  %v947_v15 = vadd.f32 %v1903_v11, %v940_v13  ;;  %v1213_v13 = vld [vmem:[%s2567_s11 + $0x48] sm:$0xff] }
 0x519   :  { %v948_v4 = vadd.f32 %v1903_v11, %v942_v14  ;;  %v949_v5 = vadd.f32 %v947_v15, %v2336_v16  ;;  %v955_v16 = vld [vmem:[#allocation8 + $0x20] sm:$0xff]  ;;  %v1215_v11 = vld [vmem:[%s2567_s11 + $0x58] sm:$0xff]  ;;  %v1212_v14 = vld [vmem:[%s2567_s11 + $0x40] sm:$0xff] }
 0x51b   :  { %v950_v21 = vadd.f32 %v948_v4, %v2339_v17  ;;  %1831 = vmatpush.msk.msra.mxu0 %vm193_vm0, %v949_v5 }
 0x51c   :  { %1832 = vmatmul.msk.f32.vlgmr.msra.gmra.mxu0 %vm189_vm2, %v2395_v19 }
 0x51d   :  { %1833 = vmatpush.msk.msra.mxu1 %vm193_vm0, %v950_v21  ;;  %1080 = vmatpush.msrb.mxu0 %v958_v20  ;;  %vm1220_vm0 = vmor %vm1218_vm14, %vm1219_vm15 }
 0x51e   :  { %1834 = vmatmul.msk.f32.vlgmr.msra.gmra.mxu1 %vm189_vm2, %v2395_v19  ;;  %v1221_v56 = vsel %vm1220_vm0, 1.0, %v2118_v6  ;;  %vm1276_vm2 = vcmask 130048   ;;  %v1204_v6 = vld [vmem:[%s2567_s11] sm:$0xff] }
 0x51f   :  { %1081 = vmatpush.msrb.mxu0 %v957_v22  ;;  %1109 = vmatpush.msrb.mxu1 %v954_v25 }
 0x521   :  { %1082 = vmatpush.msrb.mxu0 %v956_v23  ;;  %1110 = vmatpush.msrb.mxu1 %v953_v26 }
 0x523   :  { %1083 = vmatpush.msrb.mxu0 %v955_v16  ;;  %1111 = vmatpush.msrb.mxu1 %v952_v27  ;;  %v1531_v16 = vld [vmem:[%s2569_s13 + $0x18] sm:$0xff]  ;;  %v1905_v27 = vld [vmem:[#allocation11] ss:$0 sm:$0xff] }
 0x525   :  { %1112 = vmatpush.msrb.mxu1 %v951_v28 }
 0x599   :  { %v993_v24 = vpop.f32.mrf.mxu0 }
 0x59a   :  { %1037 = vmatpush.msrb.mxu2 %v993_v24  ;;  %1837 = vmatmul.msk.f32.vlgmr.msrb.gmra.mxu0 %vm244_vm3, %v993_v24 }
 0x59b   :  { %1835 = vmatmul.msk.f32.vlgmr.msrb.gmra.mxu2 %vm1019_vm12, %v2250_v7  ;;  %v1016_v17 = vpop.f32.mrf.mxu1 }
 0x59c   :  { %1137 = vmatpush.msra.mxu2 %v993_v24  ;;  %1057 = vmatpush.msrb.mxu3 %v1016_v17  ;;  %v1530_v24 = vld [vmem:[%s2569_s13 + $0x10] sm:$0xff] }
 0x59d   :  { %1836 = vmatmul.msk.f32.vlgmr.msrb.gmra.mxu3 %vm1019_vm12, %v2250_v7 }
 0x59e   :  { %1157 = vmatpush.msra.mxu3 %v1016_v17  ;;  %1180 = vmatpush.msrb.mxu2 %v962_v29 }
 0x5a0   :  { %1181 = vmatpush.msrb.mxu2 %v961_v30 }
 0x5a2   :  { %1838 = vmatmul.msk.f32.gmra.mxu0 %vm244_vm3, %v1016_v17  ;;  %1182 = vmatpush.msrb.mxu2 %v960_v31 }
 0x5a3   :  { %1841 = vmatmul.msk.f32.vlgmr.msra.gmra.mxu2 %vm1019_vm12, %v2294_v18 }
 0x5a4   :  { %1183 = vmatpush.msrb.mxu2 %v959_v32 }
 0x5a5   :  { %1842 = vmatmul.msk.f32.vlgmr.msra.gmra.mxu3 %vm1019_vm12, %v2294_v18 }
 0x617   :  { %v1085_v38 = vpop.f32.mrf.mxu0 }
 0x61e   :  { %v1039_v33 = vpop.f32.mrf.mxu2 }
 0x61f   :  { %1839 = vmatmul.msk.f32.vlgmr.msrb.gmra.mxu1 %vm244_vm3, %v1039_v33  ;;  %v1088_v47 = vpop.f32.mrf.mxu0 }
 0x620   :  { %v1059_v34 = vpop.f32.mrf.mxu3 }
 0x626   :  { %v1139_v35 = vpop.f32.mrf.mxu2 }
 0x627   :  { %1840 = vmatmul.msk.f32.gmra.mxu1 %vm244_vm3, %v1059_v34  ;;  %1843 = vmatmul.msk.f32.vlgmr.msrb.gmra.mxu2 %vm244_vm3, %v1139_v35 }
 0x628   :  { %v1159_v36 = vpop.f32.mrf.mxu3 }
 0x62f   :  { %1844 = vmatmul.msk.f32.gmra.mxu2 %vm244_vm3, %v1159_v36 }
 0x69c   :  { %v1114_v37 = vpop.f32.mrf.mxu1 }
 0x69d   :  { %v1115_v39 = vadd.f32 %v1114_v37, %v1085_v38 }
 0x6a4   :  { %v1117_v44 = vpop.f32.mrf.mxu1 }
 0x6a5   :  { %v1118_v48 = vadd.f32 %v1117_v44, %v1088_v47 }
 0x6aa   :  { %v1185_v41 = vpop.f32.mrf.mxu2 }
 0x6ab   :  { %v1191_v42 = vadd.f32 %v1185_v41, %v1115_v39 }
 0x6ad   :  { %v1196_v43 = vadd.f32 %v1904_v40, %v1191_v42 }
 0x6af   :  { %v1200_v46 = vmul.f32 0.2, %v1196_v43  ;;  %vm1198_vm13 = vcmp.ge.f32.partialorder %v1196_v43, 0.0 }
 0x6b1   :  { %v1202_v49 = vsel %vm1198_vm13, %v1196_v43, %v1200_v46 }
 0x6b2   :  { %v1188_v51 = vpop.f32.mrf.mxu2  ;;  %1242 = vmatpush.msrb.mxu3 %v1202_v49 }
 0x6b3   :  { %v1192_v52 = vadd.f32 %v1188_v51, %v1118_v48  ;;  %1845 = vmatmul.msk.f32.vlgmr.msrb.gmra.mxu3 %vm1019_vm12, %v2395_v19 }
 0x6b4   :  { %1352 = vmatpush.msra.mxu3 %v1211_v50 }
 0x6b5   :  { %v1197_v53 = vadd.f32 %v1904_v40, %v1192_v52 }
 0x6b6   :  { %1353 = vmatpush.msra.mxu3 %v1210_v1 }
 0x6b7   :  { %v1201_v55 = vmul.f32 0.2, %v1197_v53  ;;  %vm1199_vm1 = vcmp.ge.f32.partialorder %v1197_v53, 0.0 }
 0x6b8   :  { %1354 = vmatpush.msra.mxu3 %v1209_v54 }
 0x6b9   :  { %v1203_v57 = vsel %vm1199_vm1, %v1197_v53, %v1201_v55 }
 0x6ba   :  { %1265 = vmatpush.msra.mxu0 %v1203_v57  ;;  %1355 = vmatpush.msra.mxu3 %v1208_v58  ;;  %v1533_v57 = vld [vmem:[%s2569_s13 + $0x28] sm:$0xff] }
 0x6bb   :  { %1846 = vmatmul.msk.f32.gmra.mxu3 %vm1019_vm12, %v1221_v56  ;;  %1847 = vmatmul.msk.f32.vlgmr.msra.gmra.mxu0 %vm1019_vm12, %v2395_v19 }
 0x6bc   :  { %1393 = vmatpush.msrb.mxu0 %v1207_v61 }
 0x6be   :  { %1394 = vmatpush.msrb.mxu0 %v1206_v10 }
 0x6c0   :  { %1395 = vmatpush.msrb.mxu0 %v1205_v2  ;;  %v1906_v2 = vld [vmem:[#allocation13] ss:$0 sm:$0xff] }
 0x6c2   :  { %1396 = vmatpush.msrb.mxu0 %v1204_v6 }
 0x6c3   :  { %1848 = vmatmul.msk.f32.gmra.mxu0 %vm1019_vm12, %v1221_v56  ;;  %v1528_v56 = vld [vmem:[%s2569_s13] sm:$0xff] }
 0x6c4   :  { %1607 = vmatpush.msra.mxu0 %v1531_v16 }
 0x6c6   :  { %1608 = vmatpush.msra.mxu0 %v1530_v24 }
 0x736   :  { %v1244_v59 = vpop.f32.mrf.mxu3 }
 0x737   :  { %1853 = vmatmul.msk.f32.vlgmr.msra.gmra.mxu3 %vm244_vm3, %v1244_v59 }
 0x738   :  { %v1267_v60 = vpop.f32.mrf.mxu0 }
 0x73e   :  { %v1247_v62 = vpop.f32.mrf.mxu3 }
 0x73f   :  { %1296 = vmatpush.msra.mxu1 %v1247_v62  ;;  %1854 = vmatmul.msk.f32.gmra.mxu3 %vm244_vm3, %v1247_v62 }
 0x740   :  { %v1270_v63 = vpop.f32.mrf.mxu0 }
 0x741   :  { %1297 = vmatpush.msra.mxu1 %v1244_v59  ;;  %1319 = vmatpush.msra.mxu2 %v1270_v63 }
 0x742   :  { %1849 = vmatmul.msk.f32.vlgmr.msra.gmra.mxu1 %vm1276_vm2, %v2250_v7 }
 0x743   :  { %1432 = vmatpush.msrb.mxu1 %v1247_v62  ;;  %1320 = vmatpush.msra.mxu2 %v1267_v60 }
 0x744   :  { %1851 = vmatmul.msk.f32.vlgmr.msra.gmra.mxu2 %vm1276_vm2, %v2250_v7 }
 0x745   :  { %1455 = vmatpush.msrb.mxu2 %v1270_v63  ;;  %1433 = vmatpush.msrb.mxu1 %v1244_v59 }
 0x747   :  { %1456 = vmatpush.msrb.mxu2 %v1267_v60  ;;  %1855 = vmatmul.msk.f32.gmra.mxu3 %vm244_vm3, %v1267_v60 }
 0x748   :  { %1488 = vmatpush.msra.mxu1 %v1215_v11 }
 0x74a   :  { %1850 = vmatmul.msk.f32.gmra.mxu1 %vm1276_vm2, %v2452_v3 }
 0x74b   :  { %1489 = vmatpush.msra.mxu1 %v1214_v12 }
 0x74c   :  { %1852 = vmatmul.msk.f32.gmra.mxu2 %vm1276_vm2, %v2452_v3 }
 0x74d   :  { %1490 = vmatpush.msra.mxu1 %v1213_v13 }
 0x74f   :  { %1856 = vmatmul.msk.f32.gmra.mxu3 %vm244_vm3, %v1270_v63  ;;  %1491 = vmatpush.msra.mxu1 %v1212_v14 }
 0x752   :  { %1861 = vmatmul.msk.f32.vlgmr.msrb.gmra.mxu1 %vm1276_vm2, %v2294_v18 }
 0x754   :  { %1863 = vmatmul.msk.f32.vlgmr.msrb.gmra.mxu2 %vm1276_vm2, %v2294_v18 }
 0x75a   :  { %1862 = vmatmul.msk.f32.gmra.mxu1 %vm1276_vm2, %v2465_v9 }
 0x75c   :  { %1864 = vmatmul.msk.f32.gmra.mxu2 %vm1276_vm2, %v2465_v9 }
 0x7ba   :  { %v1357_v25 = vpop.f32.mrf.mxu3 }
 0x7bf   :  { %v1299_v15 = vpop.f32.mrf.mxu1 }
 0x7c0   :  { %1857 = vmatmul.msk.f32.vlgmr.msrb.gmra.mxu0 %vm244_vm3, %v1299_v15 }
 0x7c2   :  { %v1360_v31 = vpop.f32.mrf.mxu3 }
 0x7c7   :  { %v1302_v4 = vpop.f32.mrf.mxu1  ;;  %v1322_v5 = vpop.f32.mrf.mxu2 }
 0x7c8   :  { %1858 = vmatmul.msk.f32.gmra.mxu0 %vm244_vm3, %v1302_v4 }
 0x7ca   :  { %v1363_v40 = vpop.f32.mrf.mxu3 }
 0x7cf   :  { %v1435_v19 = vpop.f32.mrf.mxu1  ;;  %v1325_v20 = vpop.f32.mrf.mxu2 }
 0x7d0   :  { %1859 = vmatmul.msk.f32.gmra.mxu0 %vm244_vm3, %v1322_v5  ;;  %1865 = vmatmul.msk.f32.vlgmr.msra.gmra.mxu1 %vm244_vm3, %v1435_v19 }
 0x7d2   :  { %v1366_v49 = vpop.f32.mrf.mxu3 }
 0x7d7   :  { %v1438_v21 = vpop.f32.mrf.mxu1  ;;  %v1458_v22 = vpop.f32.mrf.mxu2 }
 0x7d8   :  { %1860 = vmatmul.msk.f32.gmra.mxu0 %vm244_vm3, %v1325_v20  ;;  %1866 = vmatmul.msk.f32.gmra.mxu1 %vm244_vm3, %v1438_v21 }
 0x7df   :  { %v1461_v23 = vpop.f32.mrf.mxu2 }
 0x7e0   :  { %1867 = vmatmul.msk.f32.gmra.mxu1 %vm244_vm3, %v1458_v22 }
 0x7e8   :  { %1868 = vmatmul.msk.f32.gmra.mxu1 %vm244_vm3, %v1461_v23 }
 0x83d   :  { %v1398_v17 = vpop.f32.mrf.mxu0 }
 0x83e   :  { %v1399_v26 = vadd.f32 %v1398_v17, %v1357_v25 }
 0x845   :  { %v1401_v28 = vpop.f32.mrf.mxu0 }
 0x846   :  { %v1402_v34 = vadd.f32 %v1401_v28, %v1360_v31 }
 0x84d   :  { %v1493_v29 = vpop.f32.mrf.mxu1  ;;  %v1404_v38 = vpop.f32.mrf.mxu0 }
 0x84e   :  { %v1505_v30 = vadd.f32 %v1493_v29, %v1399_v26  ;;  %v1405_v42 = vadd.f32 %v1404_v38, %v1363_v40 }
 0x850   :  { %v1512_v32 = vadd.f32 %v1905_v27, %v1505_v30 }
 0x852   :  { %vm1516_vm3 = vcmp.ge.f32.partialorder %v1512_v32, 0.0  ;;  %v1520_v33 = vmul.f32 0.2, %v1512_v32 }
 0x854   :  { %v1524_v35 = vsel %vm1516_vm3, %v1512_v32, %v1520_v33 }
 0x855   :  { %v1496_v36 = vpop.f32.mrf.mxu1  ;;  %1873 = vmatmul.msk.f32.vlgmr.msra.gmra.mxu0 %vm1276_vm2, %v1524_v35  ;;  %v1407_v47 = vpop.f32.mrf.mxu0 }
 0x856   :  { %v1506_v37 = vadd.f32 %v1496_v36, %v1402_v34  ;;  %v1408_v50 = vadd.f32 %v1407_v47, %v1366_v49 }
 0x858   :  { %v1513_v39 = vadd.f32 %v1905_v27, %v1506_v37 }
 0x85a   :  { %v1521_v41 = vmul.f32 0.2, %v1513_v39  ;;  %vm1517_vm6 = vcmp.ge.f32.partialorder %v1513_v39, 0.0 }
 0x85c   :  { %v1525_v43 = vsel %vm1517_vm6, %v1513_v39, %v1521_v41 }
 0x85d   :  { %v1499_v44 = vpop.f32.mrf.mxu1  ;;  %1549 = vmatpush.msra.mxu2 %v1525_v43  ;;  %1874 = vmatmul.msk.f32.gmra.mxu0 %vm1276_vm2, %v1525_v43 }
 0x85e   :  { %v1507_v45 = vadd.f32 %v1499_v44, %v1405_v42 }
 0x85f   :  { %1550 = vmatpush.msra.mxu2 %v1524_v35 }
 0x860   :  { %v1514_v46 = vadd.f32 %v1905_v27, %v1507_v45  ;;  %1869 = vmatmul.msk.f32.vlgmr.msra.gmra.mxu2 %vm1276_vm2, %v2250_v7 }
 0x862   :  { %vm1518_vm7 = vcmp.ge.f32.partialorder %v1514_v46, 0.0  ;;  %v1522_v48 = vmul.f32 0.2, %v1514_v46 }
 0x864   :  { %v1526_v51 = vsel %vm1518_vm7, %v1514_v46, %v1522_v48 }
 0x865   :  { %v1502_v52 = vpop.f32.mrf.mxu1  ;;  %1875 = vmatmul.msk.f32.gmra.mxu0 %vm1276_vm2, %v1526_v51 }
 0x866   :  { %v1508_v1 = vadd.f32 %v1502_v52, %v1408_v50 }
 0x868   :  { %v1515_v53 = vadd.f32 %v1905_v27, %v1508_v1  ;;  %1870 = vmatmul.msk.f32.gmra.mxu2 %vm1276_vm2, %v2452_v3 }
 0x86a   :  { %v1523_v54 = vmul.f32 0.2, %v1515_v53  ;;  %vm1519_vm8 = vcmp.ge.f32.partialorder %v1515_v53, 0.0 }
 0x86c   :  { %v1527_v55 = vsel %vm1519_vm8, %v1515_v53, %v1523_v54 }
 0x86d   :  { %1572 = vmatpush.msrb.mxu3 %v1527_v55  ;;  %1876 = vmatmul.msk.f32.gmra.mxu0 %vm1276_vm2, %v1527_v55 }
 0x86e   :  { %1700 = vmatpush.msrb.mxu1 %v1527_v55 }
 0x86f   :  { %1573 = vmatpush.msrb.mxu3 %v1526_v51 }
 0x870   :  { %1701 = vmatpush.msrb.mxu1 %v1526_v51  ;;  %1871 = vmatmul.msk.f32.vlgmr.msrb.gmra.mxu3 %vm1276_vm2, %v2250_v7  ;;  %v1529_v7 = vld [vmem:[%s2569_s13 + $0x8] sm:$0xff] }
 0x871   :  { %1677 = vmatpush.msra.mxu3 %v1525_v43  ;;  %1883 = vmatmul.msk.f32.vlgmr.msrb.gmra.mxu1 %vm1276_vm2, %v2294_v18 }
 0x872   :  { %1648 = vmatpush.msrb.mxu2 %v1529_v7 }
 0x873   :  { %1678 = vmatpush.msra.mxu3 %v1524_v35 }
 0x874   :  { %1649 = vmatpush.msrb.mxu2 %v1528_v56 }
 0x875   :  { %1735 = vmatpush.msrb.mxu3 %v1533_v57 }
 0x878   :  { %1872 = vmatmul.msk.f32.gmra.mxu3 %vm1276_vm2, %v2452_v3 }
 0x879   :  { %1884 = vmatmul.msk.f32.gmra.mxu1 %vm1276_vm2, %v2465_v9 }
 0x880   :  { %1881 = vmatmul.msk.f32.vlgmr.msra.gmra.mxu3 %vm1276_vm2, %v2294_v18  ;;  %v1532_v18 = vld [vmem:[%s2569_s13 + $0x20] sm:$0xff]  ;;  %s2119_s13 = smov [#allocation14]  }
 0x881   :  { %1736 = vmatpush.msrb.mxu3 %v1532_v18  ;;  %s1769_s18 = sshll.u32 %s2119_s13, 4  ;;  %s1770_s18 = int_to_ptr.vmem [resolvable:$true] %s1769_s18 }
 0x888   :  { %1882 = vmatmul.msk.f32.gmra.mxu3 %vm1276_vm2, %v2465_v9 }
 0x8d2   :  { %v1610_v9 = vpop.f32.mrf.mxu0 }
 0x8da   :  { %v1613_v13 = vpop.f32.mrf.mxu0 }
 0x8e2   :  { %v1616_v21 = vpop.f32.mrf.mxu0 }
 0x8e3   :  { %v1552_v58 = vpop.f32.mrf.mxu2 }
 0x8e4   :  { %1877 = vmatmul.msk.f32.vlgmr.msrb.gmra.mxu2 %vm1276_vm2, %v1552_v58 }
 0x8ea   :  { %v1619_v25 = vpop.f32.mrf.mxu0 }
 0x8eb   :  { %v1555_v59 = vpop.f32.mrf.mxu2 }
 0x8ec   :  { %1878 = vmatmul.msk.f32.gmra.mxu2 %vm1276_vm2, %v1555_v59 }
 0x8ee   :  { %v1703_v0 = vpop.f32.mrf.mxu1 }
 0x8f3   :  { %v1575_v60 = vpop.f32.mrf.mxu3 }
 0x8f4   :  { %1879 = vmatmul.msk.f32.gmra.mxu2 %vm1276_vm2, %v1575_v60 }
 0x8f6   :  { %v1706_v3 = vpop.f32.mrf.mxu1 }
 0x8fb   :  { %v1578_v61 = vpop.f32.mrf.mxu3 }
 0x8fc   :  { %1880 = vmatmul.msk.f32.gmra.mxu2 %vm1276_vm2, %v1578_v61 }
 0x903   :  { %v1680_v62 = vpop.f32.mrf.mxu3 }
 0x904   :  { %1885 = vmatmul.msk.f32.vlgmr.msrb.gmra.mxu3 %vm1276_vm2, %v1680_v62 }
 0x90b   :  { %v1683_v63 = vpop.f32.mrf.mxu3 }
 0x90c   :  { %1886 = vmatmul.msk.f32.gmra.mxu3 %vm1276_vm2, %v1683_v63 }
 0x914   :  { %1887 = vmatmul.msk.f32.gmra.mxu3 %vm1276_vm2, %v1703_v0 }
 0x91c   :  { %1888 = vmatmul.msk.f32.gmra.mxu3 %vm1276_vm2, %v1706_v3 }
 0x967   :  { %v1651_v8 = vpop.f32.mrf.mxu2 }
 0x968   :  { %v1652_v10 = vadd.f32 %v1651_v8, %v1610_v9 }
 0x96f   :  { %v1654_v6 = vpop.f32.mrf.mxu2 }
 0x970   :  { %v1655_v15 = vadd.f32 %v1654_v6, %v1613_v13 }
 0x977   :  { %v1657_v19 = vpop.f32.mrf.mxu2 }
 0x978   :  { %v1658_v22 = vadd.f32 %v1657_v19, %v1616_v21 }
 0x97f   :  { %v1660_v17 = vpop.f32.mrf.mxu2 }
 0x980   :  { %v1661_v26 = vadd.f32 %v1660_v17, %v1619_v25 }
 0x987   :  { %v1738_v11 = vpop.f32.mrf.mxu3 }
 0x988   :  { %v1750_v12 = vadd.f32 %v1738_v11, %v1652_v10 }
 0x98a   :  { %v1757_v14 = vadd.f32 %v1906_v2, %v1750_v12 }
 0x98c   :  { %1761 = vst.msk [vmem:[#allocation14] sm:$0xff] %vm1276_vm2, %v1757_v14 }
 0x98f   :  { %v1741_v4 = vpop.f32.mrf.mxu3 }
 0x990   :  { %v1751_v5 = vadd.f32 %v1741_v4, %v1655_v15 }
 0x992   :  { %v1758_v20 = vadd.f32 %v1906_v2, %v1751_v5 }
 0x994   :  { %1762 = vst.msk [vmem:[#allocation14 + $0x8] sm:$0xff] %vm1276_vm2, %v1758_v20 }
 0x997   :  { %v1744_v23 = vpop.f32.mrf.mxu3 }
 0x998   :  { %v1752_v16 = vadd.f32 %v1744_v23, %v1658_v22 }
 0x99a   :  { %v1759_v24 = vadd.f32 %v1906_v2, %v1752_v16 }
 0x99c   :  { %1763 = vst.msk [vmem:[#allocation14 + $0x10] sm:$0xff] %vm1276_vm2, %v1759_v24 }
 0x99f   :  { %v1747_v27 = vpop.f32.mrf.mxu3 }
 0x9a0   :  { %v1753_v28 = vadd.f32 %v1747_v27, %v1661_v26 }
 0x9a2   :  { %v1760_v29 = vadd.f32 %v1906_v2, %v1753_v28 }
 0x9a4   :  { %1764 = vst.msk [vmem:[#allocation14 + $0x18] sm:$0xff] %vm1276_vm2, %v1760_v29 }
 0x9a5   :  { %1777 = dma.vmem_to_hbm [thread:$0]  %s1770_s18, 512, %s1772_s14, [#allocation4], %s2110_s26, %s2110_s26, %s2111_s27  }
 0x9a6   :  { %2107 = dma.done.wait [#allocation4], 512  }
 0x9a7   :  { %2108 = vsyncadd [#allocation4], 4294966784 }
 0x9a8   :  { %1782 = vsyncpa [#allocation3], 1 }
 0x9a9   :  { %1783 = vsyncpa [#allocation6], 1 }
 0x9aa   :  { %1784 = vsyncpa [#allocation9], 1 }
 0x9ab   :  { %1785 = vsyncpa [#allocation12], 1 }
 0x9ac   :  { %1786 = vsyncpa [#allocation4], 1 }

</bundles_post_ra>
